<compile_context>
chip_gen: v7x
topology: tpu7x:2x2x1
jax: 0.10.0
libtpu: 0.0.40
codegen_flags: <defaults>
</compile_context>

<pallas_src>
import functools

import jax
import jax.numpy as jnp
from jax.experimental import pallas as pl
from jax.experimental.pallas import tpu as pltpu


_VMEM = pl.BlockSpec(memory_space=pltpu.MemorySpace.VMEM)


def _round_up(x, m):
    return (x + m - 1) // m * m


# ---------------------------------------------------------------------------
# Pallas kernels
# ---------------------------------------------------------------------------
def _matmul_epilogue_kernel(x_ref, w_ref, b_ref, o_ref, *, relu):
    # x/w tiles are bf16; accumulate in f32 on the MXU, epilogue in f32.
    acc = jnp.dot(x_ref[...], w_ref[...], preferred_element_type=jnp.float32)
    acc = acc + b_ref[...]
    if relu:
        acc = jnp.maximum(acc, 0.0)
    o_ref[...] = acc.astype(o_ref.dtype)


def _matmul_res_epilogue_kernel(x_ref, w_ref, b_ref, r_ref, o_ref, *, relu):
    acc = jnp.dot(x_ref[...], w_ref[...], preferred_element_type=jnp.float32)
    acc = acc + b_ref[...] + r_ref[...]
    if relu:
        acc = jnp.maximum(acc, 0.0)
    o_ref[...] = acc.astype(o_ref.dtype)


def _pool_fc_kernel(x_ref, w_ref, b_ref, o_ref):
    # x_ref: (N, H*W, C). Mean scale is folded into w_ref, so just sum + FC.
    x = x_ref[...].astype(jnp.float32)
    pooled = jnp.sum(x, axis=1)                               # (N, C)
    out = jnp.dot(pooled, w_ref[...], preferred_element_type=jnp.float32)
    o_ref[...] = (out + b_ref[...]).astype(o_ref.dtype)


# ---------------------------------------------------------------------------
# Tiled fused matmul (+bias [+residual] [+ReLU]) wrapper
# ---------------------------------------------------------------------------
def matmul_bias(x, w, b, residual=None, relu=False, out_dtype=jnp.float32):
    """x: (M, K) bf16, w: (K, N) bf16, b: (N,) f32, residual: (M, N) f32 or None."""
    M, K = x.shape
    N = w.shape[1]

    # Tile sizes: M tiled to <=512 (8-aligned), N padded/tiled to 128 lanes.
    tm = min(512, _round_up(M, 8))
    tn = min(256, _round_up(N, 128))
    Mp = _round_up(M, tm)
    Np = _round_up(N, tn)

    if Mp != M:
        x = jnp.pad(x, ((0, Mp - M), (0, 0)))
    if Np != N:
        w = jnp.pad(w, ((0, 0), (0, Np - N)))
        b = jnp.pad(b, (0, Np - N))
    b2 = b.astype(jnp.float32).reshape(1, Np)

    grid = (Mp // tm, Np // tn)
    x_spec = pl.BlockSpec((tm, K), lambda i, j: (i, 0))
    w_spec = pl.BlockSpec((K, tn), lambda i, j: (0, j))
    b_spec = pl.BlockSpec((1, tn), lambda i, j: (0, j))
    o_spec = pl.BlockSpec((tm, tn), lambda i, j: (i, j))

    bytes_accessed = (x.size * x.dtype.itemsize + w.size * w.dtype.itemsize
                      + b2.size * 4 + Mp * Np * 4)

    if residual is None:
        kernel = functools.partial(_matmul_epilogue_kernel, relu=relu)
        in_specs = [x_spec, w_spec, b_spec]
        args = (x, w, b2)
    else:
        r = residual.astype(jnp.float32)
        if Mp != M or Np != N:
            r = jnp.pad(r, ((0, Mp - M), (0, Np - N)))
        bytes_accessed += r.size * 4
        kernel = functools.partial(_matmul_res_epilogue_kernel, relu=relu)
        r_spec = pl.BlockSpec((tm, tn), lambda i, j: (i, j))
        in_specs = [x_spec, w_spec, b_spec, r_spec]
        args = (x, w, b2, r)

    out = pl.pallas_call(
        kernel,
        out_shape=jax.ShapeDtypeStruct((Mp, Np), out_dtype),
        grid=grid,
        in_specs=in_specs,
        out_specs=o_spec,
        compiler_params=pltpu.CompilerParams(
            dimension_semantics=("parallel", "parallel"),
            vmem_limit_bytes=32 * 1024 * 1024,
        ),
        cost_estimate=pl.CostEstimate(
            flops=2 * Mp * K * Np,
            transcendentals=0,
            bytes_accessed=bytes_accessed,
        ),
    )(*args)

    if Mp != M or Np != N:
        out = out[:M, :N]
    return out


def conv2d(x_nhwc, w_oihw, b, stride=1, padding=1, relu=False, residual=None):
    """2D conv via im2col (XLA glue, bf16) + fused tiled Pallas matmul kernel.

    x_nhwc:  (N, H, W, Cin) f32
    w_oihw:  (Cout, Cin, KH, KW)  -- PyTorch weight layout
    residual (optional): (N, Ho, Wo, Cout), added before the final ReLU.
    stride/padding must be Python ints.
    """
    N, H, W, Cin = x_nhwc.shape
    Cout, _, KH, KW = w_oihw.shape
    Ho = (H + 2 * padding - KH) // stride + 1
    Wo = (W + 2 * padding - KW) // stride + 1

    x_bf = x_nhwc.astype(jnp.bfloat16)          # halves im2col HBM traffic
    if padding:
        x_bf = jnp.pad(
            x_bf, ((0, 0), (padding, padding), (padding, padding), (0, 0)))

    parts = []
    for kh in range(KH):
        for kw in range(KW):
            parts.append(
                x_bf[:,
                     kh:kh + stride * (Ho - 1) + 1:stride,
                     kw:kw + stride * (Wo - 1) + 1:stride,
                     :])
    patches = parts[0] if len(parts) == 1 else jnp.concatenate(parts, axis=-1)
    xm = patches.reshape(N * Ho * Wo, KH * KW * Cin)

    # weight -> (KH*KW*Cin, Cout), matching patch channel ordering (kh, kw, cin)
    wm = jnp.transpose(w_oihw, (2, 3, 1, 0)).reshape(
        KH * KW * Cin, Cout).astype(jnp.bfloat16)

    res = residual.reshape(N * Ho * Wo, Cout) if residual is not None else None
    y = matmul_bias(xm, wm, b, residual=res, relu=relu)
    return y.reshape(N, Ho, Wo, Cout)


def avgpool_fc(x_nhwc, w_fc_torch, b_fc):
    """Global average pool over H,W then Linear, fused in one Pallas kernel."""
    N, H, W, C = x_nhwc.shape
    classes = w_fc_torch.shape[0]
    cpad = _round_up(classes, 128)

    xf = x_nhwc.reshape(N, H * W, C)
    # fold the 1/(H*W) mean scale into the FC weights; pad classes to 128 lanes
    wf = (jnp.transpose(w_fc_torch).astype(jnp.float32) / jnp.float32(H * W))
    wf = jnp.pad(wf, ((0, 0), (0, cpad - classes)))
    bf = jnp.pad(b_fc.astype(jnp.float32), (0, cpad - classes)).reshape(1, cpad)

    out = pl.pallas_call(
        _pool_fc_kernel,
        out_shape=jax.ShapeDtypeStruct((N, cpad), jnp.float32),
        in_specs=[_VMEM, _VMEM, _VMEM],
        out_specs=_VMEM,
    )(xf, wf, bf)
    return out[:, :classes]


# ---------------------------------------------------------------------------
# Parameters (deterministic synthetic init, PyTorch weight layouts).
# Returns (params pytree of arrays, static arch description).
# ---------------------------------------------------------------------------
def _init_conv(key, cout, cin, kh, kw):
    kw_, kb_ = jax.random.split(key)
    fan_in = cin * kh * kw
    w = jax.random.normal(kw_, (cout, cin, kh, kw), jnp.float32) / jnp.sqrt(
        jnp.float32(fan_in))
    b = 0.01 * jax.random.normal(kb_, (cout,), jnp.float32)
    return w, b


def init_wresnet_params(key, layers=(1, 1, 1), factor=1, in_channels=3, classes=10):
    keys = iter(jax.random.split(key, 128))
    params = {}
    params["layer0"] = _init_conv(next(keys), 16, in_channels, 3, 3)

    def make_layer(count, cin, cout, stride):
        blks, descs = [], []
        for i in range(count):
            s = stride if i == 0 else 1
            ci = cin if i == 0 else cout
            blk = {
                "conv1": _init_conv(next(keys), cout, ci, 3, 3),
                "conv2": _init_conv(next(keys), cout, cout, 3, 3),
            }
            has_sc = (s != 1 or ci != cout)
            if has_sc:
                blk["shortcut"] = _init_conv(next(keys), cout, ci, 1, 1)
            blks.append(blk)
            descs.append((s, has_sc))          # static Python ints/bools
        return blks, tuple(descs)

    params["layer1"], a1 = make_layer(layers[0], 16, 16 * factor, 1)
    params["layer2"], a2 = make_layer(layers[1], 16 * factor, 32 * factor, 2)
    params["layer3"], a3 = make_layer(layers[2], 32 * factor, 64 * factor, 2)
    arch = (a1, a2, a3)

    kf1, kf2 = jax.random.split(next(keys))
    wf = jax.random.normal(kf1, (classes, 64 * factor), jnp.float32) / jnp.sqrt(
        jnp.float32(64 * factor))
    bf = 0.01 * jax.random.normal(kf2, (classes,), jnp.float32)
    params["fc"] = (wf, bf)
    return params, arch


# ---------------------------------------------------------------------------
# Forward pass
# ---------------------------------------------------------------------------
def _basic_block(x, blk, stride, has_shortcut):
    w1, b1 = blk["conv1"]
    w2, b2 = blk["conv2"]
    out = conv2d(x, w1, b1, stride=stride, padding=1, relu=True)
    if has_shortcut:
        ws, bs = blk["shortcut"]
        res = conv2d(x, ws, bs, stride=stride, padding=0, relu=False)
    else:
        res = x
    # conv2 + bias + residual + ReLU fused in one Pallas kernel
    return conv2d(out, w2, b2, stride=1, padding=1, relu=True, residual=res)


def wresnet_forward(params, x_nchw, arch):
    x = jnp.transpose(x_nchw, (0, 2, 3, 1))               # NCHW -> NHWC
    w0, b0 = params["layer0"]
    x = conv2d(x, w0, b0, stride=1, padding=1, relu=True)
    for name, layer_arch in zip(("layer1", "layer2", "layer3"), arch):
        for blk, (stride, has_sc) in zip(params[name], layer_arch):
            x = _basic_block(x, blk, stride, has_sc)
    wf, bf = params["fc"]
    return avgpool_fc(x, wf, bf)                           # (N, classes)


# ---------------------------------------------------------------------------
if __name__ == "__main__":
    key = jax.random.PRNGKey(0)
    k_param, k_data = jax.random.split(key)

    # WResNet(layers=[1,1,1], factor=1, in_channels=3, classes=10)
    params, arch = init_wresnet_params(
        k_param, layers=(1, 1, 1), factor=1, in_channels=3, classes=10)

    # small CIFAR-like input, NCHW as in PyTorch
    x = jax.random.normal(k_data, (2, 3, 16, 16), jnp.float32)

    fwd = jax.jit(functools.partial(wresnet_forward, arch=arch))
    logits = fwd(params, x)
    jax.block_until_ready(logits)
    assert logits.shape == (2, 10) and logits.dtype == jnp.float32
    print("KERNEL_OK")
</pallas_src>

<mosaic_0001>
module attributes {stable_mosaic.version = 11 : i64} {
  func.func @_matmul_epilogue_kernel(%arg0: i32, %arg1: i32, %arg2: memref<512x27xbf16, #tpu.memory_space<vmem>>, %arg3: memref<27x128xbf16, #tpu.memory_space<vmem>>, %arg4: memref<1x128xf32, #tpu.memory_space<vmem>>, %arg5: memref<512x128xf32, #tpu.memory_space<vmem>>) attributes {dimension_semantics = [#tpu.dimension_semantics<parallel>, #tpu.dimension_semantics<parallel>], iteration_bounds = array<i64: 1, 1>, scalar_prefetch = 0 : i64, scratch_operands = 0 : i64, tpu.core_type = #tpu.core_type<tc>, window_params = [{transform_indices = @transform_0, window_bounds = array<i64: 512, 27>}, {transform_indices = @transform_1, window_bounds = array<i64: 27, 128>}, {transform_indices = @transform_2, window_bounds = array<i64: 1, 128>}, {transform_indices = @transform_3, window_bounds = array<i64: 512, 128>}]} {
    %c0 = arith.constant 0 : index
    %c0_0 = arith.constant 0 : index
    %0 = vector.load %arg2[%c0, %c0_0] : memref<512x27xbf16, #tpu.memory_space<vmem>>, vector<512x27xbf16>
    %c0_1 = arith.constant 0 : index
    %c0_2 = arith.constant 0 : index
    %1 = vector.load %arg3[%c0_1, %c0_2] : memref<27x128xbf16, #tpu.memory_space<vmem>>, vector<27x128xbf16>
    %cst = arith.constant dense<0.000000e+00> : vector<512x128xf32>
    %2 = tpu.matmul %0, %1, %cst {dimension_numbers = #tpu.dot_dimension_numbers<[1], [0], [0], [1], [0, 0, 1, 1], [], []>} : vector<512x27xbf16>, vector<27x128xbf16>, vector<512x128xf32> -> vector<512x128xf32>
    %c0_3 = arith.constant 0 : index
    %c0_4 = arith.constant 0 : index
    %3 = vector.load %arg4[%c0_3, %c0_4] : memref<1x128xf32, #tpu.memory_space<vmem>>, vector<1x128xf32>
    %4 = vector.broadcast %3 : vector<1x128xf32> to vector<512x128xf32>
    %5 = arith.addf %2, %4 : vector<512x128xf32>
    %cst_5 = arith.constant 0.000000e+00 : f32
    %6 = vector.broadcast %cst_5 : f32 to vector<512x128xf32>
    %7 = arith.maximumf %5, %6 : vector<512x128xf32>
    %c0_6 = arith.constant 0 : index
    %c0_7 = arith.constant 0 : index
    %8 = vector.load %arg5[%c0_6, %c0_7] : memref<512x128xf32, #tpu.memory_space<vmem>>, vector<512x128xf32>
    tpu.vector_store %arg5[%c0_6, %c0_7], %7 {strides = array<i32>} : memref<512x128xf32, #tpu.memory_space<vmem>>, vector<512x128xf32>,
    return
  }
  func.func @transform_0(%arg0: i32, %arg1: i32) -> (i32, i32) {
    %c0_i32 = arith.constant 0 : i32
    %c0_i32_0 = arith.constant 0 : i32
    return %arg0, %c0_i32 : i32, i32
  }
  func.func @transform_1(%arg0: i32, %arg1: i32) -> (i32, i32) {
    %c0_i32 = arith.constant 0 : i32
    %c0_i32_0 = arith.constant 0 : i32
    return %c0_i32, %arg1 : i32, i32
  }
  func.func @transform_2(%arg0: i32, %arg1: i32) -> (i32, i32) {
    %c0_i32 = arith.constant 0 : i32
    %c0_i32_0 = arith.constant 0 : i32
    return %c0_i32, %arg1 : i32, i32
  }
  func.func @transform_3(%arg0: i32, %arg1: i32) -> (i32, i32) {
    %c0_i32 = arith.constant 0 : i32
    return %arg0, %arg1 : i32, i32
  }
}

module attributes {stable_mosaic.version = 11 : i64} {
  func.func @_matmul_epilogue_kernel(%arg0: i32, %arg1: i32, %arg2: memref<512x144xbf16, #tpu.memory_space<vmem>>, %arg3: memref<144x128xbf16, #tpu.memory_space<vmem>>, %arg4: memref<1x128xf32, #tpu.memory_space<vmem>>, %arg5: memref<512x128xf32, #tpu.memory_space<vmem>>) attributes {dimension_semantics = [#tpu.dimension_semantics<parallel>, #tpu.dimension_semantics<parallel>], iteration_bounds = array<i64: 1, 1>, scalar_prefetch = 0 : i64, scratch_operands = 0 : i64, tpu.core_type = #tpu.core_type<tc>, window_params = [{transform_indices = @transform_0, window_bounds = array<i64: 512, 144>}, {transform_indices = @transform_1, window_bounds = array<i64: 144, 128>}, {transform_indices = @transform_2, window_bounds = array<i64: 1, 128>}, {transform_indices = @transform_3, window_bounds = array<i64: 512, 128>}]} {
    %c0 = arith.constant 0 : index
    %c0_0 = arith.constant 0 : index
    %0 = vector.load %arg2[%c0, %c0_0] : memref<512x144xbf16, #tpu.memory_space<vmem>>, vector<512x144xbf16>
    %c0_1 = arith.constant 0 : index
    %c0_2 = arith.constant 0 : index
    %1 = vector.load %arg3[%c0_1, %c0_2] : memref<144x128xbf16, #tpu.memory_space<vmem>>, vector<144x128xbf16>
    %cst = arith.constant dense<0.000000e+00> : vector<512x128xf32>
    %2 = tpu.matmul %0, %1, %cst {dimension_numbers = #tpu.dot_dimension_numbers<[1], [0], [0], [1], [0, 0, 1, 1], [], []>} : vector<512x144xbf16>, vector<144x128xbf16>, vector<512x128xf32> -> vector<512x128xf32>
    %c0_3 = arith.constant 0 : index
    %c0_4 = arith.constant 0 : index
    %3 = vector.load %arg4[%c0_3, %c0_4] : memref<1x128xf32, #tpu.memory_space<vmem>>, vector<1x128xf32>
    %4 = vector.broadcast %3 : vector<1x128xf32> to vector<512x128xf32>
    %5 = arith.addf %2, %4 : vector<512x128xf32>
    %cst_5 = arith.constant 0.000000e+00 : f32
    %6 = vector.broadcast %cst_5 : f32 to vector<512x128xf32>
    %7 = arith.maximumf %5, %6 : vector<512x128xf32>
    %c0_6 = arith.constant 0 : index
    %c0_7 = arith.constant 0 : index
    %8 = vector.load %arg5[%c0_6, %c0_7] : memref<512x128xf32, #tpu.memory_space<vmem>>, vector<512x128xf32>
    tpu.vector_store %arg5[%c0_6, %c0_7], %7 {strides = array<i32>} : memref<512x128xf32, #tpu.memory_space<vmem>>, vector<512x128xf32>,
    return
  }
  func.func @transform_0(%arg0: i32, %arg1: i32) -> (i32, i32) {
    %c0_i32 = arith.constant 0 : i32
    %c0_i32_0 = arith.constant 0 : i32
    return %arg0, %c0_i32 : i32, i32
  }
  func.func @transform_1(%arg0: i32, %arg1: i32) -> (i32, i32) {
    %c0_i32 = arith.constant 0 : i32
    %c0_i32_0 = arith.constant 0 : i32
    return %c0_i32, %arg1 : i32, i32
  }
  func.func @transform_2(%arg0: i32, %arg1: i32) -> (i32, i32) {
    %c0_i32 = arith.constant 0 : i32
    %c0_i32_0 = arith.constant 0 : i32
    return %c0_i32, %arg1 : i32, i32
  }
  func.func @transform_3(%arg0: i32, %arg1: i32) -> (i32, i32) {
    %c0_i32 = arith.constant 0 : i32
    return %arg0, %arg1 : i32, i32
  }
}

module attributes {stable_mosaic.version = 11 : i64} {
  func.func @_matmul_res_epilogue_kernel(%arg0: i32, %arg1: i32, %arg2: memref<512x144xbf16, #tpu.memory_space<vmem>>, %arg3: memref<144x128xbf16, #tpu.memory_space<vmem>>, %arg4: memref<1x128xf32, #tpu.memory_space<vmem>>, %arg5: memref<512x128xf32, #tpu.memory_space<vmem>>, %arg6: memref<512x128xf32, #tpu.memory_space<vmem>>) attributes {dimension_semantics = [#tpu.dimension_semantics<parallel>, #tpu.dimension_semantics<parallel>], iteration_bounds = array<i64: 1, 1>, scalar_prefetch = 0 : i64, scratch_operands = 0 : i64, tpu.core_type = #tpu.core_type<tc>, window_params = [{transform_indices = @transform_0, window_bounds = array<i64: 512, 144>}, {transform_indices = @transform_1, window_bounds = array<i64: 144, 128>}, {transform_indices = @transform_2, window_bounds = array<i64: 1, 128>}, {transform_indices = @transform_3, window_bounds = array<i64: 512, 128>}, {transform_indices = @transform_4, window_bounds = array<i64: 512, 128>}]} {
    %c0 = arith.constant 0 : index
    %c0_0 = arith.constant 0 : index
    %0 = vector.load %arg2[%c0, %c0_0] : memref<512x144xbf16, #tpu.memory_space<vmem>>, vector<512x144xbf16>
    %c0_1 = arith.constant 0 : index
    %c0_2 = arith.constant 0 : index
    %1 = vector.load %arg3[%c0_1, %c0_2] : memref<144x128xbf16, #tpu.memory_space<vmem>>, vector<144x128xbf16>
    %cst = arith.constant dense<0.000000e+00> : vector<512x128xf32>
    %2 = tpu.matmul %0, %1, %cst {dimension_numbers = #tpu.dot_dimension_numbers<[1], [0], [0], [1], [0, 0, 1, 1], [], []>} : vector<512x144xbf16>, vector<144x128xbf16>, vector<512x128xf32> -> vector<512x128xf32>
    %c0_3 = arith.constant 0 : index
    %c0_4 = arith.constant 0 : index
    %3 = vector.load %arg4[%c0_3, %c0_4] : memref<1x128xf32, #tpu.memory_space<vmem>>, vector<1x128xf32>
    %4 = vector.broadcast %3 : vector<1x128xf32> to vector<512x128xf32>
    %5 = arith.addf %2, %4 : vector<512x128xf32>
    %c0_5 = arith.constant 0 : index
    %c0_6 = arith.constant 0 : index
    %6 = vector.load %arg5[%c0_5, %c0_6] : memref<512x128xf32, #tpu.memory_space<vmem>>, vector<512x128xf32>
    %7 = arith.addf %5, %6 : vector<512x128xf32>
    %cst_7 = arith.constant 0.000000e+00 : f32
    %8 = vector.broadcast %cst_7 : f32 to vector<512x128xf32>
    %9 = arith.maximumf %7, %8 : vector<512x128xf32>
    %c0_8 = arith.constant 0 : index
    %c0_9 = arith.constant 0 : index
    %10 = vector.load %arg6[%c0_8, %c0_9] : memref<512x128xf32, #tpu.memory_space<vmem>>, vector<512x128xf32>
    tpu.vector_store %arg6[%c0_8, %c0_9], %9 {strides = array<i32>} : memref<512x128xf32, #tpu.memory_space<vmem>>, vector<512x128xf32>,
    return
  }
  func.func @transform_0(%arg0: i32, %arg1: i32) -> (i32, i32) {
    %c0_i32 = arith.constant 0 : i32
    %c0_i32_0 = arith.constant 0 : i32
    return %arg0, %c0_i32 : i32, i32
  }
  func.func @transform_1(%arg0: i32, %arg1: i32) -> (i32, i32) {
    %c0_i32 = arith.constant 0 : i32
    %c0_i32_0 = arith.constant 0 : i32
    return %c0_i32, %arg1 : i32, i32
  }
  func.func @transform_2(%arg0: i32, %arg1: i32) -> (i32, i32) {
    %c0_i32 = arith.constant 0 : i32
    %c0_i32_0 = arith.constant 0 : i32
    return %c0_i32, %arg1 : i32, i32
  }
  func.func @transform_3(%arg0: i32, %arg1: i32) -> (i32, i32) {
    %c0_i32 = arith.constant 0 : i32
    return %arg0, %arg1 : i32, i32
  }
  func.func @transform_4(%arg0: i32, %arg1: i32) -> (i32, i32) {
    %c0_i32 = arith.constant 0 : i32
    return %arg0, %arg1 : i32, i32
  }
}

module attributes {stable_mosaic.version = 11 : i64} {
  func.func @_matmul_epilogue_kernel(%arg0: i32, %arg1: i32, %arg2: memref<128x144xbf16, #tpu.memory_space<vmem>>, %arg3: memref<144x128xbf16, #tpu.memory_space<vmem>>, %arg4: memref<1x128xf32, #tpu.memory_space<vmem>>, %arg5: memref<128x128xf32, #tpu.memory_space<vmem>>) attributes {dimension_semantics = [#tpu.dimension_semantics<parallel>, #tpu.dimension_semantics<parallel>], iteration_bounds = array<i64: 1, 1>, scalar_prefetch = 0 : i64, scratch_operands = 0 : i64, tpu.core_type = #tpu.core_type<tc>, window_params = [{transform_indices = @transform_0, window_bounds = array<i64: 128, 144>}, {transform_indices = @transform_1, window_bounds = array<i64: 144, 128>}, {transform_indices = @transform_2, window_bounds = array<i64: 1, 128>}, {transform_indices = @transform_3, window_bounds = array<i64: 128, 128>}]} {
    %c0 = arith.constant 0 : index
    %c0_0 = arith.constant 0 : index
    %0 = vector.load %arg2[%c0, %c0_0] : memref<128x144xbf16, #tpu.memory_space<vmem>>, vector<128x144xbf16>
    %c0_1 = arith.constant 0 : index
    %c0_2 = arith.constant 0 : index
    %1 = vector.load %arg3[%c0_1, %c0_2] : memref<144x128xbf16, #tpu.memory_space<vmem>>, vector<144x128xbf16>
    %cst = arith.constant dense<0.000000e+00> : vector<128x128xf32>
    %2 = tpu.matmul %0, %1, %cst {dimension_numbers = #tpu.dot_dimension_numbers<[1], [0], [0], [1], [0, 0, 1, 1], [], []>} : vector<128x144xbf16>, vector<144x128xbf16>, vector<128x128xf32> -> vector<128x128xf32>
    %c0_3 = arith.constant 0 : index
    %c0_4 = arith.constant 0 : index
    %3 = vector.load %arg4[%c0_3, %c0_4] : memref<1x128xf32, #tpu.memory_space<vmem>>, vector<1x128xf32>
    %4 = vector.broadcast %3 : vector<1x128xf32> to vector<128x128xf32>
    %5 = arith.addf %2, %4 : vector<128x128xf32>
    %cst_5 = arith.constant 0.000000e+00 : f32
    %6 = vector.broadcast %cst_5 : f32 to vector<128x128xf32>
    %7 = arith.maximumf %5, %6 : vector<128x128xf32>
    %c0_6 = arith.constant 0 : index
    %c0_7 = arith.constant 0 : index
    %8 = vector.load %arg5[%c0_6, %c0_7] : memref<128x128xf32, #tpu.memory_space<vmem>>, vector<128x128xf32>
    tpu.vector_store %arg5[%c0_6, %c0_7], %7 {strides = array<i32>} : memref<128x128xf32, #tpu.memory_space<vmem>>, vector<128x128xf32>,
    return
  }
  func.func @transform_0(%arg0: i32, %arg1: i32) -> (i32, i32) {
    %c0_i32 = arith.constant 0 : i32
    %c0_i32_0 = arith.constant 0 : i32
    return %arg0, %c0_i32 : i32, i32
  }
  func.func @transform_1(%arg0: i32, %arg1: i32) -> (i32, i32) {
    %c0_i32 = arith.constant 0 : i32
    %c0_i32_0 = arith.constant 0 : i32
    return %c0_i32, %arg1 : i32, i32
  }
  func.func @transform_2(%arg0: i32, %arg1: i32) -> (i32, i32) {
    %c0_i32 = arith.constant 0 : i32
    %c0_i32_0 = arith.constant 0 : i32
    return %c0_i32, %arg1 : i32, i32
  }
  func.func @transform_3(%arg0: i32, %arg1: i32) -> (i32, i32) {
    %c0_i32 = arith.constant 0 : i32
    return %arg0, %arg1 : i32, i32
  }
}

module attributes {stable_mosaic.version = 11 : i64} {
  func.func @_matmul_epilogue_kernel(%arg0: i32, %arg1: i32, %arg2: memref<128x16xbf16, #tpu.memory_space<vmem>>, %arg3: memref<16x128xbf16, #tpu.memory_space<vmem>>, %arg4: memref<1x128xf32, #tpu.memory_space<vmem>>, %arg5: memref<128x128xf32, #tpu.memory_space<vmem>>) attributes {dimension_semantics = [#tpu.dimension_semantics<parallel>, #tpu.dimension_semantics<parallel>], iteration_bounds = array<i64: 1, 1>, scalar_prefetch = 0 : i64, scratch_operands = 0 : i64, tpu.core_type = #tpu.core_type<tc>, window_params = [{transform_indices = @transform_0, window_bounds = array<i64: 128, 16>}, {transform_indices = @transform_1, window_bounds = array<i64: 16, 128>}, {transform_indices = @transform_2, window_bounds = array<i64: 1, 128>}, {transform_indices = @transform_3, window_bounds = array<i64: 128, 128>}]} {
    %c0 = arith.constant 0 : index
    %c0_0 = arith.constant 0 : index
    %0 = vector.load %arg2[%c0, %c0_0] : memref<128x16xbf16, #tpu.memory_space<vmem>>, vector<128x16xbf16>
    %c0_1 = arith.constant 0 : index
    %c0_2 = arith.constant 0 : index
    %1 = vector.load %arg3[%c0_1, %c0_2] : memref<16x128xbf16, #tpu.memory_space<vmem>>, vector<16x128xbf16>
    %cst = arith.constant dense<0.000000e+00> : vector<128x128xf32>
    %2 = tpu.matmul %0, %1, %cst {dimension_numbers = #tpu.dot_dimension_numbers<[1], [0], [0], [1], [0, 0, 1, 1], [], []>} : vector<128x16xbf16>, vector<16x128xbf16>, vector<128x128xf32> -> vector<128x128xf32>
    %c0_3 = arith.constant 0 : index
    %c0_4 = arith.constant 0 : index
    %3 = vector.load %arg4[%c0_3, %c0_4] : memref<1x128xf32, #tpu.memory_space<vmem>>, vector<1x128xf32>
    %4 = vector.broadcast %3 : vector<1x128xf32> to vector<128x128xf32>
    %5 = arith.addf %2, %4 : vector<128x128xf32>
    %c0_5 = arith.constant 0 : index
    %c0_6 = arith.constant 0 : index
    %6 = vector.load %arg5[%c0_5, %c0_6] : memref<128x128xf32, #tpu.memory_space<vmem>>, vector<128x128xf32>
    tpu.vector_store %arg5[%c0_5, %c0_6], %5 {strides = array<i32>} : memref<128x128xf32, #tpu.memory_space<vmem>>, vector<128x128xf32>,
    return
  }
  func.func @transform_0(%arg0: i32, %arg1: i32) -> (i32, i32) {
    %c0_i32 = arith.constant 0 : i32
    %c0_i32_0 = arith.constant 0 : i32
    return %arg0, %c0_i32 : i32, i32
  }
  func.func @transform_1(%arg0: i32, %arg1: i32) -> (i32, i32) {
    %c0_i32 = arith.constant 0 : i32
    %c0_i32_0 = arith.constant 0 : i32
    return %c0_i32, %arg1 : i32, i32
  }
  func.func @transform_2(%arg0: i32, %arg1: i32) -> (i32, i32) {
    %c0_i32 = arith.constant 0 : i32
    %c0_i32_0 = arith.constant 0 : i32
    return %c0_i32, %arg1 : i32, i32
  }
  func.func @transform_3(%arg0: i32, %arg1: i32) -> (i32, i32) {
    %c0_i32 = arith.constant 0 : i32
    return %arg0, %arg1 : i32, i32
  }
}

module attributes {stable_mosaic.version = 11 : i64} {
  func.func @_matmul_res_epilogue_kernel(%arg0: i32, %arg1: i32, %arg2: memref<128x288xbf16, #tpu.memory_space<vmem>>, %arg3: memref<288x128xbf16, #tpu.memory_space<vmem>>, %arg4: memref<1x128xf32, #tpu.memory_space<vmem>>, %arg5: memref<128x128xf32, #tpu.memory_space<vmem>>, %arg6: memref<128x128xf32, #tpu.memory_space<vmem>>) attributes {dimension_semantics = [#tpu.dimension_semantics<parallel>, #tpu.dimension_semantics<parallel>], iteration_bounds = array<i64: 1, 1>, scalar_prefetch = 0 : i64, scratch_operands = 0 : i64, tpu.core_type = #tpu.core_type<tc>, window_params = [{transform_indices = @transform_0, window_bounds = array<i64: 128, 288>}, {transform_indices = @transform_1, window_bounds = array<i64: 288, 128>}, {transform_indices = @transform_2, window_bounds = array<i64: 1, 128>}, {transform_indices = @transform_3, window_bounds = array<i64: 128, 128>}, {transform_indices = @transform_4, window_bounds = array<i64: 128, 128>}]} {
    %c0 = arith.constant 0 : index
    %c0_0 = arith.constant 0 : index
    %0 = vector.load %arg2[%c0, %c0_0] : memref<128x288xbf16, #tpu.memory_space<vmem>>, vector<128x288xbf16>
    %c0_1 = arith.constant 0 : index
    %c0_2 = arith.constant 0 : index
    %1 = vector.load %arg3[%c0_1, %c0_2] : memref<288x128xbf16, #tpu.memory_space<vmem>>, vector<288x128xbf16>
    %cst = arith.constant dense<0.000000e+00> : vector<128x128xf32>
    %2 = tpu.matmul %0, %1, %cst {dimension_numbers = #tpu.dot_dimension_numbers<[1], [0], [0], [1], [0, 0, 1, 1], [], []>} : vector<128x288xbf16>, vector<288x128xbf16>, vector<128x128xf32> -> vector<128x128xf32>
    %c0_3 = arith.constant 0 : index
    %c0_4 = arith.constant 0 : index
    %3 = vector.load %arg4[%c0_3, %c0_4] : memref<1x128xf32, #tpu.memory_space<vmem>>, vector<1x128xf32>
    %4 = vector.broadcast %3 : vector<1x128xf32> to vector<128x128xf32>
    %5 = arith.addf %2, %4 : vector<128x128xf32>
    %c0_5 = arith.constant 0 : index
    %c0_6 = arith.constant 0 : index
    %6 = vector.load %arg5[%c0_5, %c0_6] : memref<128x128xf32, #tpu.memory_space<vmem>>, vector<128x128xf32>
    %7 = arith.addf %5, %6 : vector<128x128xf32>
    %cst_7 = arith.constant 0.000000e+00 : f32
    %8 = vector.broadcast %cst_7 : f32 to vector<128x128xf32>
    %9 = arith.maximumf %7, %8 : vector<128x128xf32>
    %c0_8 = arith.constant 0 : index
    %c0_9 = arith.constant 0 : index
    %10 = vector.load %arg6[%c0_8, %c0_9] : memref<128x128xf32, #tpu.memory_space<vmem>>, vector<128x128xf32>
    tpu.vector_store %arg6[%c0_8, %c0_9], %9 {strides = array<i32>} : memref<128x128xf32, #tpu.memory_space<vmem>>, vector<128x128xf32>,
    return
  }
  func.func @transform_0(%arg0: i32, %arg1: i32) -> (i32, i32) {
    %c0_i32 = arith.constant 0 : i32
    %c0_i32_0 = arith.constant 0 : i32
    return %arg0, %c0_i32 : i32, i32
  }
  func.func @transform_1(%arg0: i32, %arg1: i32) -> (i32, i32) {
    %c0_i32 = arith.constant 0 : i32
    %c0_i32_0 = arith.constant 0 : i32
    return %c0_i32, %arg1 : i32, i32
  }
  func.func @transform_2(%arg0: i32, %arg1: i32) -> (i32, i32) {
    %c0_i32 = arith.constant 0 : i32
    %c0_i32_0 = arith.constant 0 : i32
    return %c0_i32, %arg1 : i32, i32
  }
  func.func @transform_3(%arg0: i32, %arg1: i32) -> (i32, i32) {
    %c0_i32 = arith.constant 0 : i32
    return %arg0, %arg1 : i32, i32
  }
  func.func @transform_4(%arg0: i32, %arg1: i32) -> (i32, i32) {
    %c0_i32 = arith.constant 0 : i32
    return %arg0, %arg1 : i32, i32
  }
}

module attributes {stable_mosaic.version = 11 : i64} {
  func.func @_matmul_epilogue_kernel(%arg0: i32, %arg1: i32, %arg2: memref<32x288xbf16, #tpu.memory_space<vmem>>, %arg3: memref<288x128xbf16, #tpu.memory_space<vmem>>, %arg4: memref<1x128xf32, #tpu.memory_space<vmem>>, %arg5: memref<32x128xf32, #tpu.memory_space<vmem>>) attributes {dimension_semantics = [#tpu.dimension_semantics<parallel>, #tpu.dimension_semantics<parallel>], iteration_bounds = array<i64: 1, 1>, scalar_prefetch = 0 : i64, scratch_operands = 0 : i64, tpu.core_type = #tpu.core_type<tc>, window_params = [{transform_indices = @transform_0, window_bounds = array<i64: 32, 288>}, {transform_indices = @transform_1, window_bounds = array<i64: 288, 128>}, {transform_indices = @transform_2, window_bounds = array<i64: 1, 128>}, {transform_indices = @transform_3, window_bounds = array<i64: 32, 128>}]} {
    %c0 = arith.constant 0 : index
    %c0_0 = arith.constant 0 : index
    %0 = vector.load %arg2[%c0, %c0_0] : memref<32x288xbf16, #tpu.memory_space<vmem>>, vector<32x288xbf16>
    %c0_1 = arith.constant 0 : index
    %c0_2 = arith.constant 0 : index
    %1 = vector.load %arg3[%c0_1, %c0_2] : memref<288x128xbf16, #tpu.memory_space<vmem>>, vector<288x128xbf16>
    %cst = arith.constant dense<0.000000e+00> : vector<32x128xf32>
    %2 = tpu.matmul %0, %1, %cst {dimension_numbers = #tpu.dot_dimension_numbers<[1], [0], [0], [1], [0, 0, 1, 1], [], []>} : vector<32x288xbf16>, vector<288x128xbf16>, vector<32x128xf32> -> vector<32x128xf32>
    %c0_3 = arith.constant 0 : index
    %c0_4 = arith.constant 0 : index
    %3 = vector.load %arg4[%c0_3, %c0_4] : memref<1x128xf32, #tpu.memory_space<vmem>>, vector<1x128xf32>
    %4 = vector.broadcast %3 : vector<1x128xf32> to vector<32x128xf32>
    %5 = arith.addf %2, %4 : vector<32x128xf32>
    %cst_5 = arith.constant 0.000000e+00 : f32
    %6 = vector.broadcast %cst_5 : f32 to vector<32x128xf32>
    %7 = arith.maximumf %5, %6 : vector<32x128xf32>
    %c0_6 = arith.constant 0 : index
    %c0_7 = arith.constant 0 : index
    %8 = vector.load %arg5[%c0_6, %c0_7] : memref<32x128xf32, #tpu.memory_space<vmem>>, vector<32x128xf32>
    tpu.vector_store %arg5[%c0_6, %c0_7], %7 {strides = array<i32>} : memref<32x128xf32, #tpu.memory_space<vmem>>, vector<32x128xf32>,
    return
  }
  func.func @transform_0(%arg0: i32, %arg1: i32) -> (i32, i32) {
    %c0_i32 = arith.constant 0 : i32
    %c0_i32_0 = arith.constant 0 : i32
    return %arg0, %c0_i32 : i32, i32
  }
  func.func @transform_1(%arg0: i32, %arg1: i32) -> (i32, i32) {
    %c0_i32 = arith.constant 0 : i32
    %c0_i32_0 = arith.constant 0 : i32
    return %c0_i32, %arg1 : i32, i32
  }
  func.func @transform_2(%arg0: i32, %arg1: i32) -> (i32, i32) {
    %c0_i32 = arith.constant 0 : i32
    %c0_i32_0 = arith.constant 0 : i32
    return %c0_i32, %arg1 : i32, i32
  }
  func.func @transform_3(%arg0: i32, %arg1: i32) -> (i32, i32) {
    %c0_i32 = arith.constant 0 : i32
    return %arg0, %arg1 : i32, i32
  }
}

module attributes {stable_mosaic.version = 11 : i64} {
  func.func @_matmul_epilogue_kernel(%arg0: i32, %arg1: i32, %arg2: memref<32x32xbf16, #tpu.memory_space<vmem>>, %arg3: memref<32x128xbf16, #tpu.memory_space<vmem>>, %arg4: memref<1x128xf32, #tpu.memory_space<vmem>>, %arg5: memref<32x128xf32, #tpu.memory_space<vmem>>) attributes {dimension_semantics = [#tpu.dimension_semantics<parallel>, #tpu.dimension_semantics<parallel>], iteration_bounds = array<i64: 1, 1>, scalar_prefetch = 0 : i64, scratch_operands = 0 : i64, tpu.core_type = #tpu.core_type<tc>, window_params = [{transform_indices = @transform_0, window_bounds = array<i64: 32, 32>}, {transform_indices = @transform_1, window_bounds = array<i64: 32, 128>}, {transform_indices = @transform_2, window_bounds = array<i64: 1, 128>}, {transform_indices = @transform_3, window_bounds = array<i64: 32, 128>}]} {
    %c0 = arith.constant 0 : index
    %c0_0 = arith.constant 0 : index
    %0 = vector.load %arg2[%c0, %c0_0] : memref<32x32xbf16, #tpu.memory_space<vmem>>, vector<32x32xbf16>
    %c0_1 = arith.constant 0 : index
    %c0_2 = arith.constant 0 : index
    %1 = vector.load %arg3[%c0_1, %c0_2] : memref<32x128xbf16, #tpu.memory_space<vmem>>, vector<32x128xbf16>
    %cst = arith.constant dense<0.000000e+00> : vector<32x128xf32>
    %2 = tpu.matmul %0, %1, %cst {dimension_numbers = #tpu.dot_dimension_numbers<[1], [0], [0], [1], [0, 0, 1, 1], [], []>} : vector<32x32xbf16>, vector<32x128xbf16>, vector<32x128xf32> -> vector<32x128xf32>
    %c0_3 = arith.constant 0 : index
    %c0_4 = arith.constant 0 : index
    %3 = vector.load %arg4[%c0_3, %c0_4] : memref<1x128xf32, #tpu.memory_space<vmem>>, vector<1x128xf32>
    %4 = vector.broadcast %3 : vector<1x128xf32> to vector<32x128xf32>
    %5 = arith.addf %2, %4 : vector<32x128xf32>
    %c0_5 = arith.constant 0 : index
    %c0_6 = arith.constant 0 : index
    %6 = vector.load %arg5[%c0_5, %c0_6] : memref<32x128xf32, #tpu.memory_space<vmem>>, vector<32x128xf32>
    tpu.vector_store %arg5[%c0_5, %c0_6], %5 {strides = array<i32>} : memref<32x128xf32, #tpu.memory_space<vmem>>, vector<32x128xf32>,
    return
  }
  func.func @transform_0(%arg0: i32, %arg1: i32) -> (i32, i32) {
    %c0_i32 = arith.constant 0 : i32
    %c0_i32_0 = arith.constant 0 : i32
    return %arg0, %c0_i32 : i32, i32
  }
  func.func @transform_1(%arg0: i32, %arg1: i32) -> (i32, i32) {
    %c0_i32 = arith.constant 0 : i32
    %c0_i32_0 = arith.constant 0 : i32
    return %c0_i32, %arg1 : i32, i32
  }
  func.func @transform_2(%arg0: i32, %arg1: i32) -> (i32, i32) {
    %c0_i32 = arith.constant 0 : i32
    %c0_i32_0 = arith.constant 0 : i32
    return %c0_i32, %arg1 : i32, i32
  }
  func.func @transform_3(%arg0: i32, %arg1: i32) -> (i32, i32) {
    %c0_i32 = arith.constant 0 : i32
    return %arg0, %arg1 : i32, i32
  }
}

module attributes {stable_mosaic.version = 11 : i64} {
  func.func @_matmul_res_epilogue_kernel(%arg0: i32, %arg1: i32, %arg2: memref<32x576xbf16, #tpu.memory_space<vmem>>, %arg3: memref<576x128xbf16, #tpu.memory_space<vmem>>, %arg4: memref<1x128xf32, #tpu.memory_space<vmem>>, %arg5: memref<32x128xf32, #tpu.memory_space<vmem>>, %arg6: memref<32x128xf32, #tpu.memory_space<vmem>>) attributes {dimension_semantics = [#tpu.dimension_semantics<parallel>, #tpu.dimension_semantics<parallel>], iteration_bounds = array<i64: 1, 1>, scalar_prefetch = 0 : i64, scratch_operands = 0 : i64, tpu.core_type = #tpu.core_type<tc>, window_params = [{transform_indices = @transform_0, window_bounds = array<i64: 32, 576>}, {transform_indices = @transform_1, window_bounds = array<i64: 576, 128>}, {transform_indices = @transform_2, window_bounds = array<i64: 1, 128>}, {transform_indices = @transform_3, window_bounds = array<i64: 32, 128>}, {transform_indices = @transform_4, window_bounds = array<i64: 32, 128>}]} {
    %c0 = arith.constant 0 : index
    %c0_0 = arith.constant 0 : index
    %0 = vector.load %arg2[%c0, %c0_0] : memref<32x576xbf16, #tpu.memory_space<vmem>>, vector<32x576xbf16>
    %c0_1 = arith.constant 0 : index
    %c0_2 = arith.constant 0 : index
    %1 = vector.load %arg3[%c0_1, %c0_2] : memref<576x128xbf16, #tpu.memory_space<vmem>>, vector<576x128xbf16>
    %cst = arith.constant dense<0.000000e+00> : vector<32x128xf32>
    %2 = tpu.matmul %0, %1, %cst {dimension_numbers = #tpu.dot_dimension_numbers<[1], [0], [0], [1], [0, 0, 1, 1], [], []>} : vector<32x576xbf16>, vector<576x128xbf16>, vector<32x128xf32> -> vector<32x128xf32>
    %c0_3 = arith.constant 0 : index
    %c0_4 = arith.constant 0 : index
    %3 = vector.load %arg4[%c0_3, %c0_4] : memref<1x128xf32, #tpu.memory_space<vmem>>, vector<1x128xf32>
    %4 = vector.broadcast %3 : vector<1x128xf32> to vector<32x128xf32>
    %5 = arith.addf %2, %4 : vector<32x128xf32>
    %c0_5 = arith.constant 0 : index
    %c0_6 = arith.constant 0 : index
    %6 = vector.load %arg5[%c0_5, %c0_6] : memref<32x128xf32, #tpu.memory_space<vmem>>, vector<32x128xf32>
    %7 = arith.addf %5, %6 : vector<32x128xf32>
    %cst_7 = arith.constant 0.000000e+00 : f32
    %8 = vector.broadcast %cst_7 : f32 to vector<32x128xf32>
    %9 = arith.maximumf %7, %8 : vector<32x128xf32>
    %c0_8 = arith.constant 0 : index
    %c0_9 = arith.constant 0 : index
    %10 = vector.load %arg6[%c0_8, %c0_9] : memref<32x128xf32, #tpu.memory_space<vmem>>, vector<32x128xf32>
    tpu.vector_store %arg6[%c0_8, %c0_9], %9 {strides = array<i32>} : memref<32x128xf32, #tpu.memory_space<vmem>>, vector<32x128xf32>,
    return
  }
  func.func @transform_0(%arg0: i32, %arg1: i32) -> (i32, i32) {
    %c0_i32 = arith.constant 0 : i32
    %c0_i32_0 = arith.constant 0 : i32
    return %arg0, %c0_i32 : i32, i32
  }
  func.func @transform_1(%arg0: i32, %arg1: i32) -> (i32, i32) {
    %c0_i32 = arith.constant 0 : i32
    %c0_i32_0 = arith.constant 0 : i32
    return %c0_i32, %arg1 : i32, i32
  }
  func.func @transform_2(%arg0: i32, %arg1: i32) -> (i32, i32) {
    %c0_i32 = arith.constant 0 : i32
    %c0_i32_0 = arith.constant 0 : i32
    return %c0_i32, %arg1 : i32, i32
  }
  func.func @transform_3(%arg0: i32, %arg1: i32) -> (i32, i32) {
    %c0_i32 = arith.constant 0 : i32
    return %arg0, %arg1 : i32, i32
  }
  func.func @transform_4(%arg0: i32, %arg1: i32) -> (i32, i32) {
    %c0_i32 = arith.constant 0 : i32
    return %arg0, %arg1 : i32, i32
  }
}

module attributes {stable_mosaic.version = 11 : i64} {
  func.func @_pool_fc_kernel(%arg0: memref<2x16x64xf32, #tpu.memory_space<vmem>>, %arg1: memref<64x128xf32, #tpu.memory_space<vmem>>, %arg2: memref<1x128xf32, #tpu.memory_space<vmem>>, %arg3: memref<2x128xf32, #tpu.memory_space<vmem>>) attributes {dimension_semantics = [], scalar_prefetch = 0 : i64, scratch_operands = 0 : i64, tpu.core_type = #tpu.core_type<tc>} {
    %c0 = arith.constant 0 : index
    %c0_0 = arith.constant 0 : index
    %c0_1 = arith.constant 0 : index
    %0 = vector.load %arg0[%c0, %c0_0, %c0_1] : memref<2x16x64xf32, #tpu.memory_space<vmem>>, vector<2x16x64xf32>
    %cst = arith.constant dense<0.000000e+00> : vector<2x64xf32>
    %1 = vector.multi_reduction <add>, %0, %cst [1] : vector<2x16x64xf32> to vector<2x64xf32>
    %c0_2 = arith.constant 0 : index
    %c0_3 = arith.constant 0 : index
    %2 = vector.load %arg1[%c0_2, %c0_3] : memref<64x128xf32, #tpu.memory_space<vmem>>, vector<64x128xf32>
    %cst_4 = arith.constant dense<0.000000e+00> : vector<2x128xf32>
    %3 = tpu.matmul %1, %2, %cst_4 {dimension_numbers = #tpu.dot_dimension_numbers<[1], [0], [0], [1], [0, 0, 1, 1], [], []>} : vector<2x64xf32>, vector<64x128xf32>, vector<2x128xf32> -> vector<2x128xf32>
    %c0_5 = arith.constant 0 : index
    %c0_6 = arith.constant 0 : index
    %4 = vector.load %arg2[%c0_5, %c0_6] : memref<1x128xf32, #tpu.memory_space<vmem>>, vector<1x128xf32>
    %5 = vector.broadcast %4 : vector<1x128xf32> to vector<2x128xf32>
    %6 = arith.addf %3, %5 : vector<2x128xf32>
    %c0_7 = arith.constant 0 : index
    %c0_8 = arith.constant 0 : index
    %7 = vector.load %arg3[%c0_7, %c0_8] : memref<2x128xf32, #tpu.memory_space<vmem>>, vector<2x128xf32>
    tpu.vector_store %arg3[%c0_7, %c0_8], %6 {strides = array<i32>} : memref<2x128xf32, #tpu.memory_space<vmem>>, vector<2x128xf32>,
    return
  }
}

</mosaic_0001>

<bundles_post_ra>
// kernel: wresnet_forward.10
= control target key start
LH: loop header
LB: loop body
LE: loop exit
PB: predicated region body
PF: predicated region fallthrough
CT: control target
= control target key end

     0   :  { %vm358_vm0 = vcmask 1044480   ;;  %vm359_vm1 = vcmask 1045504   ;;  %vm261_vm2 = vcmask 220160   ;;  %v994_v1 = vmov 65535   ;;  %s1410_s1 = inlined_call_operand.vmem [shape: bf16[27,128], index: 1, kind: input, shape index: {}]   ;;  %s1411_s0 = inlined_call_operand.vmem [shape: bf16[512,27], index: 0, kind: input, shape index: {}]   ;;  %s1412_s2 = inlined_call_operand.vmem [shape: f32[1,128], index: 2, kind: input, shape index: {}]   ;;  %s1413_s3 = inlined_call_operand.vmem [shape: f32[512,128], index: 3, kind: output, shape index: {}]  }
   0x1   :  { %v960_v0 = vld [vmem:[%s1410_s1] sm:$0xff]   ;;  %v360_v2 = vsel %vm358_vm0, 4294967295, %v994_v1  ;;  %v961_v3 = vld [vmem:[%s1410_s1 + $0x8] sm:$0x3f]   ;;  %v966_v10 = vld [vmem:[%s1411_s0 + $0x10] sm:$0xff]  }
   0x2   :  { %887 = vmatprep.subr.bf16.mxu0 %v960_v0  ;;  %955 = vmatprep.subr.bf16.mxu1 %v960_v0  ;;  %v361_v4 = vsel %vm359_vm1, %v360_v2, 0  ;;  %v962_v5 = vld [vmem:[%s1411_s0] sm:$0xff]   ;;  %v964_v8 = vld [vmem:[%s1411_s0 + $0x8] sm:$0xff]   ;;  %v967_v11 = vld [vmem:[%s1411_s0 + $0x90] sm:$0xff]  }
   0x3   :  { %888 = vmatpush3.bf16.msra.mxu0 %v960_v0  ;;  %957 = vmatpush3.bf16.msra.mxu1 %v960_v0  ;;  %v363_v6 = vand.u32 %v961_v3, %v361_v4  ;;  %v963_v7 = vld [vmem:[%s1411_s0 + $0x80] sm:$0xff]   ;;  %v965_v9 = vld [vmem:[%s1411_s0 + $0x88] sm:$0xff]   ;;  %v968_v12 = vld [vmem:[%s1411_s0 + $0x18] sm:$0xff]  }
   0x4   :  { %891 = vmatprep.mubr.msk.bf16.mxu0 %vm261_vm2, %v962_v5  ;;  %923 = vmatprep.mubr.msk.bf16.mxu1 %vm261_vm2, %v963_v7  ;;  %v969_v13 = vld [vmem:[%s1411_s0 + $0x98] sm:$0xff]   ;;  %v970_v14 = vld [vmem:[%s1411_s0 + $0x20] sm:$0xff]   ;;  %v972_v16 = vld [vmem:[%s1411_s0 + $0x28] sm:$0xff]  }
   0x5   :  { %889 = vmatprep.subr.bf16.mxu0 %v363_v6  ;;  %956 = vmatprep.subr.bf16.mxu1 %v363_v6  ;;  %v971_v15 = vld [vmem:[%s1411_s0 + $0xa0] sm:$0xff]   ;;  %v973_v17 = vld [vmem:[%s1411_s0 + $0xa8] sm:$0xff]   ;;  %v974_v18 = vld [vmem:[%s1411_s0 + $0x30] sm:$0xff]  }
   0x6   :  { %v975_v19 = vld [vmem:[%s1411_s0 + $0xb0] sm:$0xff]   ;;  %v976_v20 = vld [vmem:[%s1411_s0 + $0x38] sm:$0xff]   ;;  %v978_v22 = vld [vmem:[%s1411_s0 + $0x40] sm:$0xff]  }
   0x7   :  { %890 = vmatpush3.bf16.msra.mxu0 %v363_v6  ;;  %958 = vmatpush3.bf16.msra.mxu1 %v363_v6  ;;  %v977_v21 = vld [vmem:[%s1411_s0 + $0xb8] sm:$0xff]   ;;  %v979_v23 = vld [vmem:[%s1411_s0 + $0xc0] sm:$0xff]   ;;  %v980_v24 = vld [vmem:[%s1411_s0 + $0x48] sm:$0xff]  }
   0x8   :  { %v981_v25 = vld [vmem:[%s1411_s0 + $0xc8] sm:$0xff]   ;;  %v982_v26 = vld [vmem:[%s1411_s0 + $0x50] sm:$0xff]   ;;  %v984_v28 = vld [vmem:[%s1411_s0 + $0x58] sm:$0xff]  }
   0x9   :  { %v983_v27 = vld [vmem:[%s1411_s0 + $0xd0] sm:$0xff]   ;;  %v985_v29 = vld [vmem:[%s1411_s0 + $0xd8] sm:$0xff]   ;;  %v986_v30 = vld [vmem:[%s1411_s0 + $0x60] sm:$0xff]  }
   0xa   :  { %892 = vmatmul.mubr.msk.bf16.vlgmr.msra.gmra.mrb[0].mxu0 %vm261_vm2, %v964_v8  ;;  %924 = vmatmul.mubr.msk.bf16.vlgmr.msra.gmra.mrb[0].mxu1 %vm261_vm2, %v965_v9  ;;  %v987_v31 = vld [vmem:[%s1411_s0 + $0xe0] sm:$0xff]   ;;  %v988_v32 = vld [vmem:[%s1411_s0 + $0x68] sm:$0xff]   ;;  %v990_v34 = vld [vmem:[%s1411_s0 + $0x70] sm:$0xff]  }
   0xb   :  { %895 = vmatprep.mubr.msk.bf16.mxu0 %vm261_vm2, %v966_v10  ;;  %927 = vmatprep.mubr.msk.bf16.mxu1 %vm261_vm2, %v967_v11  ;;  %v989_v33 = vld [vmem:[%s1411_s0 + $0xe8] sm:$0xff]   ;;  %v991_v35 = vld [vmem:[%s1411_s0 + $0xf0] sm:$0xff]   ;;  %v992_v36 = vld [vmem:[%s1411_s0 + $0x78] sm:$0xff]  }
   0xc   :  { %v993_v37 = vld [vmem:[%s1411_s0 + $0xf8] sm:$0xff]   ;;  %v1152_v38 = vld [vmem:[%s1412_s2] ss:$0 sm:$0xff] }
  0x12   :  { %896 = vmatmul.mubr.msk.bf16.gmra.mrb[4].mxu0 %vm261_vm2, %v968_v12  ;;  %928 = vmatmul.mubr.msk.bf16.gmra.mrb[4].mxu1 %vm261_vm2, %v969_v13 }
  0x13   :  { %899 = vmatprep.mubr.msk.bf16.mxu0 %vm261_vm2, %v970_v14  ;;  %931 = vmatprep.mubr.msk.bf16.mxu1 %vm261_vm2, %v971_v15 }
  0x1a   :  { %900 = vmatmul.mubr.msk.bf16.gmra.mrb[8].mxu0 %vm261_vm2, %v972_v16  ;;  %932 = vmatmul.mubr.msk.bf16.gmra.mrb[8].mxu1 %vm261_vm2, %v973_v17 }
  0x1b   :  { %903 = vmatprep.mubr.msk.bf16.mxu0 %vm261_vm2, %v974_v18  ;;  %935 = vmatprep.mubr.msk.bf16.mxu1 %vm261_vm2, %v975_v19 }
  0x22   :  { %904 = vmatmul.mubr.msk.bf16.gmra.mrb[12].mxu0 %vm261_vm2, %v976_v20  ;;  %936 = vmatmul.mubr.msk.bf16.gmra.mrb[12].mxu1 %vm261_vm2, %v977_v21 }
  0x23   :  { %907 = vmatprep.mubr.msk.bf16.mxu0 %vm261_vm2, %v978_v22  ;;  %939 = vmatprep.mubr.msk.bf16.mxu1 %vm261_vm2, %v979_v23 }
  0x2a   :  { %908 = vmatmul.mubr.msk.bf16.gmra.mrb[16].mxu0 %vm261_vm2, %v980_v24  ;;  %940 = vmatmul.mubr.msk.bf16.gmra.mrb[16].mxu1 %vm261_vm2, %v981_v25 }
  0x2b   :  { %911 = vmatprep.mubr.msk.bf16.mxu0 %vm261_vm2, %v982_v26  ;;  %943 = vmatprep.mubr.msk.bf16.mxu1 %vm261_vm2, %v983_v27 }
  0x32   :  { %912 = vmatmul.mubr.msk.bf16.gmra.mrb[20].mxu0 %vm261_vm2, %v984_v28  ;;  %944 = vmatmul.mubr.msk.bf16.gmra.mrb[20].mxu1 %vm261_vm2, %v985_v29 }
  0x33   :  { %915 = vmatprep.mubr.msk.bf16.mxu0 %vm261_vm2, %v986_v30  ;;  %947 = vmatprep.mubr.msk.bf16.mxu1 %vm261_vm2, %v987_v31 }
  0x3a   :  { %916 = vmatmul.mubr.msk.bf16.gmra.mrb[24].mxu0 %vm261_vm2, %v988_v32  ;;  %948 = vmatmul.mubr.msk.bf16.gmra.mrb[24].mxu1 %vm261_vm2, %v989_v33 }
  0x3b   :  { %919 = vmatprep.mubr.msk.bf16.mxu0 %vm261_vm2, %v990_v34  ;;  %951 = vmatprep.mubr.msk.bf16.mxu1 %vm261_vm2, %v991_v35 }
  0x42   :  { %920 = vmatmul.mubr.msk.bf16.gmra.mrb[28].mxu0 %vm261_vm2, %v992_v36  ;;  %952 = vmatmul.mubr.msk.bf16.gmra.mrb[28].mxu1 %vm261_vm2, %v993_v37 }
  0xdd   :  { %v893_v39 = vpop.f32.mrb[0].mxu0  ;;  %v925_v40 = vpop.f32.mrb[0].mxu1 }
  0xde   :  { %v408_v41 = vadd.f32 %v893_v39, %v1152_v38  ;;  %v536_v42 = vadd.f32 %v925_v40, %v1152_v38  ;;  %v399_v43 = vpop.f32.mrb[1].mxu0  ;;  %v527_v44 = vpop.f32.mrb[1].mxu1 }
  0xdf   :  { %v400_v45 = vadd.f32 %v1152_v38, %v399_v43  ;;  %v528_v46 = vadd.f32 %v1152_v38, %v527_v44  ;;  %v894_v47 = vpop.f32.mrb[2].mxu0  ;;  %v926_v48 = vpop.f32.mrb[2].mxu1 }
  0xe0   :  { %v656_v49 = vmax.f32 %v408_v41, 0.0  ;;  %v688_v50 = vmax.f32 %v536_v42, 0.0  ;;  %v411_v51 = vadd.f32 %v894_v47, %v1152_v38  ;;  %v539_v52 = vadd.f32 %v926_v48, %v1152_v38  ;;  %v402_v53 = vpop.f32.mrb[3].mxu0  ;;  %v530_v54 = vpop.f32.mrb[3].mxu1 }
  0xe1   :  { %v654_v55 = vmax.f32 %v400_v45, 0.0  ;;  %v686_v56 = vmax.f32 %v528_v46, 0.0  ;;  %v403_v57 = vadd.f32 %v1152_v38, %v402_v53  ;;  %v531_v58 = vadd.f32 %v1152_v38, %v530_v54 }
  0xe2   :  { %720 = vst [vmem:[%s1413_s3 + $0x10] sm:$0xff] %v656_v49  ;;  %752 = vst [vmem:[%s1413_s3 + $0x110] sm:$0xff] %v688_v50  ;;  %v657_v59 = vmax.f32 %v411_v51, 0.0  ;;  %v689_v60 = vmax.f32 %v539_v52, 0.0 }
  0xe3   :  { %718 = vst [vmem:[%s1413_s3] sm:$0xff] %v654_v55  ;;  %750 = vst [vmem:[%s1413_s3 + $0x100] sm:$0xff] %v686_v56  ;;  %v655_v61 = vmax.f32 %v403_v57, 0.0  ;;  %v687_v62 = vmax.f32 %v531_v58, 0.0 }
  0xe4   :  { %721 = vst [vmem:[%s1413_s3 + $0x18] sm:$0xff] %v657_v59  ;;  %753 = vst [vmem:[%s1413_s3 + $0x118] sm:$0xff] %v689_v60 }
  0xe5   :  { %719 = vst [vmem:[%s1413_s3 + $0x8] sm:$0xff] %v655_v61  ;;  %751 = vst [vmem:[%s1413_s3 + $0x108] sm:$0xff] %v687_v62  ;;  %v897_v63 = vpop.f32.mrb[4].mxu0  ;;  %v929_v0 = vpop.f32.mrb[4].mxu1 }
  0xe6   :  { %v424_v1 = vadd.f32 %v897_v63, %v1152_v38  ;;  %v552_v2 = vadd.f32 %v929_v0, %v1152_v38  ;;  %v415_v3 = vpop.f32.mrb[5].mxu0  ;;  %v543_v4 = vpop.f32.mrb[5].mxu1 }
  0xe7   :  { %v416_v5 = vadd.f32 %v1152_v38, %v415_v3  ;;  %v544_v6 = vadd.f32 %v1152_v38, %v543_v4  ;;  %v898_v7 = vpop.f32.mrb[6].mxu0  ;;  %v930_v8 = vpop.f32.mrb[6].mxu1 }
  0xe8   :  { %v660_v9 = vmax.f32 %v424_v1, 0.0  ;;  %v692_v10 = vmax.f32 %v552_v2, 0.0  ;;  %v427_v11 = vadd.f32 %v898_v7, %v1152_v38  ;;  %v555_v12 = vadd.f32 %v930_v8, %v1152_v38  ;;  %v418_v13 = vpop.f32.mrb[7].mxu0  ;;  %v546_v14 = vpop.f32.mrb[7].mxu1 }
  0xe9   :  { %v658_v15 = vmax.f32 %v416_v5, 0.0  ;;  %v690_v16 = vmax.f32 %v544_v6, 0.0  ;;  %v419_v17 = vadd.f32 %v1152_v38, %v418_v13  ;;  %v547_v18 = vadd.f32 %v1152_v38, %v546_v14 }
  0xea   :  { %724 = vst [vmem:[%s1413_s3 + $0x30] sm:$0xff] %v660_v9  ;;  %756 = vst [vmem:[%s1413_s3 + $0x130] sm:$0xff] %v692_v10  ;;  %v661_v19 = vmax.f32 %v427_v11, 0.0  ;;  %v693_v20 = vmax.f32 %v555_v12, 0.0 }
  0xeb   :  { %722 = vst [vmem:[%s1413_s3 + $0x20] sm:$0xff] %v658_v15  ;;  %754 = vst [vmem:[%s1413_s3 + $0x120] sm:$0xff] %v690_v16  ;;  %v659_v21 = vmax.f32 %v419_v17, 0.0  ;;  %v691_v22 = vmax.f32 %v547_v18, 0.0 }
  0xec   :  { %725 = vst [vmem:[%s1413_s3 + $0x38] sm:$0xff] %v661_v19  ;;  %757 = vst [vmem:[%s1413_s3 + $0x138] sm:$0xff] %v693_v20 }
  0xed   :  { %723 = vst [vmem:[%s1413_s3 + $0x28] sm:$0xff] %v659_v21  ;;  %755 = vst [vmem:[%s1413_s3 + $0x128] sm:$0xff] %v691_v22  ;;  %v901_v23 = vpop.f32.mrb[8].mxu0  ;;  %v933_v24 = vpop.f32.mrb[8].mxu1 }
  0xee   :  { %v440_v25 = vadd.f32 %v901_v23, %v1152_v38  ;;  %v568_v26 = vadd.f32 %v933_v24, %v1152_v38  ;;  %v431_v27 = vpop.f32.mrb[9].mxu0  ;;  %v559_v28 = vpop.f32.mrb[9].mxu1 }
  0xef   :  { %v432_v29 = vadd.f32 %v1152_v38, %v431_v27  ;;  %v560_v30 = vadd.f32 %v1152_v38, %v559_v28  ;;  %v902_v31 = vpop.f32.mrb[10].mxu0  ;;  %v934_v32 = vpop.f32.mrb[10].mxu1 }
  0xf0   :  { %v664_v33 = vmax.f32 %v440_v25, 0.0  ;;  %v696_v34 = vmax.f32 %v568_v26, 0.0  ;;  %v443_v35 = vadd.f32 %v902_v31, %v1152_v38  ;;  %v571_v36 = vadd.f32 %v934_v32, %v1152_v38  ;;  %v434_v37 = vpop.f32.mrb[11].mxu0  ;;  %v562_v39 = vpop.f32.mrb[11].mxu1 }
  0xf1   :  { %v662_v40 = vmax.f32 %v432_v29, 0.0  ;;  %v694_v41 = vmax.f32 %v560_v30, 0.0  ;;  %v435_v42 = vadd.f32 %v1152_v38, %v434_v37  ;;  %v563_v43 = vadd.f32 %v1152_v38, %v562_v39 }
  0xf2   :  { %728 = vst [vmem:[%s1413_s3 + $0x50] sm:$0xff] %v664_v33  ;;  %760 = vst [vmem:[%s1413_s3 + $0x150] sm:$0xff] %v696_v34  ;;  %v665_v44 = vmax.f32 %v443_v35, 0.0  ;;  %v697_v45 = vmax.f32 %v571_v36, 0.0 }
  0xf3   :  { %726 = vst [vmem:[%s1413_s3 + $0x40] sm:$0xff] %v662_v40  ;;  %758 = vst [vmem:[%s1413_s3 + $0x140] sm:$0xff] %v694_v41  ;;  %v663_v46 = vmax.f32 %v435_v42, 0.0  ;;  %v695_v47 = vmax.f32 %v563_v43, 0.0 }
  0xf4   :  { %729 = vst [vmem:[%s1413_s3 + $0x58] sm:$0xff] %v665_v44  ;;  %761 = vst [vmem:[%s1413_s3 + $0x158] sm:$0xff] %v697_v45 }
  0xf5   :  { %727 = vst [vmem:[%s1413_s3 + $0x48] sm:$0xff] %v663_v46  ;;  %759 = vst [vmem:[%s1413_s3 + $0x148] sm:$0xff] %v695_v47  ;;  %v905_v48 = vpop.f32.mrb[12].mxu0  ;;  %v937_v49 = vpop.f32.mrb[12].mxu1 }
  0xf6   :  { %v456_v50 = vadd.f32 %v905_v48, %v1152_v38  ;;  %v584_v51 = vadd.f32 %v937_v49, %v1152_v38  ;;  %v447_v52 = vpop.f32.mrb[13].mxu0  ;;  %v575_v53 = vpop.f32.mrb[13].mxu1 }
  0xf7   :  { %v448_v54 = vadd.f32 %v1152_v38, %v447_v52  ;;  %v576_v55 = vadd.f32 %v1152_v38, %v575_v53  ;;  %v906_v56 = vpop.f32.mrb[14].mxu0  ;;  %v938_v57 = vpop.f32.mrb[14].mxu1 }
  0xf8   :  { %v668_v58 = vmax.f32 %v456_v50, 0.0  ;;  %v700_v59 = vmax.f32 %v584_v51, 0.0  ;;  %v459_v60 = vadd.f32 %v906_v56, %v1152_v38  ;;  %v587_v61 = vadd.f32 %v938_v57, %v1152_v38  ;;  %v450_v62 = vpop.f32.mrb[15].mxu0  ;;  %v578_v63 = vpop.f32.mrb[15].mxu1 }
  0xf9   :  { %v666_v0 = vmax.f32 %v448_v54, 0.0  ;;  %v698_v1 = vmax.f32 %v576_v55, 0.0  ;;  %v451_v2 = vadd.f32 %v1152_v38, %v450_v62  ;;  %v579_v3 = vadd.f32 %v1152_v38, %v578_v63 }
  0xfa   :  { %732 = vst [vmem:[%s1413_s3 + $0x70] sm:$0xff] %v668_v58  ;;  %764 = vst [vmem:[%s1413_s3 + $0x170] sm:$0xff] %v700_v59  ;;  %v669_v4 = vmax.f32 %v459_v60, 0.0  ;;  %v701_v5 = vmax.f32 %v587_v61, 0.0 }
  0xfb   :  { %730 = vst [vmem:[%s1413_s3 + $0x60] sm:$0xff] %v666_v0  ;;  %762 = vst [vmem:[%s1413_s3 + $0x160] sm:$0xff] %v698_v1  ;;  %v667_v6 = vmax.f32 %v451_v2, 0.0  ;;  %v699_v7 = vmax.f32 %v579_v3, 0.0 }
  0xfc   :  { %733 = vst [vmem:[%s1413_s3 + $0x78] sm:$0xff] %v669_v4  ;;  %765 = vst [vmem:[%s1413_s3 + $0x178] sm:$0xff] %v701_v5 }
  0xfd   :  { %731 = vst [vmem:[%s1413_s3 + $0x68] sm:$0xff] %v667_v6  ;;  %763 = vst [vmem:[%s1413_s3 + $0x168] sm:$0xff] %v699_v7  ;;  %v909_v8 = vpop.f32.mrb[16].mxu0  ;;  %v941_v9 = vpop.f32.mrb[16].mxu1 }
  0xfe   :  { %v472_v10 = vadd.f32 %v909_v8, %v1152_v38  ;;  %v600_v11 = vadd.f32 %v941_v9, %v1152_v38  ;;  %v463_v12 = vpop.f32.mrb[17].mxu0  ;;  %v591_v13 = vpop.f32.mrb[17].mxu1 }
  0xff   :  { %v464_v14 = vadd.f32 %v1152_v38, %v463_v12  ;;  %v592_v15 = vadd.f32 %v1152_v38, %v591_v13  ;;  %v910_v16 = vpop.f32.mrb[18].mxu0  ;;  %v942_v17 = vpop.f32.mrb[18].mxu1 }
 0x100   :  { %v672_v18 = vmax.f32 %v472_v10, 0.0  ;;  %v704_v19 = vmax.f32 %v600_v11, 0.0  ;;  %v475_v20 = vadd.f32 %v910_v16, %v1152_v38  ;;  %v603_v21 = vadd.f32 %v942_v17, %v1152_v38  ;;  %v466_v22 = vpop.f32.mrb[19].mxu0  ;;  %v594_v23 = vpop.f32.mrb[19].mxu1 }
 0x101   :  { %v670_v24 = vmax.f32 %v464_v14, 0.0  ;;  %v702_v25 = vmax.f32 %v592_v15, 0.0  ;;  %v467_v26 = vadd.f32 %v1152_v38, %v466_v22  ;;  %v595_v27 = vadd.f32 %v1152_v38, %v594_v23 }
 0x102   :  { %736 = vst [vmem:[%s1413_s3 + $0x90] sm:$0xff] %v672_v18  ;;  %768 = vst [vmem:[%s1413_s3 + $0x190] sm:$0xff] %v704_v19  ;;  %v673_v28 = vmax.f32 %v475_v20, 0.0  ;;  %v705_v29 = vmax.f32 %v603_v21, 0.0 }
 0x103   :  { %734 = vst [vmem:[%s1413_s3 + $0x80] sm:$0xff] %v670_v24  ;;  %766 = vst [vmem:[%s1413_s3 + $0x180] sm:$0xff] %v702_v25  ;;  %v671_v30 = vmax.f32 %v467_v26, 0.0  ;;  %v703_v31 = vmax.f32 %v595_v27, 0.0 }
 0x104   :  { %737 = vst [vmem:[%s1413_s3 + $0x98] sm:$0xff] %v673_v28  ;;  %769 = vst [vmem:[%s1413_s3 + $0x198] sm:$0xff] %v705_v29 }
 0x105   :  { %735 = vst [vmem:[%s1413_s3 + $0x88] sm:$0xff] %v671_v30  ;;  %767 = vst [vmem:[%s1413_s3 + $0x188] sm:$0xff] %v703_v31  ;;  %v913_v32 = vpop.f32.mrb[20].mxu0  ;;  %v945_v33 = vpop.f32.mrb[20].mxu1 }
 0x106   :  { %v488_v34 = vadd.f32 %v913_v32, %v1152_v38  ;;  %v616_v35 = vadd.f32 %v945_v33, %v1152_v38  ;;  %v479_v36 = vpop.f32.mrb[21].mxu0  ;;  %v607_v37 = vpop.f32.mrb[21].mxu1 }
 0x107   :  { %v480_v39 = vadd.f32 %v1152_v38, %v479_v36  ;;  %v608_v40 = vadd.f32 %v1152_v38, %v607_v37  ;;  %v914_v41 = vpop.f32.mrb[22].mxu0  ;;  %v946_v42 = vpop.f32.mrb[22].mxu1 }
 0x108   :  { %v676_v43 = vmax.f32 %v488_v34, 0.0  ;;  %v708_v44 = vmax.f32 %v616_v35, 0.0  ;;  %v491_v45 = vadd.f32 %v914_v41, %v1152_v38  ;;  %v619_v46 = vadd.f32 %v946_v42, %v1152_v38  ;;  %v482_v47 = vpop.f32.mrb[23].mxu0  ;;  %v610_v48 = vpop.f32.mrb[23].mxu1 }
 0x109   :  { %v674_v49 = vmax.f32 %v480_v39, 0.0  ;;  %v706_v50 = vmax.f32 %v608_v40, 0.0  ;;  %v483_v51 = vadd.f32 %v1152_v38, %v482_v47  ;;  %v611_v52 = vadd.f32 %v1152_v38, %v610_v48 }
 0x10a   :  { %740 = vst [vmem:[%s1413_s3 + $0xb0] sm:$0xff] %v676_v43  ;;  %772 = vst [vmem:[%s1413_s3 + $0x1b0] sm:$0xff] %v708_v44  ;;  %v677_v53 = vmax.f32 %v491_v45, 0.0  ;;  %v709_v54 = vmax.f32 %v619_v46, 0.0 }
 0x10b   :  { %738 = vst [vmem:[%s1413_s3 + $0xa0] sm:$0xff] %v674_v49  ;;  %770 = vst [vmem:[%s1413_s3 + $0x1a0] sm:$0xff] %v706_v50  ;;  %v675_v55 = vmax.f32 %v483_v51, 0.0  ;;  %v707_v56 = vmax.f32 %v611_v52, 0.0 }
 0x10c   :  { %741 = vst [vmem:[%s1413_s3 + $0xb8] sm:$0xff] %v677_v53  ;;  %773 = vst [vmem:[%s1413_s3 + $0x1b8] sm:$0xff] %v709_v54 }
 0x10d   :  { %739 = vst [vmem:[%s1413_s3 + $0xa8] sm:$0xff] %v675_v55  ;;  %771 = vst [vmem:[%s1413_s3 + $0x1a8] sm:$0xff] %v707_v56  ;;  %v917_v57 = vpop.f32.mrb[24].mxu0  ;;  %v949_v58 = vpop.f32.mrb[24].mxu1 }
 0x10e   :  { %v504_v59 = vadd.f32 %v917_v57, %v1152_v38  ;;  %v632_v60 = vadd.f32 %v949_v58, %v1152_v38  ;;  %v495_v61 = vpop.f32.mrb[25].mxu0  ;;  %v623_v62 = vpop.f32.mrb[25].mxu1 }
 0x10f   :  { %v496_v63 = vadd.f32 %v1152_v38, %v495_v61  ;;  %v624_v0 = vadd.f32 %v1152_v38, %v623_v62  ;;  %v918_v1 = vpop.f32.mrb[26].mxu0  ;;  %v950_v2 = vpop.f32.mrb[26].mxu1 }
 0x110   :  { %v680_v3 = vmax.f32 %v504_v59, 0.0  ;;  %v712_v4 = vmax.f32 %v632_v60, 0.0  ;;  %v507_v5 = vadd.f32 %v918_v1, %v1152_v38  ;;  %v635_v6 = vadd.f32 %v950_v2, %v1152_v38  ;;  %v498_v7 = vpop.f32.mrb[27].mxu0  ;;  %v626_v8 = vpop.f32.mrb[27].mxu1 }
 0x111   :  { %v678_v9 = vmax.f32 %v496_v63, 0.0  ;;  %v710_v10 = vmax.f32 %v624_v0, 0.0  ;;  %v499_v11 = vadd.f32 %v1152_v38, %v498_v7  ;;  %v627_v12 = vadd.f32 %v1152_v38, %v626_v8 }
 0x112   :  { %744 = vst [vmem:[%s1413_s3 + $0xd0] sm:$0xff] %v680_v3  ;;  %776 = vst [vmem:[%s1413_s3 + $0x1d0] sm:$0xff] %v712_v4  ;;  %v681_v13 = vmax.f32 %v507_v5, 0.0  ;;  %v713_v14 = vmax.f32 %v635_v6, 0.0 }
 0x113   :  { %742 = vst [vmem:[%s1413_s3 + $0xc0] sm:$0xff] %v678_v9  ;;  %774 = vst [vmem:[%s1413_s3 + $0x1c0] sm:$0xff] %v710_v10  ;;  %v679_v15 = vmax.f32 %v499_v11, 0.0  ;;  %v711_v16 = vmax.f32 %v627_v12, 0.0 }
 0x114   :  { %745 = vst [vmem:[%s1413_s3 + $0xd8] sm:$0xff] %v681_v13  ;;  %777 = vst [vmem:[%s1413_s3 + $0x1d8] sm:$0xff] %v713_v14 }
 0x115   :  { %743 = vst [vmem:[%s1413_s3 + $0xc8] sm:$0xff] %v679_v15  ;;  %775 = vst [vmem:[%s1413_s3 + $0x1c8] sm:$0xff] %v711_v16  ;;  %v921_v17 = vpop.f32.mrb[28].mxu0  ;;  %v953_v18 = vpop.f32.mrb[28].mxu1 }
 0x116   :  { %v520_v19 = vadd.f32 %v921_v17, %v1152_v38  ;;  %v648_v20 = vadd.f32 %v953_v18, %v1152_v38  ;;  %v511_v21 = vpop.f32.mrb[29].mxu0  ;;  %v639_v22 = vpop.f32.mrb[29].mxu1 }
 0x117   :  { %v512_v23 = vadd.f32 %v1152_v38, %v511_v21  ;;  %v640_v24 = vadd.f32 %v1152_v38, %v639_v22  ;;  %v922_v25 = vpop.f32.mrb[30].mxu0  ;;  %v954_v26 = vpop.f32.mrb[30].mxu1 }
 0x118   :  { %v684_v27 = vmax.f32 %v520_v19, 0.0  ;;  %v716_v28 = vmax.f32 %v648_v20, 0.0  ;;  %v523_v29 = vadd.f32 %v922_v25, %v1152_v38  ;;  %v651_v30 = vadd.f32 %v954_v26, %v1152_v38  ;;  %v514_v31 = vpop.f32.mrb[31].mxu0  ;;  %v642_v32 = vpop.f32.mrb[31].mxu1 }
 0x119   :  { %v682_v33 = vmax.f32 %v512_v23, 0.0  ;;  %v714_v34 = vmax.f32 %v640_v24, 0.0  ;;  %v515_v35 = vadd.f32 %v1152_v38, %v514_v31  ;;  %v643_v36 = vadd.f32 %v1152_v38, %v642_v32 }
 0x11a   :  { %748 = vst [vmem:[%s1413_s3 + $0xf0] sm:$0xff] %v684_v27  ;;  %780 = vst [vmem:[%s1413_s3 + $0x1f0] sm:$0xff] %v716_v28  ;;  %v685_v37 = vmax.f32 %v523_v29, 0.0  ;;  %v717_v39 = vmax.f32 %v651_v30, 0.0 }
 0x11b   :  { %746 = vst [vmem:[%s1413_s3 + $0xe0] sm:$0xff] %v682_v33  ;;  %778 = vst [vmem:[%s1413_s3 + $0x1e0] sm:$0xff] %v714_v34  ;;  %v683_v40 = vmax.f32 %v515_v35, 0.0  ;;  %v715_v38 = vmax.f32 %v643_v36, 0.0 }
 0x11c   :  { %749 = vst [vmem:[%s1413_s3 + $0xf8] sm:$0xff] %v685_v37  ;;  %781 = vst [vmem:[%s1413_s3 + $0x1f8] sm:$0xff] %v717_v39 }
 0x11d   :  { %747 = vst [vmem:[%s1413_s3 + $0xe8] sm:$0xff] %v683_v40  ;;  %779 = vst [vmem:[%s1413_s3 + $0x1e8] sm:$0xff] %v715_v38 }

// kernel: wresnet_forward.11
= control target key start
LH: loop header
LB: loop body
LE: loop exit
PB: predicated region body
PF: predicated region fallthrough
CT: control target
= control target key end

     0   :  { %v1194_v0 = vmov 0   ;;  %vm446_vm0 = vcmask 130048   ;;  %s1727_s1 = inlined_call_operand.vmem [shape: bf16[144,128], index: 1, kind: input, shape index: {}]   ;;  %s1728_s0 = inlined_call_operand.vmem [shape: bf16[512,144], index: 0, kind: input, shape index: {}]   ;;  %s1729_s2 = inlined_call_operand.vmem [shape: f32[1,128], index: 2, kind: input, shape index: {}]   ;;  %s1730_s3 = inlined_call_operand.vmem [shape: f32[512,128], index: 3, kind: output, shape index: {}]  }
   0x1   :  { %543 = vmatprep.subr.bf16.mxu0 %v1194_v0  ;;  %1070 = vmatprep.subr.bf16.mxu1 %v1194_v0  ;;  %v1089_v1 = vld [vmem:[%s1727_s1] sm:$0xff]   ;;  %v1090_v2 = vld [vmem:[%s1727_s1 + $0x8] sm:$0xff]   ;;  %v1091_v3 = vld [vmem:[%s1727_s1 + $0x10] sm:$0xff]  }
   0x2   :  { %544 = vmatpush1.bf16.msra.mxu0 %v1089_v1  ;;  %1079 = vmatpush1.bf16.msra.mxu1 %v1089_v1  ;;  %v1092_v4 = vld [vmem:[%s1727_s1 + $0x18] sm:$0xff]   ;;  %v1100_v5 = vld [vmem:[%s1728_s0 + $0x4] ss:$8 sps:$4 sm:$0xff]   ;;  %v1095_v9 = vld [vmem:[%s1727_s1 + $0x30] sm:$0xff]  }
   0x3   :  { %545 = vmatprep.subr.bf16.mxu0 %v1194_v0  ;;  %1071 = vmatprep.subr.bf16.mxu1 %v1194_v0  ;;  %v1103_v6 = vld [vmem:[%s1728_s0 + $0x104] ss:$8 sps:$4 sm:$0xff]   ;;  %v1096_v10 = vld [vmem:[%s1727_s1 + $0x38] sm:$0xff]   ;;  %v1098_v12 = vld [vmem:[%s1728_s0] ss:$8 sps:$4 sm:$0xff]  }
   0x4   :  { %1038 = vmatprep.mubr.msk.bf16.mxu0 %vm446_vm0, %v1100_v5  ;;  %1054 = vmatprep.mubr.msk.bf16.mxu1 %vm446_vm0, %v1103_v6  ;;  %v1093_v7 = vld [vmem:[%s1727_s1 + $0x20] sm:$0xff]   ;;  %v1094_v8 = vld [vmem:[%s1727_s1 + $0x28] sm:$0xff]   ;;  %v1104_v14 = vld [vmem:[%s1728_s0 + $0x14] ss:$8 sps:$4 sm:$0xff]  }
   0x5   :  { %v1097_v11 = vld [vmem:[%s1727_s1 + $0x40] sm:$0xff]   ;;  %v1106_v15 = vld [vmem:[%s1728_s0 + $0x114] ss:$8 sps:$4 sm:$0xff]   ;;  %v1108_v16 = vld [vmem:[%s1728_s0 + $0x10] ss:$8 sps:$4 sm:$0xff]  }
   0x6   :  { %546 = vmatpush1.bf16.msra.mxu0 %v1090_v2  ;;  %1080 = vmatpush1.bf16.msra.mxu1 %v1090_v2  ;;  %v1101_v13 = vld [vmem:[%s1728_s0 + $0x100] ss:$8 sps:$4 sm:$0xff]   ;;  %v1109_v17 = vld [vmem:[%s1728_s0 + $0x110] ss:$8 sps:$4 sm:$0xff]   ;;  %v1110_v18 = vld [vmem:[%s1728_s0 + $0x24] ss:$8 sps:$4 sm:$0xff]  }
   0x7   :  { %547 = vmatprep.subr.bf16.mxu0 %v1194_v0  ;;  %1072 = vmatprep.subr.bf16.mxu1 %v1194_v0  ;;  %v1112_v19 = vld [vmem:[%s1728_s0 + $0x124] ss:$8 sps:$4 sm:$0xff]   ;;  %v1114_v20 = vld [vmem:[%s1728_s0 + $0x20] ss:$8 sps:$4 sm:$0xff]   ;;  %v1116_v22 = vld [vmem:[%s1728_s0 + $0x34] ss:$8 sps:$4 sm:$0xff]  }
   0x8   :  { %v1115_v21 = vld [vmem:[%s1728_s0 + $0x120] ss:$8 sps:$4 sm:$0xff]   ;;  %v1118_v23 = vld [vmem:[%s1728_s0 + $0x134] ss:$8 sps:$4 sm:$0xff]   ;;  %v1120_v24 = vld [vmem:[%s1728_s0 + $0x30] ss:$8 sps:$4 sm:$0xff]  }
   0x9   :  { %v1121_v25 = vld [vmem:[%s1728_s0 + $0x130] ss:$8 sps:$4 sm:$0xff]   ;;  %v1122_v26 = vld [vmem:[%s1728_s0 + $0x44] ss:$8 sps:$4 sm:$0xff]   ;;  %v1126_v28 = vld [vmem:[%s1728_s0 + $0x40] ss:$8 sps:$4 sm:$0xff]  }
   0xa   :  { %548 = vmatpush1.bf16.msra.mxu0 %v1091_v3  ;;  %1081 = vmatpush1.bf16.msra.mxu1 %v1091_v3  ;;  %v1124_v27 = vld [vmem:[%s1728_s0 + $0x144] ss:$8 sps:$4 sm:$0xff]   ;;  %v1127_v29 = vld [vmem:[%s1728_s0 + $0x140] ss:$8 sps:$4 sm:$0xff]   ;;  %v1128_v30 = vld [vmem:[%s1728_s0 + $0x54] ss:$8 sps:$4 sm:$0xff]  }
   0xb   :  { %549 = vmatprep.subr.bf16.mxu0 %v1194_v0  ;;  %1073 = vmatprep.subr.bf16.mxu1 %v1194_v0  ;;  %v1130_v31 = vld [vmem:[%s1728_s0 + $0x154] ss:$8 sps:$4 sm:$0xff]   ;;  %v1132_v32 = vld [vmem:[%s1728_s0 + $0x50] ss:$8 sps:$4 sm:$0xff]   ;;  %v1134_v34 = vld [vmem:[%s1728_s0 + $0x64] ss:$8 sps:$4 sm:$0xff]  }
   0xc   :  { %v1133_v33 = vld [vmem:[%s1728_s0 + $0x150] ss:$8 sps:$4 sm:$0xff]   ;;  %v1136_v35 = vld [vmem:[%s1728_s0 + $0x164] ss:$8 sps:$4 sm:$0xff]   ;;  %v1138_v36 = vld [vmem:[%s1728_s0 + $0x60] ss:$8 sps:$4 sm:$0xff]  }
   0xd   :  { %v1139_v37 = vld [vmem:[%s1728_s0 + $0x160] ss:$8 sps:$4 sm:$0xff]   ;;  %v1140_v38 = vld [vmem:[%s1728_s0 + $0x74] ss:$8 sps:$4 sm:$0xff]   ;;  %v1144_v40 = vld [vmem:[%s1728_s0 + $0x70] ss:$8 sps:$4 sm:$0xff]  }
   0xe   :  { %550 = vmatpush1.bf16.msra.mxu0 %v1092_v4  ;;  %1082 = vmatpush1.bf16.msra.mxu1 %v1092_v4  ;;  %v1142_v39 = vld [vmem:[%s1728_s0 + $0x174] ss:$8 sps:$4 sm:$0xff]   ;;  %v1145_v41 = vld [vmem:[%s1728_s0 + $0x170] ss:$8 sps:$4 sm:$0xff]   ;;  %v1146_v42 = vld [vmem:[%s1728_s0 + $0x84] ss:$8 sps:$4 sm:$0xff]  }
   0xf   :  { %551 = vmatprep.subr.bf16.mxu0 %v1194_v0  ;;  %1074 = vmatprep.subr.bf16.mxu1 %v1194_v0  ;;  %v1148_v43 = vld [vmem:[%s1728_s0 + $0x184] ss:$8 sps:$4 sm:$0xff]   ;;  %v1150_v44 = vld [vmem:[%s1728_s0 + $0x80] ss:$8 sps:$4 sm:$0xff]   ;;  %v1152_v46 = vld [vmem:[%s1728_s0 + $0x94] ss:$8 sps:$4 sm:$0xff]  }
  0x10   :  { %v1151_v45 = vld [vmem:[%s1728_s0 + $0x180] ss:$8 sps:$4 sm:$0xff]   ;;  %v1154_v47 = vld [vmem:[%s1728_s0 + $0x194] ss:$8 sps:$4 sm:$0xff]   ;;  %v1156_v48 = vld [vmem:[%s1728_s0 + $0x90] ss:$8 sps:$4 sm:$0xff]  }
  0x11   :  { %v1157_v49 = vld [vmem:[%s1728_s0 + $0x190] ss:$8 sps:$4 sm:$0xff]   ;;  %v1158_v50 = vld [vmem:[%s1728_s0 + $0xa4] ss:$8 sps:$4 sm:$0xff]   ;;  %v1162_v52 = vld [vmem:[%s1728_s0 + $0xa0] ss:$8 sps:$4 sm:$0xff]  }
  0x12   :  { %552 = vmatpush1.bf16.msra.mxu0 %v1093_v7  ;;  %1083 = vmatpush1.bf16.msra.mxu1 %v1093_v7  ;;  %v1160_v51 = vld [vmem:[%s1728_s0 + $0x1a4] ss:$8 sps:$4 sm:$0xff]   ;;  %v1163_v53 = vld [vmem:[%s1728_s0 + $0x1a0] ss:$8 sps:$4 sm:$0xff]   ;;  %v1164_v54 = vld [vmem:[%s1728_s0 + $0xb4] ss:$8 sps:$4 sm:$0xff]  }
  0x13   :  { %553 = vmatprep.subr.bf16.mxu0 %v1194_v0  ;;  %1075 = vmatprep.subr.bf16.mxu1 %v1194_v0  ;;  %v1166_v55 = vld [vmem:[%s1728_s0 + $0x1b4] ss:$8 sps:$4 sm:$0xff]   ;;  %v1168_v56 = vld [vmem:[%s1728_s0 + $0xb0] ss:$8 sps:$4 sm:$0xff]   ;;  %v1170_v58 = vld [vmem:[%s1728_s0 + $0xc4] ss:$8 sps:$4 sm:$0xff]  }
  0x14   :  { %v1169_v57 = vld [vmem:[%s1728_s0 + $0x1b0] ss:$8 sps:$4 sm:$0xff]   ;;  %v1172_v59 = vld [vmem:[%s1728_s0 + $0x1c4] ss:$8 sps:$4 sm:$0xff]   ;;  %v1174_v60 = vld [vmem:[%s1728_s0 + $0xc0] ss:$8 sps:$4 sm:$0xff]  }
  0x15   :  { %v1175_v61 = vld [vmem:[%s1728_s0 + $0x1c0] ss:$8 sps:$4 sm:$0xff]   ;;  %v1176_v62 = vld [vmem:[%s1728_s0 + $0xd4] ss:$8 sps:$4 sm:$0xff]   ;;  %v1181_v1 = vld [vmem:[%s1728_s0 + $0x1d0] ss:$8 sps:$4 sm:$0xff]  }
  0x16   :  { %554 = vmatpush1.bf16.msra.mxu0 %v1094_v8  ;;  %1084 = vmatpush1.bf16.msra.mxu1 %v1094_v8  ;;  %v1178_v63 = vld [vmem:[%s1728_s0 + $0x1d4] ss:$8 sps:$4 sm:$0xff]   ;;  %v1182_v2 = vld [vmem:[%s1728_s0 + $0xe4] ss:$8 sps:$4 sm:$0xff]   ;;  %v1186_v4 = vld [vmem:[%s1728_s0 + $0xe0] ss:$8 sps:$4 sm:$0xff]  }
  0x17   :  { %555 = vmatprep.subr.bf16.mxu0 %v1194_v0  ;;  %1076 = vmatprep.subr.bf16.mxu1 %v1194_v0  ;;  %v1184_v3 = vld [vmem:[%s1728_s0 + $0x1e4] ss:$8 sps:$4 sm:$0xff]   ;;  %v1187_v5 = vld [vmem:[%s1728_s0 + $0x1e0] ss:$8 sps:$4 sm:$0xff]   ;;  %v1188_v6 = vld [vmem:[%s1728_s0 + $0xf4] ss:$8 sps:$4 sm:$0xff]  }
  0x18   :  { %v1190_v7 = vld [vmem:[%s1728_s0 + $0x1f4] ss:$8 sps:$4 sm:$0xff]   ;;  %v1192_v8 = vld [vmem:[%s1728_s0 + $0xf0] ss:$8 sps:$4 sm:$0xff]  }
  0x1a   :  { %556 = vmatpush1.bf16.msra.mxu0 %v1095_v9  ;;  %1085 = vmatpush1.bf16.msra.mxu1 %v1095_v9  ;;  %v1193_v9 = vld [vmem:[%s1728_s0 + $0x1f0] ss:$8 sps:$4 sm:$0xff]  }
  0x1b   :  { %557 = vmatprep.subr.bf16.mxu0 %v1194_v0  ;;  %1077 = vmatprep.subr.bf16.mxu1 %v1194_v0 }
  0x1e   :  { %558 = vmatpush1.bf16.msra.mxu0 %v1096_v10  ;;  %1086 = vmatpush1.bf16.msra.mxu1 %v1096_v10  ;;  %v1469_v10 = vld [vmem:[%s1729_s2] ss:$0 sm:$0xff] }
  0x1f   :  { %559 = vmatprep.subr.bf16.mxu0 %v1194_v0  ;;  %1078 = vmatprep.subr.bf16.mxu1 %v1194_v0  ;;  %v1180_v0 = vld [vmem:[%s1728_s0 + $0xd0] ss:$8 sps:$4 sm:$0xff]  }
  0x22   :  { %560 = vmatpush1.bf16.msra.mxu0 %v1097_v11  ;;  %1087 = vmatpush1.bf16.msra.mxu1 %v1097_v11 }
  0x25   :  { %576 = vmatmul.mubr.bf16.vlgmr.msra.gmra.mrb[0].mxu0 %v1098_v12  ;;  %704 = vmatmul.mubr.bf16.vlgmr.msra.gmra.mrb[0].mxu1 %v1101_v13 }
  0x26   :  { %1039 = vmatprep.mubr.msk.bf16.mxu0 %vm446_vm0, %v1104_v14  ;;  %1055 = vmatprep.mubr.msk.bf16.mxu1 %vm446_vm0, %v1106_v15 }
  0x2d   :  { %584 = vmatmul.mubr.bf16.gmra.mrb[4].mxu0 %v1108_v16  ;;  %712 = vmatmul.mubr.bf16.gmra.mrb[4].mxu1 %v1109_v17 }
  0x2e   :  { %1040 = vmatprep.mubr.msk.bf16.mxu0 %vm446_vm0, %v1110_v18  ;;  %1056 = vmatprep.mubr.msk.bf16.mxu1 %vm446_vm0, %v1112_v19 }
  0x35   :  { %592 = vmatmul.mubr.bf16.gmra.mrb[8].mxu0 %v1114_v20  ;;  %720 = vmatmul.mubr.bf16.gmra.mrb[8].mxu1 %v1115_v21 }
  0x36   :  { %1041 = vmatprep.mubr.msk.bf16.mxu0 %vm446_vm0, %v1116_v22  ;;  %1057 = vmatprep.mubr.msk.bf16.mxu1 %vm446_vm0, %v1118_v23 }
  0x3d   :  { %600 = vmatmul.mubr.bf16.gmra.mrb[12].mxu0 %v1120_v24  ;;  %728 = vmatmul.mubr.bf16.gmra.mrb[12].mxu1 %v1121_v25 }
  0x3e   :  { %1042 = vmatprep.mubr.msk.bf16.mxu0 %vm446_vm0, %v1122_v26  ;;  %1058 = vmatprep.mubr.msk.bf16.mxu1 %vm446_vm0, %v1124_v27 }
  0x45   :  { %608 = vmatmul.mubr.bf16.gmra.mrb[16].mxu0 %v1126_v28  ;;  %736 = vmatmul.mubr.bf16.gmra.mrb[16].mxu1 %v1127_v29 }
  0x46   :  { %1043 = vmatprep.mubr.msk.bf16.mxu0 %vm446_vm0, %v1128_v30  ;;  %1059 = vmatprep.mubr.msk.bf16.mxu1 %vm446_vm0, %v1130_v31 }
  0x4d   :  { %616 = vmatmul.mubr.bf16.gmra.mrb[20].mxu0 %v1132_v32  ;;  %744 = vmatmul.mubr.bf16.gmra.mrb[20].mxu1 %v1133_v33 }
  0x4e   :  { %1044 = vmatprep.mubr.msk.bf16.mxu0 %vm446_vm0, %v1134_v34  ;;  %1060 = vmatprep.mubr.msk.bf16.mxu1 %vm446_vm0, %v1136_v35 }
  0x55   :  { %624 = vmatmul.mubr.bf16.gmra.mrb[24].mxu0 %v1138_v36  ;;  %752 = vmatmul.mubr.bf16.gmra.mrb[24].mxu1 %v1139_v37 }
  0x56   :  { %1045 = vmatprep.mubr.msk.bf16.mxu0 %vm446_vm0, %v1140_v38  ;;  %1061 = vmatprep.mubr.msk.bf16.mxu1 %vm446_vm0, %v1142_v39 }
  0x5d   :  { %632 = vmatmul.mubr.bf16.gmra.mrb[28].mxu0 %v1144_v40  ;;  %760 = vmatmul.mubr.bf16.gmra.mrb[28].mxu1 %v1145_v41 }
  0x5e   :  { %1046 = vmatprep.mubr.msk.bf16.mxu0 %vm446_vm0, %v1146_v42  ;;  %1062 = vmatprep.mubr.msk.bf16.mxu1 %vm446_vm0, %v1148_v43 }
  0x65   :  { %640 = vmatmul.mubr.bf16.gmra.mrb[32].mxu0 %v1150_v44  ;;  %768 = vmatmul.mubr.bf16.gmra.mrb[32].mxu1 %v1151_v45 }
  0x66   :  { %1047 = vmatprep.mubr.msk.bf16.mxu0 %vm446_vm0, %v1152_v46  ;;  %1063 = vmatprep.mubr.msk.bf16.mxu1 %vm446_vm0, %v1154_v47 }
  0x6d   :  { %648 = vmatmul.mubr.bf16.gmra.mrb[36].mxu0 %v1156_v48  ;;  %776 = vmatmul.mubr.bf16.gmra.mrb[36].mxu1 %v1157_v49 }
  0x6e   :  { %1048 = vmatprep.mubr.msk.bf16.mxu0 %vm446_vm0, %v1158_v50  ;;  %1064 = vmatprep.mubr.msk.bf16.mxu1 %vm446_vm0, %v1160_v51 }
  0x75   :  { %656 = vmatmul.mubr.bf16.gmra.mrb[40].mxu0 %v1162_v52  ;;  %784 = vmatmul.mubr.bf16.gmra.mrb[40].mxu1 %v1163_v53 }
  0x76   :  { %1049 = vmatprep.mubr.msk.bf16.mxu0 %vm446_vm0, %v1164_v54  ;;  %1065 = vmatprep.mubr.msk.bf16.mxu1 %vm446_vm0, %v1166_v55 }
  0x7d   :  { %664 = vmatmul.mubr.bf16.gmra.mrb[44].mxu0 %v1168_v56  ;;  %792 = vmatmul.mubr.bf16.gmra.mrb[44].mxu1 %v1169_v57 }
  0x7e   :  { %1050 = vmatprep.mubr.msk.bf16.mxu0 %vm446_vm0, %v1170_v58  ;;  %1066 = vmatprep.mubr.msk.bf16.mxu1 %vm446_vm0, %v1172_v59 }
  0x85   :  { %672 = vmatmul.mubr.bf16.gmra.mrb[48].mxu0 %v1174_v60  ;;  %800 = vmatmul.mubr.bf16.gmra.mrb[48].mxu1 %v1175_v61 }
  0x86   :  { %1051 = vmatprep.mubr.msk.bf16.mxu0 %vm446_vm0, %v1176_v62  ;;  %1067 = vmatprep.mubr.msk.bf16.mxu1 %vm446_vm0, %v1178_v63 }
  0x8d   :  { %680 = vmatmul.mubr.bf16.gmra.mrb[52].mxu0 %v1180_v0  ;;  %808 = vmatmul.mubr.bf16.gmra.mrb[52].mxu1 %v1181_v1 }
  0x8e   :  { %1052 = vmatprep.mubr.msk.bf16.mxu0 %vm446_vm0, %v1182_v2  ;;  %1068 = vmatprep.mubr.msk.bf16.mxu1 %vm446_vm0, %v1184_v3 }
  0x95   :  { %688 = vmatmul.mubr.bf16.gmra.mrb[56].mxu0 %v1186_v4  ;;  %816 = vmatmul.mubr.bf16.gmra.mrb[56].mxu1 %v1187_v5 }
  0x96   :  { %1053 = vmatprep.mubr.msk.bf16.mxu0 %vm446_vm0, %v1188_v6  ;;  %1069 = vmatprep.mubr.msk.bf16.mxu1 %vm446_vm0, %v1190_v7 }
  0x9d   :  { %696 = vmatmul.mubr.bf16.gmra.mrb[60].mxu0 %v1192_v8  ;;  %824 = vmatmul.mubr.bf16.gmra.mrb[60].mxu1 %v1193_v9 }
  0xf8   :  { %v577_v11 = vpop.f32.mrb[0].mxu0  ;;  %v705_v12 = vpop.f32.mrb[0].mxu1 }
  0xf9   :  { %v578_v13 = vadd.f32 %v1469_v10, %v577_v11  ;;  %v706_v14 = vadd.f32 %v1469_v10, %v705_v12  ;;  %v579_v15 = vpop.f32.mrb[1].mxu0  ;;  %v707_v16 = vpop.f32.mrb[1].mxu1 }
  0xfa   :  { %v580_v17 = vpop.f32.mrb[2].mxu0  ;;  %v708_v18 = vpop.f32.mrb[2].mxu1 }
  0xfb   :  { %v832_v19 = vmax.f32 %v578_v13, 0.0  ;;  %v864_v20 = vmax.f32 %v706_v14, 0.0  ;;  %v581_v21 = vadd.f32 %v1469_v10, %v580_v17  ;;  %v709_v22 = vadd.f32 %v1469_v10, %v708_v18  ;;  %v582_v23 = vpop.f32.mrb[3].mxu0  ;;  %v710_v24 = vpop.f32.mrb[3].mxu1 }
  0xfd   :  { %896 = vst [vmem:[%s1730_s3] sm:$0xff] %v832_v19  ;;  %928 = vst [vmem:[%s1730_s3 + $0x100] sm:$0xff] %v864_v20  ;;  %v833_v25 = vmax.f32 %v581_v21, 0.0  ;;  %v865_v26 = vmax.f32 %v709_v22, 0.0 }
  0xff   :  { %897 = vst [vmem:[%s1730_s3 + $0x8] sm:$0xff] %v833_v25  ;;  %929 = vst [vmem:[%s1730_s3 + $0x108] sm:$0xff] %v865_v26 }
 0x100   :  { %v585_v27 = vpop.f32.mrb[4].mxu0  ;;  %v713_v28 = vpop.f32.mrb[4].mxu1 }
 0x101   :  { %v586_v29 = vadd.f32 %v1469_v10, %v585_v27  ;;  %v714_v30 = vadd.f32 %v1469_v10, %v713_v28  ;;  %v587_v31 = vpop.f32.mrb[5].mxu0  ;;  %v715_v32 = vpop.f32.mrb[5].mxu1 }
 0x102   :  { %v588_v33 = vpop.f32.mrb[6].mxu0  ;;  %v716_v34 = vpop.f32.mrb[6].mxu1 }
 0x103   :  { %v834_v35 = vmax.f32 %v586_v29, 0.0  ;;  %v866_v36 = vmax.f32 %v714_v30, 0.0  ;;  %v589_v37 = vadd.f32 %v1469_v10, %v588_v33  ;;  %v717_v38 = vadd.f32 %v1469_v10, %v716_v34  ;;  %v590_v39 = vpop.f32.mrb[7].mxu0  ;;  %v718_v40 = vpop.f32.mrb[7].mxu1 }
 0x105   :  { %898 = vst [vmem:[%s1730_s3 + $0x10] sm:$0xff] %v834_v35  ;;  %930 = vst [vmem:[%s1730_s3 + $0x110] sm:$0xff] %v866_v36  ;;  %v835_v41 = vmax.f32 %v589_v37, 0.0  ;;  %v867_v42 = vmax.f32 %v717_v38, 0.0 }
 0x107   :  { %899 = vst [vmem:[%s1730_s3 + $0x18] sm:$0xff] %v835_v41  ;;  %931 = vst [vmem:[%s1730_s3 + $0x118] sm:$0xff] %v867_v42 }
 0x108   :  { %v593_v43 = vpop.f32.mrb[8].mxu0  ;;  %v721_v44 = vpop.f32.mrb[8].mxu1 }
 0x109   :  { %v594_v45 = vadd.f32 %v1469_v10, %v593_v43  ;;  %v722_v46 = vadd.f32 %v1469_v10, %v721_v44  ;;  %v595_v47 = vpop.f32.mrb[9].mxu0  ;;  %v723_v48 = vpop.f32.mrb[9].mxu1 }
 0x10a   :  { %v596_v49 = vpop.f32.mrb[10].mxu0  ;;  %v724_v50 = vpop.f32.mrb[10].mxu1 }
 0x10b   :  { %v836_v51 = vmax.f32 %v594_v45, 0.0  ;;  %v868_v52 = vmax.f32 %v722_v46, 0.0  ;;  %v597_v53 = vadd.f32 %v1469_v10, %v596_v49  ;;  %v725_v54 = vadd.f32 %v1469_v10, %v724_v50  ;;  %v598_v55 = vpop.f32.mrb[11].mxu0  ;;  %v726_v56 = vpop.f32.mrb[11].mxu1 }
 0x10d   :  { %900 = vst [vmem:[%s1730_s3 + $0x20] sm:$0xff] %v836_v51  ;;  %932 = vst [vmem:[%s1730_s3 + $0x120] sm:$0xff] %v868_v52  ;;  %v837_v57 = vmax.f32 %v597_v53, 0.0  ;;  %v869_v58 = vmax.f32 %v725_v54, 0.0 }
 0x10f   :  { %901 = vst [vmem:[%s1730_s3 + $0x28] sm:$0xff] %v837_v57  ;;  %933 = vst [vmem:[%s1730_s3 + $0x128] sm:$0xff] %v869_v58 }
 0x110   :  { %v601_v59 = vpop.f32.mrb[12].mxu0  ;;  %v729_v60 = vpop.f32.mrb[12].mxu1 }
 0x111   :  { %v602_v61 = vadd.f32 %v1469_v10, %v601_v59  ;;  %v730_v62 = vadd.f32 %v1469_v10, %v729_v60  ;;  %v603_v63 = vpop.f32.mrb[13].mxu0  ;;  %v731_v0 = vpop.f32.mrb[13].mxu1 }
 0x112   :  { %v604_v1 = vpop.f32.mrb[14].mxu0  ;;  %v732_v2 = vpop.f32.mrb[14].mxu1 }
 0x113   :  { %v838_v3 = vmax.f32 %v602_v61, 0.0  ;;  %v870_v4 = vmax.f32 %v730_v62, 0.0  ;;  %v605_v5 = vadd.f32 %v1469_v10, %v604_v1  ;;  %v733_v6 = vadd.f32 %v1469_v10, %v732_v2  ;;  %v606_v7 = vpop.f32.mrb[15].mxu0  ;;  %v734_v8 = vpop.f32.mrb[15].mxu1 }
 0x115   :  { %902 = vst [vmem:[%s1730_s3 + $0x30] sm:$0xff] %v838_v3  ;;  %934 = vst [vmem:[%s1730_s3 + $0x130] sm:$0xff] %v870_v4  ;;  %v839_v9 = vmax.f32 %v605_v5, 0.0  ;;  %v871_v11 = vmax.f32 %v733_v6, 0.0 }
 0x117   :  { %903 = vst [vmem:[%s1730_s3 + $0x38] sm:$0xff] %v839_v9  ;;  %935 = vst [vmem:[%s1730_s3 + $0x138] sm:$0xff] %v871_v11 }
 0x118   :  { %v609_v12 = vpop.f32.mrb[16].mxu0  ;;  %v737_v13 = vpop.f32.mrb[16].mxu1 }
 0x119   :  { %v610_v14 = vadd.f32 %v1469_v10, %v609_v12  ;;  %v738_v15 = vadd.f32 %v1469_v10, %v737_v13  ;;  %v611_v16 = vpop.f32.mrb[17].mxu0  ;;  %v739_v17 = vpop.f32.mrb[17].mxu1 }
 0x11a   :  { %v612_v18 = vpop.f32.mrb[18].mxu0  ;;  %v740_v19 = vpop.f32.mrb[18].mxu1 }
 0x11b   :  { %v840_v20 = vmax.f32 %v610_v14, 0.0  ;;  %v872_v21 = vmax.f32 %v738_v15, 0.0  ;;  %v613_v22 = vadd.f32 %v1469_v10, %v612_v18  ;;  %v741_v23 = vadd.f32 %v1469_v10, %v740_v19  ;;  %v614_v24 = vpop.f32.mrb[19].mxu0  ;;  %v742_v25 = vpop.f32.mrb[19].mxu1 }
 0x11d   :  { %904 = vst [vmem:[%s1730_s3 + $0x40] sm:$0xff] %v840_v20  ;;  %936 = vst [vmem:[%s1730_s3 + $0x140] sm:$0xff] %v872_v21  ;;  %v841_v26 = vmax.f32 %v613_v22, 0.0  ;;  %v873_v27 = vmax.f32 %v741_v23, 0.0 }
 0x11f   :  { %905 = vst [vmem:[%s1730_s3 + $0x48] sm:$0xff] %v841_v26  ;;  %937 = vst [vmem:[%s1730_s3 + $0x148] sm:$0xff] %v873_v27 }
 0x120   :  { %v617_v28 = vpop.f32.mrb[20].mxu0  ;;  %v745_v29 = vpop.f32.mrb[20].mxu1 }
 0x121   :  { %v618_v30 = vadd.f32 %v1469_v10, %v617_v28  ;;  %v746_v31 = vadd.f32 %v1469_v10, %v745_v29  ;;  %v619_v32 = vpop.f32.mrb[21].mxu0  ;;  %v747_v33 = vpop.f32.mrb[21].mxu1 }
 0x122   :  { %v620_v34 = vpop.f32.mrb[22].mxu0  ;;  %v748_v35 = vpop.f32.mrb[22].mxu1 }
 0x123   :  { %v842_v36 = vmax.f32 %v618_v30, 0.0  ;;  %v874_v37 = vmax.f32 %v746_v31, 0.0  ;;  %v621_v38 = vadd.f32 %v1469_v10, %v620_v34  ;;  %v749_v39 = vadd.f32 %v1469_v10, %v748_v35  ;;  %v622_v40 = vpop.f32.mrb[23].mxu0  ;;  %v750_v41 = vpop.f32.mrb[23].mxu1 }
 0x125   :  { %906 = vst [vmem:[%s1730_s3 + $0x50] sm:$0xff] %v842_v36  ;;  %938 = vst [vmem:[%s1730_s3 + $0x150] sm:$0xff] %v874_v37  ;;  %v843_v42 = vmax.f32 %v621_v38, 0.0  ;;  %v875_v43 = vmax.f32 %v749_v39, 0.0 }
 0x127   :  { %907 = vst [vmem:[%s1730_s3 + $0x58] sm:$0xff] %v843_v42  ;;  %939 = vst [vmem:[%s1730_s3 + $0x158] sm:$0xff] %v875_v43 }
 0x128   :  { %v625_v44 = vpop.f32.mrb[24].mxu0  ;;  %v753_v45 = vpop.f32.mrb[24].mxu1 }
 0x129   :  { %v626_v46 = vadd.f32 %v1469_v10, %v625_v44  ;;  %v754_v47 = vadd.f32 %v1469_v10, %v753_v45  ;;  %v627_v48 = vpop.f32.mrb[25].mxu0  ;;  %v755_v49 = vpop.f32.mrb[25].mxu1 }
 0x12a   :  { %v628_v50 = vpop.f32.mrb[26].mxu0  ;;  %v756_v51 = vpop.f32.mrb[26].mxu1 }
 0x12b   :  { %v844_v52 = vmax.f32 %v626_v46, 0.0  ;;  %v876_v53 = vmax.f32 %v754_v47, 0.0  ;;  %v629_v54 = vadd.f32 %v1469_v10, %v628_v50  ;;  %v757_v55 = vadd.f32 %v1469_v10, %v756_v51  ;;  %v630_v56 = vpop.f32.mrb[27].mxu0  ;;  %v758_v57 = vpop.f32.mrb[27].mxu1 }
 0x12d   :  { %908 = vst [vmem:[%s1730_s3 + $0x60] sm:$0xff] %v844_v52  ;;  %940 = vst [vmem:[%s1730_s3 + $0x160] sm:$0xff] %v876_v53  ;;  %v845_v58 = vmax.f32 %v629_v54, 0.0  ;;  %v877_v59 = vmax.f32 %v757_v55, 0.0 }
 0x12f   :  { %909 = vst [vmem:[%s1730_s3 + $0x68] sm:$0xff] %v845_v58  ;;  %941 = vst [vmem:[%s1730_s3 + $0x168] sm:$0xff] %v877_v59 }
 0x130   :  { %v633_v60 = vpop.f32.mrb[28].mxu0  ;;  %v761_v61 = vpop.f32.mrb[28].mxu1 }
 0x131   :  { %v634_v62 = vadd.f32 %v1469_v10, %v633_v60  ;;  %v762_v63 = vadd.f32 %v1469_v10, %v761_v61  ;;  %v635_v0 = vpop.f32.mrb[29].mxu0  ;;  %v763_v1 = vpop.f32.mrb[29].mxu1 }
 0x132   :  { %v636_v2 = vpop.f32.mrb[30].mxu0  ;;  %v764_v3 = vpop.f32.mrb[30].mxu1 }
 0x133   :  { %v846_v4 = vmax.f32 %v634_v62, 0.0  ;;  %v878_v5 = vmax.f32 %v762_v63, 0.0  ;;  %v637_v6 = vadd.f32 %v1469_v10, %v636_v2  ;;  %v765_v7 = vadd.f32 %v1469_v10, %v764_v3  ;;  %v638_v8 = vpop.f32.mrb[31].mxu0  ;;  %v766_v9 = vpop.f32.mrb[31].mxu1 }
 0x135   :  { %910 = vst [vmem:[%s1730_s3 + $0x70] sm:$0xff] %v846_v4  ;;  %942 = vst [vmem:[%s1730_s3 + $0x170] sm:$0xff] %v878_v5  ;;  %v847_v11 = vmax.f32 %v637_v6, 0.0  ;;  %v879_v12 = vmax.f32 %v765_v7, 0.0 }
 0x137   :  { %911 = vst [vmem:[%s1730_s3 + $0x78] sm:$0xff] %v847_v11  ;;  %943 = vst [vmem:[%s1730_s3 + $0x178] sm:$0xff] %v879_v12 }
 0x138   :  { %v641_v13 = vpop.f32.mrb[32].mxu0  ;;  %v769_v14 = vpop.f32.mrb[32].mxu1 }
 0x139   :  { %v642_v15 = vadd.f32 %v1469_v10, %v641_v13  ;;  %v770_v16 = vadd.f32 %v1469_v10, %v769_v14  ;;  %v643_v17 = vpop.f32.mrb[33].mxu0  ;;  %v771_v18 = vpop.f32.mrb[33].mxu1 }
 0x13a   :  { %v644_v19 = vpop.f32.mrb[34].mxu0  ;;  %v772_v20 = vpop.f32.mrb[34].mxu1 }
 0x13b   :  { %v848_v21 = vmax.f32 %v642_v15, 0.0  ;;  %v880_v22 = vmax.f32 %v770_v16, 0.0  ;;  %v645_v23 = vadd.f32 %v1469_v10, %v644_v19  ;;  %v773_v24 = vadd.f32 %v1469_v10, %v772_v20  ;;  %v646_v25 = vpop.f32.mrb[35].mxu0  ;;  %v774_v26 = vpop.f32.mrb[35].mxu1 }
 0x13d   :  { %912 = vst [vmem:[%s1730_s3 + $0x80] sm:$0xff] %v848_v21  ;;  %944 = vst [vmem:[%s1730_s3 + $0x180] sm:$0xff] %v880_v22  ;;  %v849_v27 = vmax.f32 %v645_v23, 0.0  ;;  %v881_v28 = vmax.f32 %v773_v24, 0.0 }
 0x13f   :  { %913 = vst [vmem:[%s1730_s3 + $0x88] sm:$0xff] %v849_v27  ;;  %945 = vst [vmem:[%s1730_s3 + $0x188] sm:$0xff] %v881_v28 }
 0x140   :  { %v649_v29 = vpop.f32.mrb[36].mxu0  ;;  %v777_v30 = vpop.f32.mrb[36].mxu1 }
 0x141   :  { %v650_v31 = vadd.f32 %v1469_v10, %v649_v29  ;;  %v778_v32 = vadd.f32 %v1469_v10, %v777_v30  ;;  %v651_v33 = vpop.f32.mrb[37].mxu0  ;;  %v779_v34 = vpop.f32.mrb[37].mxu1 }
 0x142   :  { %v652_v35 = vpop.f32.mrb[38].mxu0  ;;  %v780_v36 = vpop.f32.mrb[38].mxu1 }
 0x143   :  { %v850_v37 = vmax.f32 %v650_v31, 0.0  ;;  %v882_v38 = vmax.f32 %v778_v32, 0.0  ;;  %v653_v39 = vadd.f32 %v1469_v10, %v652_v35  ;;  %v781_v40 = vadd.f32 %v1469_v10, %v780_v36  ;;  %v654_v41 = vpop.f32.mrb[39].mxu0  ;;  %v782_v42 = vpop.f32.mrb[39].mxu1 }
 0x145   :  { %914 = vst [vmem:[%s1730_s3 + $0x90] sm:$0xff] %v850_v37  ;;  %946 = vst [vmem:[%s1730_s3 + $0x190] sm:$0xff] %v882_v38  ;;  %v851_v43 = vmax.f32 %v653_v39, 0.0  ;;  %v883_v44 = vmax.f32 %v781_v40, 0.0 }
 0x147   :  { %915 = vst [vmem:[%s1730_s3 + $0x98] sm:$0xff] %v851_v43  ;;  %947 = vst [vmem:[%s1730_s3 + $0x198] sm:$0xff] %v883_v44 }
 0x148   :  { %v657_v45 = vpop.f32.mrb[40].mxu0  ;;  %v785_v46 = vpop.f32.mrb[40].mxu1 }
 0x149   :  { %v658_v47 = vadd.f32 %v1469_v10, %v657_v45  ;;  %v786_v48 = vadd.f32 %v1469_v10, %v785_v46  ;;  %v659_v49 = vpop.f32.mrb[41].mxu0  ;;  %v787_v50 = vpop.f32.mrb[41].mxu1 }
 0x14a   :  { %v660_v51 = vpop.f32.mrb[42].mxu0  ;;  %v788_v52 = vpop.f32.mrb[42].mxu1 }
 0x14b   :  { %v852_v53 = vmax.f32 %v658_v47, 0.0  ;;  %v884_v54 = vmax.f32 %v786_v48, 0.0  ;;  %v661_v55 = vadd.f32 %v1469_v10, %v660_v51  ;;  %v789_v56 = vadd.f32 %v1469_v10, %v788_v52  ;;  %v662_v57 = vpop.f32.mrb[43].mxu0  ;;  %v790_v58 = vpop.f32.mrb[43].mxu1 }
 0x14d   :  { %916 = vst [vmem:[%s1730_s3 + $0xa0] sm:$0xff] %v852_v53  ;;  %948 = vst [vmem:[%s1730_s3 + $0x1a0] sm:$0xff] %v884_v54  ;;  %v853_v59 = vmax.f32 %v661_v55, 0.0  ;;  %v885_v60 = vmax.f32 %v789_v56, 0.0 }
 0x14f   :  { %917 = vst [vmem:[%s1730_s3 + $0xa8] sm:$0xff] %v853_v59  ;;  %949 = vst [vmem:[%s1730_s3 + $0x1a8] sm:$0xff] %v885_v60 }
 0x150   :  { %v665_v61 = vpop.f32.mrb[44].mxu0  ;;  %v793_v62 = vpop.f32.mrb[44].mxu1 }
 0x151   :  { %v666_v63 = vadd.f32 %v1469_v10, %v665_v61  ;;  %v794_v0 = vadd.f32 %v1469_v10, %v793_v62  ;;  %v667_v1 = vpop.f32.mrb[45].mxu0  ;;  %v795_v2 = vpop.f32.mrb[45].mxu1 }
 0x152   :  { %v668_v3 = vpop.f32.mrb[46].mxu0  ;;  %v796_v4 = vpop.f32.mrb[46].mxu1 }
 0x153   :  { %v854_v5 = vmax.f32 %v666_v63, 0.0  ;;  %v886_v6 = vmax.f32 %v794_v0, 0.0  ;;  %v669_v7 = vadd.f32 %v1469_v10, %v668_v3  ;;  %v797_v8 = vadd.f32 %v1469_v10, %v796_v4  ;;  %v670_v9 = vpop.f32.mrb[47].mxu0  ;;  %v798_v11 = vpop.f32.mrb[47].mxu1 }
 0x155   :  { %918 = vst [vmem:[%s1730_s3 + $0xb0] sm:$0xff] %v854_v5  ;;  %950 = vst [vmem:[%s1730_s3 + $0x1b0] sm:$0xff] %v886_v6  ;;  %v855_v12 = vmax.f32 %v669_v7, 0.0  ;;  %v887_v13 = vmax.f32 %v797_v8, 0.0 }
 0x157   :  { %919 = vst [vmem:[%s1730_s3 + $0xb8] sm:$0xff] %v855_v12  ;;  %951 = vst [vmem:[%s1730_s3 + $0x1b8] sm:$0xff] %v887_v13 }
 0x158   :  { %v673_v14 = vpop.f32.mrb[48].mxu0  ;;  %v801_v15 = vpop.f32.mrb[48].mxu1 }
 0x159   :  { %v674_v16 = vadd.f32 %v1469_v10, %v673_v14  ;;  %v802_v17 = vadd.f32 %v1469_v10, %v801_v15  ;;  %v675_v18 = vpop.f32.mrb[49].mxu0  ;;  %v803_v19 = vpop.f32.mrb[49].mxu1 }
 0x15a   :  { %v676_v20 = vpop.f32.mrb[50].mxu0  ;;  %v804_v21 = vpop.f32.mrb[50].mxu1 }
 0x15b   :  { %v856_v22 = vmax.f32 %v674_v16, 0.0  ;;  %v888_v23 = vmax.f32 %v802_v17, 0.0  ;;  %v677_v24 = vadd.f32 %v1469_v10, %v676_v20  ;;  %v805_v25 = vadd.f32 %v1469_v10, %v804_v21  ;;  %v678_v26 = vpop.f32.mrb[51].mxu0  ;;  %v806_v27 = vpop.f32.mrb[51].mxu1 }
 0x15d   :  { %920 = vst [vmem:[%s1730_s3 + $0xc0] sm:$0xff] %v856_v22  ;;  %952 = vst [vmem:[%s1730_s3 + $0x1c0] sm:$0xff] %v888_v23  ;;  %v857_v28 = vmax.f32 %v677_v24, 0.0  ;;  %v889_v29 = vmax.f32 %v805_v25, 0.0 }
 0x15f   :  { %921 = vst [vmem:[%s1730_s3 + $0xc8] sm:$0xff] %v857_v28  ;;  %953 = vst [vmem:[%s1730_s3 + $0x1c8] sm:$0xff] %v889_v29 }
 0x160   :  { %v681_v30 = vpop.f32.mrb[52].mxu0  ;;  %v809_v31 = vpop.f32.mrb[52].mxu1 }
 0x161   :  { %v682_v32 = vadd.f32 %v1469_v10, %v681_v30  ;;  %v810_v33 = vadd.f32 %v1469_v10, %v809_v31  ;;  %v683_v34 = vpop.f32.mrb[53].mxu0  ;;  %v811_v35 = vpop.f32.mrb[53].mxu1 }
 0x162   :  { %v684_v36 = vpop.f32.mrb[54].mxu0  ;;  %v812_v37 = vpop.f32.mrb[54].mxu1 }
 0x163   :  { %v858_v38 = vmax.f32 %v682_v32, 0.0  ;;  %v890_v39 = vmax.f32 %v810_v33, 0.0  ;;  %v685_v40 = vadd.f32 %v1469_v10, %v684_v36  ;;  %v813_v41 = vadd.f32 %v1469_v10, %v812_v37  ;;  %v686_v42 = vpop.f32.mrb[55].mxu0  ;;  %v814_v43 = vpop.f32.mrb[55].mxu1 }
 0x165   :  { %922 = vst [vmem:[%s1730_s3 + $0xd0] sm:$0xff] %v858_v38  ;;  %954 = vst [vmem:[%s1730_s3 + $0x1d0] sm:$0xff] %v890_v39  ;;  %v859_v44 = vmax.f32 %v685_v40, 0.0  ;;  %v891_v45 = vmax.f32 %v813_v41, 0.0 }
 0x167   :  { %923 = vst [vmem:[%s1730_s3 + $0xd8] sm:$0xff] %v859_v44  ;;  %955 = vst [vmem:[%s1730_s3 + $0x1d8] sm:$0xff] %v891_v45 }
 0x168   :  { %v689_v46 = vpop.f32.mrb[56].mxu0  ;;  %v817_v47 = vpop.f32.mrb[56].mxu1 }
 0x169   :  { %v690_v48 = vadd.f32 %v1469_v10, %v689_v46  ;;  %v818_v49 = vadd.f32 %v1469_v10, %v817_v47  ;;  %v691_v50 = vpop.f32.mrb[57].mxu0  ;;  %v819_v51 = vpop.f32.mrb[57].mxu1 }
 0x16a   :  { %v692_v52 = vpop.f32.mrb[58].mxu0  ;;  %v820_v53 = vpop.f32.mrb[58].mxu1 }
 0x16b   :  { %v860_v54 = vmax.f32 %v690_v48, 0.0  ;;  %v892_v55 = vmax.f32 %v818_v49, 0.0  ;;  %v693_v56 = vadd.f32 %v1469_v10, %v692_v52  ;;  %v821_v57 = vadd.f32 %v1469_v10, %v820_v53  ;;  %v694_v58 = vpop.f32.mrb[59].mxu0  ;;  %v822_v59 = vpop.f32.mrb[59].mxu1 }
 0x16d   :  { %924 = vst [vmem:[%s1730_s3 + $0xe0] sm:$0xff] %v860_v54  ;;  %956 = vst [vmem:[%s1730_s3 + $0x1e0] sm:$0xff] %v892_v55  ;;  %v861_v60 = vmax.f32 %v693_v56, 0.0  ;;  %v893_v61 = vmax.f32 %v821_v57, 0.0 }
 0x16f   :  { %925 = vst [vmem:[%s1730_s3 + $0xe8] sm:$0xff] %v861_v60  ;;  %957 = vst [vmem:[%s1730_s3 + $0x1e8] sm:$0xff] %v893_v61 }
 0x170   :  { %v697_v62 = vpop.f32.mrb[60].mxu0  ;;  %v825_v63 = vpop.f32.mrb[60].mxu1 }
 0x171   :  { %v698_v0 = vadd.f32 %v1469_v10, %v697_v62  ;;  %v826_v1 = vadd.f32 %v1469_v10, %v825_v63  ;;  %v699_v2 = vpop.f32.mrb[61].mxu0  ;;  %v827_v3 = vpop.f32.mrb[61].mxu1 }
 0x172   :  { %v700_v4 = vpop.f32.mrb[62].mxu0  ;;  %v828_v5 = vpop.f32.mrb[62].mxu1 }
 0x173   :  { %v862_v6 = vmax.f32 %v698_v0, 0.0  ;;  %v894_v7 = vmax.f32 %v826_v1, 0.0  ;;  %v701_v8 = vadd.f32 %v1469_v10, %v700_v4  ;;  %v829_v9 = vadd.f32 %v1469_v10, %v828_v5  ;;  %v702_v11 = vpop.f32.mrb[63].mxu0  ;;  %v830_v12 = vpop.f32.mrb[63].mxu1 }
 0x175   :  { %926 = vst [vmem:[%s1730_s3 + $0xf0] sm:$0xff] %v862_v6  ;;  %958 = vst [vmem:[%s1730_s3 + $0x1f0] sm:$0xff] %v894_v7  ;;  %v863_v13 = vmax.f32 %v701_v8, 0.0  ;;  %v895_v14 = vmax.f32 %v829_v9, 0.0 }
 0x177   :  { %927 = vst [vmem:[%s1730_s3 + $0xf8] sm:$0xff] %v863_v13  ;;  %959 = vst [vmem:[%s1730_s3 + $0x1f8] sm:$0xff] %v895_v14 }

// kernel: wresnet_forward.12
= control target key start
LH: loop header
LB: loop body
LE: loop exit
PB: predicated region body
PF: predicated region fallthrough
CT: control target
= control target key end

     0   :  { %v1325_v0 = vmov 0   ;;  %vm449_vm0 = vcmask 130048   ;;  %s2055_s1 = inlined_call_operand.vmem [shape: bf16[144,128], index: 1, kind: input, shape index: {}]   ;;  %s2056_s0 = inlined_call_operand.vmem [shape: bf16[512,144], index: 0, kind: input, shape index: {}]   ;;  %s2057_s2 = inlined_call_operand.vmem [shape: f32[1,128], index: 2, kind: input, shape index: {}]   ;;  %s2058_s3 = inlined_call_operand.vmem [shape: f32[512,128], index: 3, kind: input, shape index: {}]   ;;  %s2059_s4 = inlined_call_operand.vmem [shape: f32[512,128], index: 4, kind: output, shape index: {}]  }
   0x1   :  { %546 = vmatprep.subr.bf16.mxu0 %v1325_v0  ;;  %1201 = vmatprep.subr.bf16.mxu1 %v1325_v0  ;;  %v1220_v1 = vld [vmem:[%s2055_s1] sm:$0xff]   ;;  %v1221_v2 = vld [vmem:[%s2055_s1 + $0x8] sm:$0xff]   ;;  %v1222_v3 = vld [vmem:[%s2055_s1 + $0x10] sm:$0xff]  }
   0x2   :  { %547 = vmatpush1.bf16.msra.mxu0 %v1220_v1  ;;  %1210 = vmatpush1.bf16.msra.mxu1 %v1220_v1  ;;  %v1223_v4 = vld [vmem:[%s2055_s1 + $0x18] sm:$0xff]   ;;  %v1231_v5 = vld [vmem:[%s2056_s0 + $0x4] ss:$8 sps:$4 sm:$0xff]   ;;  %v1226_v9 = vld [vmem:[%s2055_s1 + $0x30] sm:$0xff]  }
   0x3   :  { %548 = vmatprep.subr.bf16.mxu0 %v1325_v0  ;;  %1202 = vmatprep.subr.bf16.mxu1 %v1325_v0  ;;  %v1234_v6 = vld [vmem:[%s2056_s0 + $0x104] ss:$8 sps:$4 sm:$0xff]   ;;  %v1227_v10 = vld [vmem:[%s2055_s1 + $0x38] sm:$0xff]   ;;  %v1229_v12 = vld [vmem:[%s2056_s0] ss:$8 sps:$4 sm:$0xff]  }
   0x4   :  { %1169 = vmatprep.mubr.msk.bf16.mxu0 %vm449_vm0, %v1231_v5  ;;  %1185 = vmatprep.mubr.msk.bf16.mxu1 %vm449_vm0, %v1234_v6  ;;  %v1224_v7 = vld [vmem:[%s2055_s1 + $0x20] sm:$0xff]   ;;  %v1225_v8 = vld [vmem:[%s2055_s1 + $0x28] sm:$0xff]   ;;  %v1235_v14 = vld [vmem:[%s2056_s0 + $0x14] ss:$8 sps:$4 sm:$0xff]  }
   0x5   :  { %v1228_v11 = vld [vmem:[%s2055_s1 + $0x40] sm:$0xff]   ;;  %v1237_v15 = vld [vmem:[%s2056_s0 + $0x114] ss:$8 sps:$4 sm:$0xff]   ;;  %v1239_v16 = vld [vmem:[%s2056_s0 + $0x10] ss:$8 sps:$4 sm:$0xff]  }
   0x6   :  { %549 = vmatpush1.bf16.msra.mxu0 %v1221_v2  ;;  %1211 = vmatpush1.bf16.msra.mxu1 %v1221_v2  ;;  %v1232_v13 = vld [vmem:[%s2056_s0 + $0x100] ss:$8 sps:$4 sm:$0xff]   ;;  %v1240_v17 = vld [vmem:[%s2056_s0 + $0x110] ss:$8 sps:$4 sm:$0xff]   ;;  %v1241_v18 = vld [vmem:[%s2056_s0 + $0x24] ss:$8 sps:$4 sm:$0xff]  }
   0x7   :  { %550 = vmatprep.subr.bf16.mxu0 %v1325_v0  ;;  %1203 = vmatprep.subr.bf16.mxu1 %v1325_v0  ;;  %v1243_v19 = vld [vmem:[%s2056_s0 + $0x124] ss:$8 sps:$4 sm:$0xff]   ;;  %v1245_v20 = vld [vmem:[%s2056_s0 + $0x20] ss:$8 sps:$4 sm:$0xff]   ;;  %v1247_v22 = vld [vmem:[%s2056_s0 + $0x34] ss:$8 sps:$4 sm:$0xff]  }
   0x8   :  { %v1246_v21 = vld [vmem:[%s2056_s0 + $0x120] ss:$8 sps:$4 sm:$0xff]   ;;  %v1249_v23 = vld [vmem:[%s2056_s0 + $0x134] ss:$8 sps:$4 sm:$0xff]   ;;  %v1251_v24 = vld [vmem:[%s2056_s0 + $0x30] ss:$8 sps:$4 sm:$0xff]  }
   0x9   :  { %v1252_v25 = vld [vmem:[%s2056_s0 + $0x130] ss:$8 sps:$4 sm:$0xff]   ;;  %v1253_v26 = vld [vmem:[%s2056_s0 + $0x44] ss:$8 sps:$4 sm:$0xff]   ;;  %v1257_v28 = vld [vmem:[%s2056_s0 + $0x40] ss:$8 sps:$4 sm:$0xff]  }
   0xa   :  { %551 = vmatpush1.bf16.msra.mxu0 %v1222_v3  ;;  %1212 = vmatpush1.bf16.msra.mxu1 %v1222_v3  ;;  %v1255_v27 = vld [vmem:[%s2056_s0 + $0x144] ss:$8 sps:$4 sm:$0xff]   ;;  %v1258_v29 = vld [vmem:[%s2056_s0 + $0x140] ss:$8 sps:$4 sm:$0xff]   ;;  %v1259_v30 = vld [vmem:[%s2056_s0 + $0x54] ss:$8 sps:$4 sm:$0xff]  }
   0xb   :  { %552 = vmatprep.subr.bf16.mxu0 %v1325_v0  ;;  %1204 = vmatprep.subr.bf16.mxu1 %v1325_v0  ;;  %v1261_v31 = vld [vmem:[%s2056_s0 + $0x154] ss:$8 sps:$4 sm:$0xff]   ;;  %v1263_v32 = vld [vmem:[%s2056_s0 + $0x50] ss:$8 sps:$4 sm:$0xff]   ;;  %v1265_v34 = vld [vmem:[%s2056_s0 + $0x64] ss:$8 sps:$4 sm:$0xff]  }
   0xc   :  { %v1264_v33 = vld [vmem:[%s2056_s0 + $0x150] ss:$8 sps:$4 sm:$0xff]   ;;  %v1267_v35 = vld [vmem:[%s2056_s0 + $0x164] ss:$8 sps:$4 sm:$0xff]   ;;  %v1269_v36 = vld [vmem:[%s2056_s0 + $0x60] ss:$8 sps:$4 sm:$0xff]  }
   0xd   :  { %v1270_v37 = vld [vmem:[%s2056_s0 + $0x160] ss:$8 sps:$4 sm:$0xff]   ;;  %v1271_v38 = vld [vmem:[%s2056_s0 + $0x74] ss:$8 sps:$4 sm:$0xff]   ;;  %v1275_v40 = vld [vmem:[%s2056_s0 + $0x70] ss:$8 sps:$4 sm:$0xff]  }
   0xe   :  { %553 = vmatpush1.bf16.msra.mxu0 %v1223_v4  ;;  %1213 = vmatpush1.bf16.msra.mxu1 %v1223_v4  ;;  %v1273_v39 = vld [vmem:[%s2056_s0 + $0x174] ss:$8 sps:$4 sm:$0xff]   ;;  %v1276_v41 = vld [vmem:[%s2056_s0 + $0x170] ss:$8 sps:$4 sm:$0xff]   ;;  %v1277_v42 = vld [vmem:[%s2056_s0 + $0x84] ss:$8 sps:$4 sm:$0xff]  }
   0xf   :  { %554 = vmatprep.subr.bf16.mxu0 %v1325_v0  ;;  %1205 = vmatprep.subr.bf16.mxu1 %v1325_v0  ;;  %v1279_v43 = vld [vmem:[%s2056_s0 + $0x184] ss:$8 sps:$4 sm:$0xff]   ;;  %v1281_v44 = vld [vmem:[%s2056_s0 + $0x80] ss:$8 sps:$4 sm:$0xff]   ;;  %v1283_v46 = vld [vmem:[%s2056_s0 + $0x94] ss:$8 sps:$4 sm:$0xff]  }
  0x10   :  { %v1282_v45 = vld [vmem:[%s2056_s0 + $0x180] ss:$8 sps:$4 sm:$0xff]   ;;  %v1285_v47 = vld [vmem:[%s2056_s0 + $0x194] ss:$8 sps:$4 sm:$0xff]   ;;  %v1287_v48 = vld [vmem:[%s2056_s0 + $0x90] ss:$8 sps:$4 sm:$0xff]  }
  0x11   :  { %v1288_v49 = vld [vmem:[%s2056_s0 + $0x190] ss:$8 sps:$4 sm:$0xff]   ;;  %v1289_v50 = vld [vmem:[%s2056_s0 + $0xa4] ss:$8 sps:$4 sm:$0xff]   ;;  %v1293_v52 = vld [vmem:[%s2056_s0 + $0xa0] ss:$8 sps:$4 sm:$0xff]  }
  0x12   :  { %555 = vmatpush1.bf16.msra.mxu0 %v1224_v7  ;;  %1214 = vmatpush1.bf16.msra.mxu1 %v1224_v7  ;;  %v1291_v51 = vld [vmem:[%s2056_s0 + $0x1a4] ss:$8 sps:$4 sm:$0xff]   ;;  %v1294_v53 = vld [vmem:[%s2056_s0 + $0x1a0] ss:$8 sps:$4 sm:$0xff]   ;;  %v1295_v54 = vld [vmem:[%s2056_s0 + $0xb4] ss:$8 sps:$4 sm:$0xff]  }
  0x13   :  { %556 = vmatprep.subr.bf16.mxu0 %v1325_v0  ;;  %1206 = vmatprep.subr.bf16.mxu1 %v1325_v0  ;;  %v1297_v55 = vld [vmem:[%s2056_s0 + $0x1b4] ss:$8 sps:$4 sm:$0xff]   ;;  %v1299_v56 = vld [vmem:[%s2056_s0 + $0xb0] ss:$8 sps:$4 sm:$0xff]   ;;  %v1301_v58 = vld [vmem:[%s2056_s0 + $0xc4] ss:$8 sps:$4 sm:$0xff]  }
  0x14   :  { %v1300_v57 = vld [vmem:[%s2056_s0 + $0x1b0] ss:$8 sps:$4 sm:$0xff]   ;;  %v1303_v59 = vld [vmem:[%s2056_s0 + $0x1c4] ss:$8 sps:$4 sm:$0xff]   ;;  %v1305_v60 = vld [vmem:[%s2056_s0 + $0xc0] ss:$8 sps:$4 sm:$0xff]  }
  0x15   :  { %v1306_v61 = vld [vmem:[%s2056_s0 + $0x1c0] ss:$8 sps:$4 sm:$0xff]   ;;  %v1307_v62 = vld [vmem:[%s2056_s0 + $0xd4] ss:$8 sps:$4 sm:$0xff]   ;;  %v1312_v1 = vld [vmem:[%s2056_s0 + $0x1d0] ss:$8 sps:$4 sm:$0xff]  }
  0x16   :  { %557 = vmatpush1.bf16.msra.mxu0 %v1225_v8  ;;  %1215 = vmatpush1.bf16.msra.mxu1 %v1225_v8  ;;  %v1309_v63 = vld [vmem:[%s2056_s0 + $0x1d4] ss:$8 sps:$4 sm:$0xff]   ;;  %v1313_v2 = vld [vmem:[%s2056_s0 + $0xe4] ss:$8 sps:$4 sm:$0xff]   ;;  %v1317_v4 = vld [vmem:[%s2056_s0 + $0xe0] ss:$8 sps:$4 sm:$0xff]  }
  0x17   :  { %558 = vmatprep.subr.bf16.mxu0 %v1325_v0  ;;  %1207 = vmatprep.subr.bf16.mxu1 %v1325_v0  ;;  %v1315_v3 = vld [vmem:[%s2056_s0 + $0x1e4] ss:$8 sps:$4 sm:$0xff]   ;;  %v1318_v5 = vld [vmem:[%s2056_s0 + $0x1e0] ss:$8 sps:$4 sm:$0xff]   ;;  %v1319_v6 = vld [vmem:[%s2056_s0 + $0xf4] ss:$8 sps:$4 sm:$0xff]  }
  0x18   :  { %v1321_v7 = vld [vmem:[%s2056_s0 + $0x1f4] ss:$8 sps:$4 sm:$0xff]   ;;  %v1323_v8 = vld [vmem:[%s2056_s0 + $0xf0] ss:$8 sps:$4 sm:$0xff]  }
  0x1a   :  { %559 = vmatpush1.bf16.msra.mxu0 %v1226_v9  ;;  %1216 = vmatpush1.bf16.msra.mxu1 %v1226_v9  ;;  %v1324_v9 = vld [vmem:[%s2056_s0 + $0x1f0] ss:$8 sps:$4 sm:$0xff]  }
  0x1b   :  { %560 = vmatprep.subr.bf16.mxu0 %v1325_v0  ;;  %1208 = vmatprep.subr.bf16.mxu1 %v1325_v0 }
  0x1e   :  { %561 = vmatpush1.bf16.msra.mxu0 %v1227_v10  ;;  %1217 = vmatpush1.bf16.msra.mxu1 %v1227_v10  ;;  %v1605_v10 = vld [vmem:[%s2057_s2] ss:$0 sm:$0xff] }
  0x1f   :  { %562 = vmatprep.subr.bf16.mxu0 %v1325_v0  ;;  %1209 = vmatprep.subr.bf16.mxu1 %v1325_v0  ;;  %v1311_v0 = vld [vmem:[%s2056_s0 + $0xd0] ss:$8 sps:$4 sm:$0xff]  }
  0x22   :  { %563 = vmatpush1.bf16.msra.mxu0 %v1228_v11  ;;  %1218 = vmatpush1.bf16.msra.mxu1 %v1228_v11 }
  0x25   :  { %579 = vmatmul.mubr.bf16.vlgmr.msra.gmra.mrb[0].mxu0 %v1229_v12  ;;  %707 = vmatmul.mubr.bf16.vlgmr.msra.gmra.mrb[0].mxu1 %v1232_v13  ;;  %v835_v12 = vld [vmem:[%s2058_s3] sm:$0xff] }
  0x26   :  { %1170 = vmatprep.mubr.msk.bf16.mxu0 %vm449_vm0, %v1235_v14  ;;  %1186 = vmatprep.mubr.msk.bf16.mxu1 %vm449_vm0, %v1237_v15  ;;  %v867_v14 = vld [vmem:[%s2058_s3 + $0x100] sm:$0xff] }
  0x2d   :  { %587 = vmatmul.mubr.bf16.gmra.mrb[4].mxu0 %v1239_v16  ;;  %715 = vmatmul.mubr.bf16.gmra.mrb[4].mxu1 %v1240_v17 }
  0x2e   :  { %1171 = vmatprep.mubr.msk.bf16.mxu0 %vm449_vm0, %v1241_v18  ;;  %1187 = vmatprep.mubr.msk.bf16.mxu1 %vm449_vm0, %v1243_v19 }
  0x35   :  { %595 = vmatmul.mubr.bf16.gmra.mrb[8].mxu0 %v1245_v20  ;;  %723 = vmatmul.mubr.bf16.gmra.mrb[8].mxu1 %v1246_v21  ;;  %v836_v20 = vld [vmem:[%s2058_s3 + $0x8] sm:$0xff] }
  0x36   :  { %1172 = vmatprep.mubr.msk.bf16.mxu0 %vm449_vm0, %v1247_v22  ;;  %1188 = vmatprep.mubr.msk.bf16.mxu1 %vm449_vm0, %v1249_v23  ;;  %v868_v22 = vld [vmem:[%s2058_s3 + $0x108] sm:$0xff] }
  0x3d   :  { %603 = vmatmul.mubr.bf16.gmra.mrb[12].mxu0 %v1251_v24  ;;  %731 = vmatmul.mubr.bf16.gmra.mrb[12].mxu1 %v1252_v25 }
  0x3e   :  { %1173 = vmatprep.mubr.msk.bf16.mxu0 %vm449_vm0, %v1253_v26  ;;  %1189 = vmatprep.mubr.msk.bf16.mxu1 %vm449_vm0, %v1255_v27 }
  0x45   :  { %611 = vmatmul.mubr.bf16.gmra.mrb[16].mxu0 %v1257_v28  ;;  %739 = vmatmul.mubr.bf16.gmra.mrb[16].mxu1 %v1258_v29 }
  0x46   :  { %1174 = vmatprep.mubr.msk.bf16.mxu0 %vm449_vm0, %v1259_v30  ;;  %1190 = vmatprep.mubr.msk.bf16.mxu1 %vm449_vm0, %v1261_v31 }
  0x4d   :  { %619 = vmatmul.mubr.bf16.gmra.mrb[20].mxu0 %v1263_v32  ;;  %747 = vmatmul.mubr.bf16.gmra.mrb[20].mxu1 %v1264_v33 }
  0x4e   :  { %1175 = vmatprep.mubr.msk.bf16.mxu0 %vm449_vm0, %v1265_v34  ;;  %1191 = vmatprep.mubr.msk.bf16.mxu1 %vm449_vm0, %v1267_v35 }
  0x55   :  { %627 = vmatmul.mubr.bf16.gmra.mrb[24].mxu0 %v1269_v36  ;;  %755 = vmatmul.mubr.bf16.gmra.mrb[24].mxu1 %v1270_v37  ;;  %v837_v36 = vld [vmem:[%s2058_s3 + $0x10] sm:$0xff] }
  0x56   :  { %1176 = vmatprep.mubr.msk.bf16.mxu0 %vm449_vm0, %v1271_v38  ;;  %1192 = vmatprep.mubr.msk.bf16.mxu1 %vm449_vm0, %v1273_v39  ;;  %v869_v38 = vld [vmem:[%s2058_s3 + $0x110] sm:$0xff] }
  0x5d   :  { %635 = vmatmul.mubr.bf16.gmra.mrb[28].mxu0 %v1275_v40  ;;  %763 = vmatmul.mubr.bf16.gmra.mrb[28].mxu1 %v1276_v41 }
  0x5e   :  { %1177 = vmatprep.mubr.msk.bf16.mxu0 %vm449_vm0, %v1277_v42  ;;  %1193 = vmatprep.mubr.msk.bf16.mxu1 %vm449_vm0, %v1279_v43 }
  0x65   :  { %643 = vmatmul.mubr.bf16.gmra.mrb[32].mxu0 %v1281_v44  ;;  %771 = vmatmul.mubr.bf16.gmra.mrb[32].mxu1 %v1282_v45  ;;  %v838_v44 = vld [vmem:[%s2058_s3 + $0x18] sm:$0xff] }
  0x66   :  { %1178 = vmatprep.mubr.msk.bf16.mxu0 %vm449_vm0, %v1283_v46  ;;  %1194 = vmatprep.mubr.msk.bf16.mxu1 %vm449_vm0, %v1285_v47  ;;  %v870_v46 = vld [vmem:[%s2058_s3 + $0x118] sm:$0xff] }
  0x6d   :  { %651 = vmatmul.mubr.bf16.gmra.mrb[36].mxu0 %v1287_v48  ;;  %779 = vmatmul.mubr.bf16.gmra.mrb[36].mxu1 %v1288_v49 }
  0x6e   :  { %1179 = vmatprep.mubr.msk.bf16.mxu0 %vm449_vm0, %v1289_v50  ;;  %1195 = vmatprep.mubr.msk.bf16.mxu1 %vm449_vm0, %v1291_v51 }
  0x75   :  { %659 = vmatmul.mubr.bf16.gmra.mrb[40].mxu0 %v1293_v52  ;;  %787 = vmatmul.mubr.bf16.gmra.mrb[40].mxu1 %v1294_v53 }
  0x76   :  { %1180 = vmatprep.mubr.msk.bf16.mxu0 %vm449_vm0, %v1295_v54  ;;  %1196 = vmatprep.mubr.msk.bf16.mxu1 %vm449_vm0, %v1297_v55 }
  0x7d   :  { %667 = vmatmul.mubr.bf16.gmra.mrb[44].mxu0 %v1299_v56  ;;  %795 = vmatmul.mubr.bf16.gmra.mrb[44].mxu1 %v1300_v57 }
  0x7e   :  { %1181 = vmatprep.mubr.msk.bf16.mxu0 %vm449_vm0, %v1301_v58  ;;  %1197 = vmatprep.mubr.msk.bf16.mxu1 %vm449_vm0, %v1303_v59 }
  0x85   :  { %675 = vmatmul.mubr.bf16.gmra.mrb[48].mxu0 %v1305_v60  ;;  %803 = vmatmul.mubr.bf16.gmra.mrb[48].mxu1 %v1306_v61  ;;  %v839_v60 = vld [vmem:[%s2058_s3 + $0x20] sm:$0xff] }
  0x86   :  { %1182 = vmatprep.mubr.msk.bf16.mxu0 %vm449_vm0, %v1307_v62  ;;  %1198 = vmatprep.mubr.msk.bf16.mxu1 %vm449_vm0, %v1309_v63  ;;  %v871_v62 = vld [vmem:[%s2058_s3 + $0x120] sm:$0xff] }
  0x8d   :  { %683 = vmatmul.mubr.bf16.gmra.mrb[52].mxu0 %v1311_v0  ;;  %811 = vmatmul.mubr.bf16.gmra.mrb[52].mxu1 %v1312_v1 }
  0x8e   :  { %1183 = vmatprep.mubr.msk.bf16.mxu0 %vm449_vm0, %v1313_v2  ;;  %1199 = vmatprep.mubr.msk.bf16.mxu1 %vm449_vm0, %v1315_v3 }
  0x95   :  { %691 = vmatmul.mubr.bf16.gmra.mrb[56].mxu0 %v1317_v4  ;;  %819 = vmatmul.mubr.bf16.gmra.mrb[56].mxu1 %v1318_v5  ;;  %v840_v4 = vld [vmem:[%s2058_s3 + $0x28] sm:$0xff] }
  0x96   :  { %1184 = vmatprep.mubr.msk.bf16.mxu0 %vm449_vm0, %v1319_v6  ;;  %1200 = vmatprep.mubr.msk.bf16.mxu1 %vm449_vm0, %v1321_v7  ;;  %v872_v6 = vld [vmem:[%s2058_s3 + $0x128] sm:$0xff] }
  0x9d   :  { %699 = vmatmul.mubr.bf16.gmra.mrb[60].mxu0 %v1323_v8  ;;  %827 = vmatmul.mubr.bf16.gmra.mrb[60].mxu1 %v1324_v9 }
  0xf8   :  { %v580_v11 = vpop.f32.mrb[0].mxu0  ;;  %v708_v13 = vpop.f32.mrb[0].mxu1 }
  0xf9   :  { %v581_v15 = vadd.f32 %v1605_v10, %v580_v11  ;;  %v709_v16 = vadd.f32 %v1605_v10, %v708_v13  ;;  %v582_v17 = vpop.f32.mrb[1].mxu0  ;;  %v710_v18 = vpop.f32.mrb[1].mxu1 }
  0xfa   :  { %v583_v19 = vpop.f32.mrb[2].mxu0  ;;  %v711_v21 = vpop.f32.mrb[2].mxu1 }
  0xfb   :  { %v899_v23 = vadd.f32 %v835_v12, %v581_v15  ;;  %v931_v24 = vadd.f32 %v867_v14, %v709_v16  ;;  %v584_v25 = vadd.f32 %v1605_v10, %v583_v19  ;;  %v712_v26 = vadd.f32 %v1605_v10, %v711_v21  ;;  %v585_v27 = vpop.f32.mrb[3].mxu0  ;;  %v713_v28 = vpop.f32.mrb[3].mxu1  ;;  %v841_v21 = vld [vmem:[%s2058_s3 + $0x30] sm:$0xff] }
  0xfd   :  { %v963_v29 = vmax.f32 %v899_v23, 0.0  ;;  %v995_v30 = vmax.f32 %v931_v24, 0.0  ;;  %v900_v31 = vadd.f32 %v836_v20, %v584_v25  ;;  %v932_v32 = vadd.f32 %v868_v22, %v712_v26  ;;  %v873_v23 = vld [vmem:[%s2058_s3 + $0x130] sm:$0xff] }
  0xff   :  { %1027 = vst [vmem:[%s2059_s4] sm:$0xff] %v963_v29  ;;  %1059 = vst [vmem:[%s2059_s4 + $0x100] sm:$0xff] %v995_v30  ;;  %v964_v33 = vmax.f32 %v900_v31, 0.0  ;;  %v996_v34 = vmax.f32 %v932_v32, 0.0  ;;  %v842_v29 = vld [vmem:[%s2058_s3 + $0x38] sm:$0xff] }
 0x100   :  { %v588_v35 = vpop.f32.mrb[4].mxu0  ;;  %v716_v37 = vpop.f32.mrb[4].mxu1  ;;  %v874_v31 = vld [vmem:[%s2058_s3 + $0x138] sm:$0xff] }
 0x101   :  { %1028 = vst [vmem:[%s2059_s4 + $0x8] sm:$0xff] %v964_v33  ;;  %1060 = vst [vmem:[%s2059_s4 + $0x108] sm:$0xff] %v996_v34  ;;  %v589_v39 = vadd.f32 %v1605_v10, %v588_v35  ;;  %v717_v40 = vadd.f32 %v1605_v10, %v716_v37  ;;  %v590_v41 = vpop.f32.mrb[5].mxu0  ;;  %v718_v42 = vpop.f32.mrb[5].mxu1 }
 0x102   :  { %v591_v43 = vpop.f32.mrb[6].mxu0  ;;  %v719_v45 = vpop.f32.mrb[6].mxu1 }
 0x103   :  { %v901_v47 = vadd.f32 %v837_v36, %v589_v39  ;;  %v933_v48 = vadd.f32 %v869_v38, %v717_v40  ;;  %v592_v49 = vadd.f32 %v1605_v10, %v591_v43  ;;  %v720_v50 = vadd.f32 %v1605_v10, %v719_v45  ;;  %v593_v51 = vpop.f32.mrb[7].mxu0  ;;  %v721_v52 = vpop.f32.mrb[7].mxu1  ;;  %v843_v45 = vld [vmem:[%s2058_s3 + $0x40] sm:$0xff] }
 0x105   :  { %v965_v53 = vmax.f32 %v901_v47, 0.0  ;;  %v997_v54 = vmax.f32 %v933_v48, 0.0  ;;  %v902_v55 = vadd.f32 %v838_v44, %v592_v49  ;;  %v934_v56 = vadd.f32 %v870_v46, %v720_v50  ;;  %v875_v47 = vld [vmem:[%s2058_s3 + $0x140] sm:$0xff] }
 0x107   :  { %1029 = vst [vmem:[%s2059_s4 + $0x10] sm:$0xff] %v965_v53  ;;  %1061 = vst [vmem:[%s2059_s4 + $0x110] sm:$0xff] %v997_v54  ;;  %v966_v57 = vmax.f32 %v902_v55, 0.0  ;;  %v998_v58 = vmax.f32 %v934_v56, 0.0  ;;  %v844_v53 = vld [vmem:[%s2058_s3 + $0x48] sm:$0xff] }
 0x108   :  { %v596_v59 = vpop.f32.mrb[8].mxu0  ;;  %v724_v61 = vpop.f32.mrb[8].mxu1  ;;  %v876_v55 = vld [vmem:[%s2058_s3 + $0x148] sm:$0xff] }
 0x109   :  { %1030 = vst [vmem:[%s2059_s4 + $0x18] sm:$0xff] %v966_v57  ;;  %1062 = vst [vmem:[%s2059_s4 + $0x118] sm:$0xff] %v998_v58  ;;  %v597_v63 = vadd.f32 %v1605_v10, %v596_v59  ;;  %v725_v0 = vadd.f32 %v1605_v10, %v724_v61  ;;  %v598_v1 = vpop.f32.mrb[9].mxu0  ;;  %v726_v2 = vpop.f32.mrb[9].mxu1 }
 0x10a   :  { %v599_v3 = vpop.f32.mrb[10].mxu0  ;;  %v727_v5 = vpop.f32.mrb[10].mxu1 }
 0x10b   :  { %v903_v7 = vadd.f32 %v839_v60, %v597_v63  ;;  %v935_v8 = vadd.f32 %v871_v62, %v725_v0  ;;  %v600_v9 = vadd.f32 %v1605_v10, %v599_v3  ;;  %v728_v11 = vadd.f32 %v1605_v10, %v727_v5  ;;  %v601_v12 = vpop.f32.mrb[11].mxu0  ;;  %v729_v13 = vpop.f32.mrb[11].mxu1  ;;  %v845_v5 = vld [vmem:[%s2058_s3 + $0x50] sm:$0xff] }
 0x10d   :  { %v967_v14 = vmax.f32 %v903_v7, 0.0  ;;  %v999_v15 = vmax.f32 %v935_v8, 0.0  ;;  %v904_v16 = vadd.f32 %v840_v4, %v600_v9  ;;  %v936_v17 = vadd.f32 %v872_v6, %v728_v11  ;;  %v877_v7 = vld [vmem:[%s2058_s3 + $0x150] sm:$0xff] }
 0x10f   :  { %1031 = vst [vmem:[%s2059_s4 + $0x20] sm:$0xff] %v967_v14  ;;  %1063 = vst [vmem:[%s2059_s4 + $0x120] sm:$0xff] %v999_v15  ;;  %v968_v18 = vmax.f32 %v904_v16, 0.0  ;;  %v1000_v19 = vmax.f32 %v936_v17, 0.0  ;;  %v846_v14 = vld [vmem:[%s2058_s3 + $0x58] sm:$0xff] }
 0x110   :  { %v604_v20 = vpop.f32.mrb[12].mxu0  ;;  %v732_v22 = vpop.f32.mrb[12].mxu1  ;;  %v878_v16 = vld [vmem:[%s2058_s3 + $0x158] sm:$0xff] }
 0x111   :  { %1032 = vst [vmem:[%s2059_s4 + $0x28] sm:$0xff] %v968_v18  ;;  %1064 = vst [vmem:[%s2059_s4 + $0x128] sm:$0xff] %v1000_v19  ;;  %v605_v24 = vadd.f32 %v1605_v10, %v604_v20  ;;  %v733_v25 = vadd.f32 %v1605_v10, %v732_v22  ;;  %v606_v26 = vpop.f32.mrb[13].mxu0  ;;  %v734_v27 = vpop.f32.mrb[13].mxu1 }
 0x112   :  { %v607_v28 = vpop.f32.mrb[14].mxu0  ;;  %v735_v30 = vpop.f32.mrb[14].mxu1 }
 0x113   :  { %v905_v32 = vadd.f32 %v841_v21, %v605_v24  ;;  %v937_v33 = vadd.f32 %v873_v23, %v733_v25  ;;  %v608_v34 = vadd.f32 %v1605_v10, %v607_v28  ;;  %v736_v35 = vadd.f32 %v1605_v10, %v735_v30  ;;  %v609_v36 = vpop.f32.mrb[15].mxu0  ;;  %v737_v37 = vpop.f32.mrb[15].mxu1  ;;  %v847_v30 = vld [vmem:[%s2058_s3 + $0x60] sm:$0xff] }
 0x115   :  { %v969_v38 = vmax.f32 %v905_v32, 0.0  ;;  %v1001_v39 = vmax.f32 %v937_v33, 0.0  ;;  %v906_v40 = vadd.f32 %v842_v29, %v608_v34  ;;  %v938_v41 = vadd.f32 %v874_v31, %v736_v35  ;;  %v879_v32 = vld [vmem:[%s2058_s3 + $0x160] sm:$0xff] }
 0x117   :  { %1033 = vst [vmem:[%s2059_s4 + $0x30] sm:$0xff] %v969_v38  ;;  %1065 = vst [vmem:[%s2059_s4 + $0x130] sm:$0xff] %v1001_v39  ;;  %v970_v42 = vmax.f32 %v906_v40, 0.0  ;;  %v1002_v43 = vmax.f32 %v938_v41, 0.0  ;;  %v848_v38 = vld [vmem:[%s2058_s3 + $0x68] sm:$0xff] }
 0x118   :  { %v612_v44 = vpop.f32.mrb[16].mxu0  ;;  %v740_v46 = vpop.f32.mrb[16].mxu1  ;;  %v880_v40 = vld [vmem:[%s2058_s3 + $0x168] sm:$0xff] }
 0x119   :  { %1034 = vst [vmem:[%s2059_s4 + $0x38] sm:$0xff] %v970_v42  ;;  %1066 = vst [vmem:[%s2059_s4 + $0x138] sm:$0xff] %v1002_v43  ;;  %v613_v48 = vadd.f32 %v1605_v10, %v612_v44  ;;  %v741_v49 = vadd.f32 %v1605_v10, %v740_v46  ;;  %v614_v50 = vpop.f32.mrb[17].mxu0  ;;  %v742_v51 = vpop.f32.mrb[17].mxu1 }
 0x11a   :  { %v615_v52 = vpop.f32.mrb[18].mxu0  ;;  %v743_v54 = vpop.f32.mrb[18].mxu1 }
 0x11b   :  { %v907_v56 = vadd.f32 %v843_v45, %v613_v48  ;;  %v939_v57 = vadd.f32 %v875_v47, %v741_v49  ;;  %v616_v58 = vadd.f32 %v1605_v10, %v615_v52  ;;  %v744_v59 = vadd.f32 %v1605_v10, %v743_v54  ;;  %v617_v60 = vpop.f32.mrb[19].mxu0  ;;  %v745_v61 = vpop.f32.mrb[19].mxu1  ;;  %v849_v54 = vld [vmem:[%s2058_s3 + $0x70] sm:$0xff] }
 0x11d   :  { %v971_v62 = vmax.f32 %v907_v56, 0.0  ;;  %v1003_v63 = vmax.f32 %v939_v57, 0.0  ;;  %v908_v0 = vadd.f32 %v844_v53, %v616_v58  ;;  %v940_v1 = vadd.f32 %v876_v55, %v744_v59  ;;  %v881_v56 = vld [vmem:[%s2058_s3 + $0x170] sm:$0xff] }
 0x11f   :  { %1035 = vst [vmem:[%s2059_s4 + $0x40] sm:$0xff] %v971_v62  ;;  %1067 = vst [vmem:[%s2059_s4 + $0x140] sm:$0xff] %v1003_v63  ;;  %v972_v2 = vmax.f32 %v908_v0, 0.0  ;;  %v1004_v3 = vmax.f32 %v940_v1, 0.0  ;;  %v850_v62 = vld [vmem:[%s2058_s3 + $0x78] sm:$0xff] }
 0x120   :  { %v620_v4 = vpop.f32.mrb[20].mxu0  ;;  %v748_v6 = vpop.f32.mrb[20].mxu1  ;;  %v882_v0 = vld [vmem:[%s2058_s3 + $0x178] sm:$0xff] }
 0x121   :  { %1036 = vst [vmem:[%s2059_s4 + $0x48] sm:$0xff] %v972_v2  ;;  %1068 = vst [vmem:[%s2059_s4 + $0x148] sm:$0xff] %v1004_v3  ;;  %v621_v8 = vadd.f32 %v1605_v10, %v620_v4  ;;  %v749_v9 = vadd.f32 %v1605_v10, %v748_v6  ;;  %v622_v11 = vpop.f32.mrb[21].mxu0  ;;  %v750_v12 = vpop.f32.mrb[21].mxu1 }
 0x122   :  { %v623_v13 = vpop.f32.mrb[22].mxu0  ;;  %v751_v15 = vpop.f32.mrb[22].mxu1 }
 0x123   :  { %v909_v17 = vadd.f32 %v845_v5, %v621_v8  ;;  %v941_v18 = vadd.f32 %v877_v7, %v749_v9  ;;  %v624_v19 = vadd.f32 %v1605_v10, %v623_v13  ;;  %v752_v20 = vadd.f32 %v1605_v10, %v751_v15  ;;  %v625_v21 = vpop.f32.mrb[23].mxu0  ;;  %v753_v22 = vpop.f32.mrb[23].mxu1  ;;  %v851_v15 = vld [vmem:[%s2058_s3 + $0x80] sm:$0xff] }
 0x125   :  { %v973_v23 = vmax.f32 %v909_v17, 0.0  ;;  %v1005_v24 = vmax.f32 %v941_v18, 0.0  ;;  %v910_v25 = vadd.f32 %v846_v14, %v624_v19  ;;  %v942_v26 = vadd.f32 %v878_v16, %v752_v20  ;;  %v883_v17 = vld [vmem:[%s2058_s3 + $0x180] sm:$0xff] }
 0x127   :  { %1037 = vst [vmem:[%s2059_s4 + $0x50] sm:$0xff] %v973_v23  ;;  %1069 = vst [vmem:[%s2059_s4 + $0x150] sm:$0xff] %v1005_v24  ;;  %v974_v27 = vmax.f32 %v910_v25, 0.0  ;;  %v1006_v28 = vmax.f32 %v942_v26, 0.0  ;;  %v852_v23 = vld [vmem:[%s2058_s3 + $0x88] sm:$0xff] }
 0x128   :  { %v628_v29 = vpop.f32.mrb[24].mxu0  ;;  %v756_v31 = vpop.f32.mrb[24].mxu1  ;;  %v884_v25 = vld [vmem:[%s2058_s3 + $0x188] sm:$0xff] }
 0x129   :  { %1038 = vst [vmem:[%s2059_s4 + $0x58] sm:$0xff] %v974_v27  ;;  %1070 = vst [vmem:[%s2059_s4 + $0x158] sm:$0xff] %v1006_v28  ;;  %v629_v33 = vadd.f32 %v1605_v10, %v628_v29  ;;  %v757_v34 = vadd.f32 %v1605_v10, %v756_v31  ;;  %v630_v35 = vpop.f32.mrb[25].mxu0  ;;  %v758_v36 = vpop.f32.mrb[25].mxu1 }
 0x12a   :  { %v631_v37 = vpop.f32.mrb[26].mxu0  ;;  %v759_v39 = vpop.f32.mrb[26].mxu1 }
 0x12b   :  { %v911_v41 = vadd.f32 %v847_v30, %v629_v33  ;;  %v943_v42 = vadd.f32 %v879_v32, %v757_v34  ;;  %v632_v43 = vadd.f32 %v1605_v10, %v631_v37  ;;  %v760_v44 = vadd.f32 %v1605_v10, %v759_v39  ;;  %v633_v45 = vpop.f32.mrb[27].mxu0  ;;  %v761_v46 = vpop.f32.mrb[27].mxu1  ;;  %v853_v39 = vld [vmem:[%s2058_s3 + $0x90] sm:$0xff] }
 0x12d   :  { %v975_v47 = vmax.f32 %v911_v41, 0.0  ;;  %v1007_v48 = vmax.f32 %v943_v42, 0.0  ;;  %v912_v49 = vadd.f32 %v848_v38, %v632_v43  ;;  %v944_v50 = vadd.f32 %v880_v40, %v760_v44  ;;  %v885_v41 = vld [vmem:[%s2058_s3 + $0x190] sm:$0xff] }
 0x12f   :  { %1039 = vst [vmem:[%s2059_s4 + $0x60] sm:$0xff] %v975_v47  ;;  %1071 = vst [vmem:[%s2059_s4 + $0x160] sm:$0xff] %v1007_v48  ;;  %v976_v51 = vmax.f32 %v912_v49, 0.0  ;;  %v1008_v52 = vmax.f32 %v944_v50, 0.0  ;;  %v854_v47 = vld [vmem:[%s2058_s3 + $0x98] sm:$0xff] }
 0x130   :  { %v636_v53 = vpop.f32.mrb[28].mxu0  ;;  %v764_v55 = vpop.f32.mrb[28].mxu1  ;;  %v886_v49 = vld [vmem:[%s2058_s3 + $0x198] sm:$0xff] }
 0x131   :  { %1040 = vst [vmem:[%s2059_s4 + $0x68] sm:$0xff] %v976_v51  ;;  %1072 = vst [vmem:[%s2059_s4 + $0x168] sm:$0xff] %v1008_v52  ;;  %v637_v57 = vadd.f32 %v1605_v10, %v636_v53  ;;  %v765_v58 = vadd.f32 %v1605_v10, %v764_v55  ;;  %v638_v59 = vpop.f32.mrb[29].mxu0  ;;  %v766_v60 = vpop.f32.mrb[29].mxu1 }
 0x132   :  { %v639_v61 = vpop.f32.mrb[30].mxu0  ;;  %v767_v63 = vpop.f32.mrb[30].mxu1 }
 0x133   :  { %v913_v1 = vadd.f32 %v849_v54, %v637_v57  ;;  %v945_v2 = vadd.f32 %v881_v56, %v765_v58  ;;  %v640_v3 = vadd.f32 %v1605_v10, %v639_v61  ;;  %v768_v4 = vadd.f32 %v1605_v10, %v767_v63  ;;  %v641_v5 = vpop.f32.mrb[31].mxu0  ;;  %v769_v6 = vpop.f32.mrb[31].mxu1  ;;  %v855_v63 = vld [vmem:[%s2058_s3 + $0xa0] sm:$0xff] }
 0x135   :  { %v977_v7 = vmax.f32 %v913_v1, 0.0  ;;  %v1009_v8 = vmax.f32 %v945_v2, 0.0  ;;  %v914_v9 = vadd.f32 %v850_v62, %v640_v3  ;;  %v946_v11 = vadd.f32 %v882_v0, %v768_v4  ;;  %v887_v1 = vld [vmem:[%s2058_s3 + $0x1a0] sm:$0xff] }
 0x137   :  { %1041 = vst [vmem:[%s2059_s4 + $0x70] sm:$0xff] %v977_v7  ;;  %1073 = vst [vmem:[%s2059_s4 + $0x170] sm:$0xff] %v1009_v8  ;;  %v978_v12 = vmax.f32 %v914_v9, 0.0  ;;  %v1010_v13 = vmax.f32 %v946_v11, 0.0  ;;  %v856_v7 = vld [vmem:[%s2058_s3 + $0xa8] sm:$0xff] }
 0x138   :  { %v644_v14 = vpop.f32.mrb[32].mxu0  ;;  %v772_v16 = vpop.f32.mrb[32].mxu1  ;;  %v888_v9 = vld [vmem:[%s2058_s3 + $0x1a8] sm:$0xff] }
 0x139   :  { %1042 = vst [vmem:[%s2059_s4 + $0x78] sm:$0xff] %v978_v12  ;;  %1074 = vst [vmem:[%s2059_s4 + $0x178] sm:$0xff] %v1010_v13  ;;  %v645_v18 = vadd.f32 %v1605_v10, %v644_v14  ;;  %v773_v19 = vadd.f32 %v1605_v10, %v772_v16  ;;  %v646_v20 = vpop.f32.mrb[33].mxu0  ;;  %v774_v21 = vpop.f32.mrb[33].mxu1 }
 0x13a   :  { %v647_v22 = vpop.f32.mrb[34].mxu0  ;;  %v775_v24 = vpop.f32.mrb[34].mxu1 }
 0x13b   :  { %v915_v26 = vadd.f32 %v851_v15, %v645_v18  ;;  %v947_v27 = vadd.f32 %v883_v17, %v773_v19  ;;  %v648_v28 = vadd.f32 %v1605_v10, %v647_v22  ;;  %v776_v29 = vadd.f32 %v1605_v10, %v775_v24  ;;  %v649_v30 = vpop.f32.mrb[35].mxu0  ;;  %v777_v31 = vpop.f32.mrb[35].mxu1  ;;  %v857_v24 = vld [vmem:[%s2058_s3 + $0xb0] sm:$0xff] }
 0x13d   :  { %v979_v32 = vmax.f32 %v915_v26, 0.0  ;;  %v1011_v33 = vmax.f32 %v947_v27, 0.0  ;;  %v916_v34 = vadd.f32 %v852_v23, %v648_v28  ;;  %v948_v35 = vadd.f32 %v884_v25, %v776_v29  ;;  %v889_v26 = vld [vmem:[%s2058_s3 + $0x1b0] sm:$0xff] }
 0x13f   :  { %1043 = vst [vmem:[%s2059_s4 + $0x80] sm:$0xff] %v979_v32  ;;  %1075 = vst [vmem:[%s2059_s4 + $0x180] sm:$0xff] %v1011_v33  ;;  %v980_v36 = vmax.f32 %v916_v34, 0.0  ;;  %v1012_v37 = vmax.f32 %v948_v35, 0.0  ;;  %v858_v32 = vld [vmem:[%s2058_s3 + $0xb8] sm:$0xff] }
 0x140   :  { %v652_v38 = vpop.f32.mrb[36].mxu0  ;;  %v780_v40 = vpop.f32.mrb[36].mxu1  ;;  %v890_v34 = vld [vmem:[%s2058_s3 + $0x1b8] sm:$0xff] }
 0x141   :  { %1044 = vst [vmem:[%s2059_s4 + $0x88] sm:$0xff] %v980_v36  ;;  %1076 = vst [vmem:[%s2059_s4 + $0x188] sm:$0xff] %v1012_v37  ;;  %v653_v42 = vadd.f32 %v1605_v10, %v652_v38  ;;  %v781_v43 = vadd.f32 %v1605_v10, %v780_v40  ;;  %v654_v44 = vpop.f32.mrb[37].mxu0  ;;  %v782_v45 = vpop.f32.mrb[37].mxu1 }
 0x142   :  { %v655_v46 = vpop.f32.mrb[38].mxu0  ;;  %v783_v48 = vpop.f32.mrb[38].mxu1 }
 0x143   :  { %v917_v50 = vadd.f32 %v853_v39, %v653_v42  ;;  %v949_v51 = vadd.f32 %v885_v41, %v781_v43  ;;  %v656_v52 = vadd.f32 %v1605_v10, %v655_v46  ;;  %v784_v53 = vadd.f32 %v1605_v10, %v783_v48  ;;  %v657_v54 = vpop.f32.mrb[39].mxu0  ;;  %v785_v55 = vpop.f32.mrb[39].mxu1  ;;  %v859_v48 = vld [vmem:[%s2058_s3 + $0xc0] sm:$0xff] }
 0x145   :  { %v981_v56 = vmax.f32 %v917_v50, 0.0  ;;  %v1013_v57 = vmax.f32 %v949_v51, 0.0  ;;  %v918_v58 = vadd.f32 %v854_v47, %v656_v52  ;;  %v950_v59 = vadd.f32 %v886_v49, %v784_v53  ;;  %v891_v50 = vld [vmem:[%s2058_s3 + $0x1c0] sm:$0xff] }
 0x147   :  { %1045 = vst [vmem:[%s2059_s4 + $0x90] sm:$0xff] %v981_v56  ;;  %1077 = vst [vmem:[%s2059_s4 + $0x190] sm:$0xff] %v1013_v57  ;;  %v982_v60 = vmax.f32 %v918_v58, 0.0  ;;  %v1014_v61 = vmax.f32 %v950_v59, 0.0  ;;  %v860_v56 = vld [vmem:[%s2058_s3 + $0xc8] sm:$0xff] }
 0x148   :  { %v660_v62 = vpop.f32.mrb[40].mxu0  ;;  %v788_v0 = vpop.f32.mrb[40].mxu1  ;;  %v892_v58 = vld [vmem:[%s2058_s3 + $0x1c8] sm:$0xff] }
 0x149   :  { %1046 = vst [vmem:[%s2059_s4 + $0x98] sm:$0xff] %v982_v60  ;;  %1078 = vst [vmem:[%s2059_s4 + $0x198] sm:$0xff] %v1014_v61  ;;  %v661_v2 = vadd.f32 %v1605_v10, %v660_v62  ;;  %v789_v3 = vadd.f32 %v1605_v10, %v788_v0  ;;  %v662_v4 = vpop.f32.mrb[41].mxu0  ;;  %v790_v5 = vpop.f32.mrb[41].mxu1 }
 0x14a   :  { %v663_v6 = vpop.f32.mrb[42].mxu0  ;;  %v791_v8 = vpop.f32.mrb[42].mxu1 }
 0x14b   :  { %v919_v11 = vadd.f32 %v855_v63, %v661_v2  ;;  %v951_v12 = vadd.f32 %v887_v1, %v789_v3  ;;  %v664_v13 = vadd.f32 %v1605_v10, %v663_v6  ;;  %v792_v14 = vadd.f32 %v1605_v10, %v791_v8  ;;  %v665_v15 = vpop.f32.mrb[43].mxu0  ;;  %v793_v16 = vpop.f32.mrb[43].mxu1  ;;  %v861_v8 = vld [vmem:[%s2058_s3 + $0xd0] sm:$0xff] }
 0x14d   :  { %v983_v17 = vmax.f32 %v919_v11, 0.0  ;;  %v1015_v18 = vmax.f32 %v951_v12, 0.0  ;;  %v920_v19 = vadd.f32 %v856_v7, %v664_v13  ;;  %v952_v20 = vadd.f32 %v888_v9, %v792_v14  ;;  %v893_v11 = vld [vmem:[%s2058_s3 + $0x1d0] sm:$0xff] }
 0x14f   :  { %1047 = vst [vmem:[%s2059_s4 + $0xa0] sm:$0xff] %v983_v17  ;;  %1079 = vst [vmem:[%s2059_s4 + $0x1a0] sm:$0xff] %v1015_v18  ;;  %v984_v21 = vmax.f32 %v920_v19, 0.0  ;;  %v1016_v22 = vmax.f32 %v952_v20, 0.0  ;;  %v862_v17 = vld [vmem:[%s2058_s3 + $0xd8] sm:$0xff] }
 0x150   :  { %v668_v23 = vpop.f32.mrb[44].mxu0  ;;  %v796_v25 = vpop.f32.mrb[44].mxu1  ;;  %v894_v19 = vld [vmem:[%s2058_s3 + $0x1d8] sm:$0xff] }
 0x151   :  { %1048 = vst [vmem:[%s2059_s4 + $0xa8] sm:$0xff] %v984_v21  ;;  %1080 = vst [vmem:[%s2059_s4 + $0x1a8] sm:$0xff] %v1016_v22  ;;  %v669_v27 = vadd.f32 %v1605_v10, %v668_v23  ;;  %v797_v28 = vadd.f32 %v1605_v10, %v796_v25  ;;  %v670_v29 = vpop.f32.mrb[45].mxu0  ;;  %v798_v30 = vpop.f32.mrb[45].mxu1 }
 0x152   :  { %v671_v31 = vpop.f32.mrb[46].mxu0  ;;  %v799_v33 = vpop.f32.mrb[46].mxu1 }
 0x153   :  { %v921_v35 = vadd.f32 %v857_v24, %v669_v27  ;;  %v953_v36 = vadd.f32 %v889_v26, %v797_v28  ;;  %v672_v37 = vadd.f32 %v1605_v10, %v671_v31  ;;  %v800_v38 = vadd.f32 %v1605_v10, %v799_v33  ;;  %v673_v39 = vpop.f32.mrb[47].mxu0  ;;  %v801_v40 = vpop.f32.mrb[47].mxu1  ;;  %v863_v33 = vld [vmem:[%s2058_s3 + $0xe0] sm:$0xff] }
 0x155   :  { %v985_v41 = vmax.f32 %v921_v35, 0.0  ;;  %v1017_v42 = vmax.f32 %v953_v36, 0.0  ;;  %v922_v43 = vadd.f32 %v858_v32, %v672_v37  ;;  %v954_v44 = vadd.f32 %v890_v34, %v800_v38  ;;  %v895_v35 = vld [vmem:[%s2058_s3 + $0x1e0] sm:$0xff] }
 0x157   :  { %1049 = vst [vmem:[%s2059_s4 + $0xb0] sm:$0xff] %v985_v41  ;;  %1081 = vst [vmem:[%s2059_s4 + $0x1b0] sm:$0xff] %v1017_v42  ;;  %v986_v45 = vmax.f32 %v922_v43, 0.0  ;;  %v1018_v46 = vmax.f32 %v954_v44, 0.0  ;;  %v864_v41 = vld [vmem:[%s2058_s3 + $0xe8] sm:$0xff] }
 0x158   :  { %v676_v47 = vpop.f32.mrb[48].mxu0  ;;  %v804_v49 = vpop.f32.mrb[48].mxu1  ;;  %v896_v43 = vld [vmem:[%s2058_s3 + $0x1e8] sm:$0xff] }
 0x159   :  { %1050 = vst [vmem:[%s2059_s4 + $0xb8] sm:$0xff] %v986_v45  ;;  %1082 = vst [vmem:[%s2059_s4 + $0x1b8] sm:$0xff] %v1018_v46  ;;  %v677_v51 = vadd.f32 %v1605_v10, %v676_v47  ;;  %v805_v52 = vadd.f32 %v1605_v10, %v804_v49  ;;  %v678_v53 = vpop.f32.mrb[49].mxu0  ;;  %v806_v54 = vpop.f32.mrb[49].mxu1 }
 0x15a   :  { %v679_v55 = vpop.f32.mrb[50].mxu0  ;;  %v807_v57 = vpop.f32.mrb[50].mxu1 }
 0x15b   :  { %v923_v59 = vadd.f32 %v859_v48, %v677_v51  ;;  %v955_v60 = vadd.f32 %v891_v50, %v805_v52  ;;  %v680_v61 = vadd.f32 %v1605_v10, %v679_v55  ;;  %v808_v62 = vadd.f32 %v1605_v10, %v807_v57  ;;  %v681_v63 = vpop.f32.mrb[51].mxu0  ;;  %v809_v0 = vpop.f32.mrb[51].mxu1  ;;  %v865_v57 = vld [vmem:[%s2058_s3 + $0xf0] sm:$0xff] }
 0x15d   :  { %v987_v1 = vmax.f32 %v923_v59, 0.0  ;;  %v1019_v2 = vmax.f32 %v955_v60, 0.0  ;;  %v924_v3 = vadd.f32 %v860_v56, %v680_v61  ;;  %v956_v4 = vadd.f32 %v892_v58, %v808_v62  ;;  %v897_v59 = vld [vmem:[%s2058_s3 + $0x1f0] sm:$0xff] }
 0x15f   :  { %1051 = vst [vmem:[%s2059_s4 + $0xc0] sm:$0xff] %v987_v1  ;;  %1083 = vst [vmem:[%s2059_s4 + $0x1c0] sm:$0xff] %v1019_v2  ;;  %v988_v5 = vmax.f32 %v924_v3, 0.0  ;;  %v1020_v6 = vmax.f32 %v956_v4, 0.0  ;;  %v866_v1 = vld [vmem:[%s2058_s3 + $0xf8] sm:$0xff] }
 0x160   :  { %v684_v7 = vpop.f32.mrb[52].mxu0  ;;  %v812_v9 = vpop.f32.mrb[52].mxu1  ;;  %v898_v3 = vld [vmem:[%s2058_s3 + $0x1f8] sm:$0xff] }
 0x161   :  { %1052 = vst [vmem:[%s2059_s4 + $0xc8] sm:$0xff] %v988_v5  ;;  %1084 = vst [vmem:[%s2059_s4 + $0x1c8] sm:$0xff] %v1020_v6  ;;  %v685_v12 = vadd.f32 %v1605_v10, %v684_v7  ;;  %v813_v13 = vadd.f32 %v1605_v10, %v812_v9  ;;  %v686_v14 = vpop.f32.mrb[53].mxu0  ;;  %v814_v15 = vpop.f32.mrb[53].mxu1 }
 0x162   :  { %v687_v16 = vpop.f32.mrb[54].mxu0  ;;  %v815_v18 = vpop.f32.mrb[54].mxu1 }
 0x163   :  { %v925_v20 = vadd.f32 %v861_v8, %v685_v12  ;;  %v957_v21 = vadd.f32 %v893_v11, %v813_v13  ;;  %v688_v22 = vadd.f32 %v1605_v10, %v687_v16  ;;  %v816_v23 = vadd.f32 %v1605_v10, %v815_v18  ;;  %v689_v24 = vpop.f32.mrb[55].mxu0  ;;  %v817_v25 = vpop.f32.mrb[55].mxu1 }
 0x165   :  { %v989_v26 = vmax.f32 %v925_v20, 0.0  ;;  %v1021_v27 = vmax.f32 %v957_v21, 0.0  ;;  %v926_v28 = vadd.f32 %v862_v17, %v688_v22  ;;  %v958_v29 = vadd.f32 %v894_v19, %v816_v23 }
 0x167   :  { %1053 = vst [vmem:[%s2059_s4 + $0xd0] sm:$0xff] %v989_v26  ;;  %1085 = vst [vmem:[%s2059_s4 + $0x1d0] sm:$0xff] %v1021_v27  ;;  %v990_v30 = vmax.f32 %v926_v28, 0.0  ;;  %v1022_v31 = vmax.f32 %v958_v29, 0.0 }
 0x168   :  { %v692_v32 = vpop.f32.mrb[56].mxu0  ;;  %v820_v34 = vpop.f32.mrb[56].mxu1 }
 0x169   :  { %1054 = vst [vmem:[%s2059_s4 + $0xd8] sm:$0xff] %v990_v30  ;;  %1086 = vst [vmem:[%s2059_s4 + $0x1d8] sm:$0xff] %v1022_v31  ;;  %v693_v36 = vadd.f32 %v1605_v10, %v692_v32  ;;  %v821_v37 = vadd.f32 %v1605_v10, %v820_v34  ;;  %v694_v38 = vpop.f32.mrb[57].mxu0  ;;  %v822_v39 = vpop.f32.mrb[57].mxu1 }
 0x16a   :  { %v695_v40 = vpop.f32.mrb[58].mxu0  ;;  %v823_v42 = vpop.f32.mrb[58].mxu1 }
 0x16b   :  { %v927_v44 = vadd.f32 %v863_v33, %v693_v36  ;;  %v959_v45 = vadd.f32 %v895_v35, %v821_v37  ;;  %v696_v46 = vadd.f32 %v1605_v10, %v695_v40  ;;  %v824_v47 = vadd.f32 %v1605_v10, %v823_v42  ;;  %v697_v48 = vpop.f32.mrb[59].mxu0  ;;  %v825_v49 = vpop.f32.mrb[59].mxu1 }
 0x16d   :  { %v991_v50 = vmax.f32 %v927_v44, 0.0  ;;  %v1023_v51 = vmax.f32 %v959_v45, 0.0  ;;  %v928_v52 = vadd.f32 %v864_v41, %v696_v46  ;;  %v960_v53 = vadd.f32 %v896_v43, %v824_v47 }
 0x16f   :  { %1055 = vst [vmem:[%s2059_s4 + $0xe0] sm:$0xff] %v991_v50  ;;  %1087 = vst [vmem:[%s2059_s4 + $0x1e0] sm:$0xff] %v1023_v51  ;;  %v992_v54 = vmax.f32 %v928_v52, 0.0  ;;  %v1024_v55 = vmax.f32 %v960_v53, 0.0 }
 0x170   :  { %v700_v56 = vpop.f32.mrb[60].mxu0  ;;  %v828_v58 = vpop.f32.mrb[60].mxu1 }
 0x171   :  { %1056 = vst [vmem:[%s2059_s4 + $0xe8] sm:$0xff] %v992_v54  ;;  %1088 = vst [vmem:[%s2059_s4 + $0x1e8] sm:$0xff] %v1024_v55  ;;  %v701_v60 = vadd.f32 %v1605_v10, %v700_v56  ;;  %v829_v61 = vadd.f32 %v1605_v10, %v828_v58  ;;  %v702_v62 = vpop.f32.mrb[61].mxu0  ;;  %v830_v63 = vpop.f32.mrb[61].mxu1 }
 0x172   :  { %v703_v0 = vpop.f32.mrb[62].mxu0  ;;  %v831_v2 = vpop.f32.mrb[62].mxu1 }
 0x173   :  { %v929_v4 = vadd.f32 %v865_v57, %v701_v60  ;;  %v961_v5 = vadd.f32 %v897_v59, %v829_v61  ;;  %v704_v6 = vadd.f32 %v1605_v10, %v703_v0  ;;  %v832_v7 = vadd.f32 %v1605_v10, %v831_v2  ;;  %v705_v8 = vpop.f32.mrb[63].mxu0  ;;  %v833_v9 = vpop.f32.mrb[63].mxu1 }
 0x175   :  { %v993_v11 = vmax.f32 %v929_v4, 0.0  ;;  %v1025_v12 = vmax.f32 %v961_v5, 0.0  ;;  %v930_v13 = vadd.f32 %v866_v1, %v704_v6  ;;  %v962_v14 = vadd.f32 %v898_v3, %v832_v7 }
 0x177   :  { %1057 = vst [vmem:[%s2059_s4 + $0xf0] sm:$0xff] %v993_v11  ;;  %1089 = vst [vmem:[%s2059_s4 + $0x1f0] sm:$0xff] %v1025_v12  ;;  %v994_v15 = vmax.f32 %v930_v13, 0.0  ;;  %v1026_v16 = vmax.f32 %v962_v14, 0.0 }
 0x179   :  { %1058 = vst [vmem:[%s2059_s4 + $0xf8] sm:$0xff] %v994_v15  ;;  %1090 = vst [vmem:[%s2059_s4 + $0x1f8] sm:$0xff] %v1026_v16 }

// kernel: wresnet_forward.13
= control target key start
LH: loop header
LB: loop body
LE: loop exit
PB: predicated region body
PF: predicated region fallthrough
CT: control target
= control target key end

     0   :  { %v426_v0 = vmov 0   ;;  %vm182_vm0 = vcmask 130048   ;;  %s599_s1 = inlined_call_operand.vmem [shape: bf16[144,128], index: 1, kind: input, shape index: {}]   ;;  %s600_s0 = inlined_call_operand.vmem [shape: bf16[128,144], index: 0, kind: input, shape index: {}]   ;;  %s601_s2 = inlined_call_operand.vmem [shape: f32[1,128], index: 2, kind: input, shape index: {}]   ;;  %s602_s3 = inlined_call_operand.vmem [shape: f32[128,128], index: 3, kind: output, shape index: {}]  }
   0x1   :  { %207 = vmatprep.subr.bf16.mxu0 %v426_v0  ;;  %374 = vmatprep.subr.bf16.mxu1 %v426_v0  ;;  %v393_v1 = vld [vmem:[%s599_s1] sm:$0xff]   ;;  %v394_v2 = vld [vmem:[%s599_s1 + $0x8] sm:$0xff]   ;;  %v395_v3 = vld [vmem:[%s599_s1 + $0x10] sm:$0xff]  }
   0x2   :  { %208 = vmatpush1.bf16.msra.mxu0 %v393_v1  ;;  %383 = vmatpush1.bf16.msra.mxu1 %v393_v1  ;;  %v396_v4 = vld [vmem:[%s599_s1 + $0x18] sm:$0xff]   ;;  %v404_v5 = vld [vmem:[%s600_s0 + $0x4] ss:$8 sps:$4 sm:$0xff]   ;;  %v399_v9 = vld [vmem:[%s599_s1 + $0x30] sm:$0xff]  }
   0x3   :  { %209 = vmatprep.subr.bf16.mxu0 %v426_v0  ;;  %375 = vmatprep.subr.bf16.mxu1 %v426_v0  ;;  %v407_v6 = vld [vmem:[%s600_s0 + $0x44] ss:$8 sps:$4 sm:$0xff]   ;;  %v400_v10 = vld [vmem:[%s599_s1 + $0x38] sm:$0xff]   ;;  %v402_v12 = vld [vmem:[%s600_s0] ss:$8 sps:$4 sm:$0xff]  }
   0x4   :  { %366 = vmatprep.mubr.msk.bf16.mxu0 %vm182_vm0, %v404_v5  ;;  %370 = vmatprep.mubr.msk.bf16.mxu1 %vm182_vm0, %v407_v6  ;;  %v397_v7 = vld [vmem:[%s599_s1 + $0x20] sm:$0xff]   ;;  %v398_v8 = vld [vmem:[%s599_s1 + $0x28] sm:$0xff]   ;;  %v408_v14 = vld [vmem:[%s600_s0 + $0x14] ss:$8 sps:$4 sm:$0xff]  }
   0x5   :  { %v401_v11 = vld [vmem:[%s599_s1 + $0x40] sm:$0xff]   ;;  %v410_v15 = vld [vmem:[%s600_s0 + $0x54] ss:$8 sps:$4 sm:$0xff]   ;;  %v412_v16 = vld [vmem:[%s600_s0 + $0x10] ss:$8 sps:$4 sm:$0xff]  }
   0x6   :  { %210 = vmatpush1.bf16.msra.mxu0 %v394_v2  ;;  %384 = vmatpush1.bf16.msra.mxu1 %v394_v2  ;;  %v405_v13 = vld [vmem:[%s600_s0 + $0x40] ss:$8 sps:$4 sm:$0xff]   ;;  %v413_v17 = vld [vmem:[%s600_s0 + $0x50] ss:$8 sps:$4 sm:$0xff]   ;;  %v414_v18 = vld [vmem:[%s600_s0 + $0x24] ss:$8 sps:$4 sm:$0xff]  }
   0x7   :  { %211 = vmatprep.subr.bf16.mxu0 %v426_v0  ;;  %376 = vmatprep.subr.bf16.mxu1 %v426_v0  ;;  %v416_v19 = vld [vmem:[%s600_s0 + $0x64] ss:$8 sps:$4 sm:$0xff]   ;;  %v418_v20 = vld [vmem:[%s600_s0 + $0x20] ss:$8 sps:$4 sm:$0xff]   ;;  %v420_v22 = vld [vmem:[%s600_s0 + $0x34] ss:$8 sps:$4 sm:$0xff]  }
   0x8   :  { %v419_v21 = vld [vmem:[%s600_s0 + $0x60] ss:$8 sps:$4 sm:$0xff]   ;;  %v422_v23 = vld [vmem:[%s600_s0 + $0x74] ss:$8 sps:$4 sm:$0xff]   ;;  %v424_v24 = vld [vmem:[%s600_s0 + $0x30] ss:$8 sps:$4 sm:$0xff]  }
   0x9   :  { %v425_v25 = vld [vmem:[%s600_s0 + $0x70] ss:$8 sps:$4 sm:$0xff]   ;;  %v533_v26 = vld [vmem:[%s601_s2] ss:$0 sm:$0xff] }
   0xa   :  { %212 = vmatpush1.bf16.msra.mxu0 %v395_v3  ;;  %385 = vmatpush1.bf16.msra.mxu1 %v395_v3 }
   0xb   :  { %213 = vmatprep.subr.bf16.mxu0 %v426_v0  ;;  %377 = vmatprep.subr.bf16.mxu1 %v426_v0 }
   0xe   :  { %214 = vmatpush1.bf16.msra.mxu0 %v396_v4  ;;  %386 = vmatpush1.bf16.msra.mxu1 %v396_v4 }
   0xf   :  { %215 = vmatprep.subr.bf16.mxu0 %v426_v0  ;;  %378 = vmatprep.subr.bf16.mxu1 %v426_v0 }
  0x12   :  { %216 = vmatpush1.bf16.msra.mxu0 %v397_v7  ;;  %387 = vmatpush1.bf16.msra.mxu1 %v397_v7 }
  0x13   :  { %217 = vmatprep.subr.bf16.mxu0 %v426_v0  ;;  %379 = vmatprep.subr.bf16.mxu1 %v426_v0 }
  0x16   :  { %218 = vmatpush1.bf16.msra.mxu0 %v398_v8  ;;  %388 = vmatpush1.bf16.msra.mxu1 %v398_v8 }
  0x17   :  { %219 = vmatprep.subr.bf16.mxu0 %v426_v0  ;;  %380 = vmatprep.subr.bf16.mxu1 %v426_v0 }
  0x1a   :  { %220 = vmatpush1.bf16.msra.mxu0 %v399_v9  ;;  %389 = vmatpush1.bf16.msra.mxu1 %v399_v9 }
  0x1b   :  { %221 = vmatprep.subr.bf16.mxu0 %v426_v0  ;;  %381 = vmatprep.subr.bf16.mxu1 %v426_v0 }
  0x1e   :  { %222 = vmatpush1.bf16.msra.mxu0 %v400_v10  ;;  %390 = vmatpush1.bf16.msra.mxu1 %v400_v10 }
  0x1f   :  { %223 = vmatprep.subr.bf16.mxu0 %v426_v0  ;;  %382 = vmatprep.subr.bf16.mxu1 %v426_v0 }
  0x22   :  { %224 = vmatpush1.bf16.msra.mxu0 %v401_v11  ;;  %391 = vmatpush1.bf16.msra.mxu1 %v401_v11 }
  0x25   :  { %240 = vmatmul.mubr.bf16.vlgmr.msra.gmra.mrb[0].mxu0 %v402_v12  ;;  %272 = vmatmul.mubr.bf16.vlgmr.msra.gmra.mrb[0].mxu1 %v405_v13 }
  0x26   :  { %367 = vmatprep.mubr.msk.bf16.mxu0 %vm182_vm0, %v408_v14  ;;  %371 = vmatprep.mubr.msk.bf16.mxu1 %vm182_vm0, %v410_v15 }
  0x2d   :  { %248 = vmatmul.mubr.bf16.gmra.mrb[4].mxu0 %v412_v16  ;;  %280 = vmatmul.mubr.bf16.gmra.mrb[4].mxu1 %v413_v17 }
  0x2e   :  { %368 = vmatprep.mubr.msk.bf16.mxu0 %vm182_vm0, %v414_v18  ;;  %372 = vmatprep.mubr.msk.bf16.mxu1 %vm182_vm0, %v416_v19 }
  0x35   :  { %256 = vmatmul.mubr.bf16.gmra.mrb[8].mxu0 %v418_v20  ;;  %288 = vmatmul.mubr.bf16.gmra.mrb[8].mxu1 %v419_v21 }
  0x36   :  { %369 = vmatprep.mubr.msk.bf16.mxu0 %vm182_vm0, %v420_v22  ;;  %373 = vmatprep.mubr.msk.bf16.mxu1 %vm182_vm0, %v422_v23 }
  0x3d   :  { %264 = vmatmul.mubr.bf16.gmra.mrb[12].mxu0 %v424_v24  ;;  %296 = vmatmul.mubr.bf16.gmra.mrb[12].mxu1 %v425_v25 }
  0xf8   :  { %v241_v27 = vpop.f32.mrb[0].mxu0  ;;  %v273_v28 = vpop.f32.mrb[0].mxu1 }
  0xf9   :  { %v242_v29 = vadd.f32 %v533_v26, %v241_v27  ;;  %v274_v30 = vadd.f32 %v533_v26, %v273_v28  ;;  %v243_v31 = vpop.f32.mrb[1].mxu0  ;;  %v275_v32 = vpop.f32.mrb[1].mxu1 }
  0xfa   :  { %v244_v33 = vpop.f32.mrb[2].mxu0  ;;  %v276_v34 = vpop.f32.mrb[2].mxu1 }
  0xfb   :  { %v304_v35 = vmax.f32 %v242_v29, 0.0  ;;  %v312_v36 = vmax.f32 %v274_v30, 0.0  ;;  %v245_v37 = vadd.f32 %v533_v26, %v244_v33  ;;  %v277_v38 = vadd.f32 %v533_v26, %v276_v34  ;;  %v246_v39 = vpop.f32.mrb[3].mxu0  ;;  %v278_v40 = vpop.f32.mrb[3].mxu1 }
  0xfd   :  { %320 = vst [vmem:[%s602_s3] sm:$0xff] %v304_v35  ;;  %328 = vst [vmem:[%s602_s3 + $0x40] sm:$0xff] %v312_v36  ;;  %v305_v41 = vmax.f32 %v245_v37, 0.0  ;;  %v313_v42 = vmax.f32 %v277_v38, 0.0 }
  0xff   :  { %321 = vst [vmem:[%s602_s3 + $0x8] sm:$0xff] %v305_v41  ;;  %329 = vst [vmem:[%s602_s3 + $0x48] sm:$0xff] %v313_v42 }
 0x100   :  { %v249_v43 = vpop.f32.mrb[4].mxu0  ;;  %v281_v44 = vpop.f32.mrb[4].mxu1 }
 0x101   :  { %v250_v45 = vadd.f32 %v533_v26, %v249_v43  ;;  %v282_v46 = vadd.f32 %v533_v26, %v281_v44  ;;  %v251_v47 = vpop.f32.mrb[5].mxu0  ;;  %v283_v48 = vpop.f32.mrb[5].mxu1 }
 0x102   :  { %v252_v49 = vpop.f32.mrb[6].mxu0  ;;  %v284_v50 = vpop.f32.mrb[6].mxu1 }
 0x103   :  { %v306_v51 = vmax.f32 %v250_v45, 0.0  ;;  %v314_v52 = vmax.f32 %v282_v46, 0.0  ;;  %v253_v53 = vadd.f32 %v533_v26, %v252_v49  ;;  %v285_v54 = vadd.f32 %v533_v26, %v284_v50  ;;  %v254_v55 = vpop.f32.mrb[7].mxu0  ;;  %v286_v56 = vpop.f32.mrb[7].mxu1 }
 0x105   :  { %322 = vst [vmem:[%s602_s3 + $0x10] sm:$0xff] %v306_v51  ;;  %330 = vst [vmem:[%s602_s3 + $0x50] sm:$0xff] %v314_v52  ;;  %v307_v57 = vmax.f32 %v253_v53, 0.0  ;;  %v315_v58 = vmax.f32 %v285_v54, 0.0 }
 0x107   :  { %323 = vst [vmem:[%s602_s3 + $0x18] sm:$0xff] %v307_v57  ;;  %331 = vst [vmem:[%s602_s3 + $0x58] sm:$0xff] %v315_v58 }
 0x108   :  { %v257_v59 = vpop.f32.mrb[8].mxu0  ;;  %v289_v60 = vpop.f32.mrb[8].mxu1 }
 0x109   :  { %v258_v61 = vadd.f32 %v533_v26, %v257_v59  ;;  %v290_v62 = vadd.f32 %v533_v26, %v289_v60  ;;  %v259_v63 = vpop.f32.mrb[9].mxu0  ;;  %v291_v0 = vpop.f32.mrb[9].mxu1 }
 0x10a   :  { %v260_v1 = vpop.f32.mrb[10].mxu0  ;;  %v292_v2 = vpop.f32.mrb[10].mxu1 }
 0x10b   :  { %v308_v3 = vmax.f32 %v258_v61, 0.0  ;;  %v316_v4 = vmax.f32 %v290_v62, 0.0  ;;  %v261_v5 = vadd.f32 %v533_v26, %v260_v1  ;;  %v293_v6 = vadd.f32 %v533_v26, %v292_v2  ;;  %v262_v7 = vpop.f32.mrb[11].mxu0  ;;  %v294_v8 = vpop.f32.mrb[11].mxu1 }
 0x10d   :  { %324 = vst [vmem:[%s602_s3 + $0x20] sm:$0xff] %v308_v3  ;;  %332 = vst [vmem:[%s602_s3 + $0x60] sm:$0xff] %v316_v4  ;;  %v309_v9 = vmax.f32 %v261_v5, 0.0  ;;  %v317_v10 = vmax.f32 %v293_v6, 0.0 }
 0x10f   :  { %325 = vst [vmem:[%s602_s3 + $0x28] sm:$0xff] %v309_v9  ;;  %333 = vst [vmem:[%s602_s3 + $0x68] sm:$0xff] %v317_v10 }
 0x110   :  { %v265_v11 = vpop.f32.mrb[12].mxu0  ;;  %v297_v12 = vpop.f32.mrb[12].mxu1 }
 0x111   :  { %v266_v13 = vadd.f32 %v533_v26, %v265_v11  ;;  %v298_v14 = vadd.f32 %v533_v26, %v297_v12  ;;  %v267_v15 = vpop.f32.mrb[13].mxu0  ;;  %v299_v16 = vpop.f32.mrb[13].mxu1 }
 0x112   :  { %v268_v17 = vpop.f32.mrb[14].mxu0  ;;  %v300_v18 = vpop.f32.mrb[14].mxu1 }
 0x113   :  { %v310_v19 = vmax.f32 %v266_v13, 0.0  ;;  %v318_v20 = vmax.f32 %v298_v14, 0.0  ;;  %v269_v21 = vadd.f32 %v533_v26, %v268_v17  ;;  %v301_v22 = vadd.f32 %v533_v26, %v300_v18  ;;  %v270_v23 = vpop.f32.mrb[15].mxu0  ;;  %v302_v24 = vpop.f32.mrb[15].mxu1 }
 0x115   :  { %326 = vst [vmem:[%s602_s3 + $0x30] sm:$0xff] %v310_v19  ;;  %334 = vst [vmem:[%s602_s3 + $0x70] sm:$0xff] %v318_v20  ;;  %v311_v25 = vmax.f32 %v269_v21, 0.0  ;;  %v319_v27 = vmax.f32 %v301_v22, 0.0 }
 0x117   :  { %327 = vst [vmem:[%s602_s3 + $0x38] sm:$0xff] %v311_v25  ;;  %335 = vst [vmem:[%s602_s3 + $0x78] sm:$0xff] %v319_v27 }

// kernel: wresnet_forward.14
= control target key start
LH: loop header
LB: loop body
LE: loop exit
PB: predicated region body
PF: predicated region fallthrough
CT: control target
= control target key end

     0   :  { %vm86_vm0 = vcmask 130048   ;;  %s390_s1 = inlined_call_operand.vmem [shape: bf16[16,128], index: 1, kind: input, shape index: {}]   ;;  %s391_s0 = inlined_call_operand.vmem [shape: bf16[128,16], index: 0, kind: input, shape index: {}]   ;;  %s392_s2 = inlined_call_operand.vmem [shape: f32[1,128], index: 2, kind: input, shape index: {}]   ;;  %s393_s3 = inlined_call_operand.vmem [shape: f32[128,128], index: 3, kind: output, shape index: {}]  }
   0x1   :  { %v275_v0 = vld [vmem:[%s390_s1] sm:$0xff]   ;;  %v278_v3 = vld [vmem:[%s391_s0 + $0x8] sm:$0xff]   ;;  %v280_v5 = vld [vmem:[%s391_s0 + $0x10] sm:$0xff]  }
   0x2   :  { %v276_v1 = vld [vmem:[%s391_s0] sm:$0xff]   ;;  %255 = vmatprep.subr.bf16.mxu0 %v275_v0  ;;  %273 = vmatprep.subr.bf16.mxu1 %v275_v0  ;;  %v279_v4 = vld [vmem:[%s391_s0 + $0x28] sm:$0xff]   ;;  %v281_v6 = vld [vmem:[%s391_s0 + $0x30] sm:$0xff]  }
   0x3   :  { %v277_v2 = vld [vmem:[%s391_s0 + $0x20] sm:$0xff]   ;;  %256 = vmatpush3.bf16.msra.mxu0 %v275_v0  ;;  %274 = vmatpush3.bf16.msra.mxu1 %v275_v0  ;;  %v282_v7 = vld [vmem:[%s391_s0 + $0x18] sm:$0xff]  }
   0x4   :  { %257 = vmatprep.mubr.msk.bf16.mxu0 %vm86_vm0, %v276_v1  ;;  %265 = vmatprep.mubr.msk.bf16.mxu1 %vm86_vm0, %v277_v2  ;;  %v283_v8 = vld [vmem:[%s391_s0 + $0x38] sm:$0xff]   ;;  %v228_v9 = vld [vmem:[%s392_s2] ss:$0 sm:$0xff] }
   0x6   :  { %258 = vmatmul.mubr.msk.bf16.vlgmr.msra.gmra.mrb[0].mxu0 %vm86_vm0, %v278_v3  ;;  %266 = vmatmul.mubr.msk.bf16.vlgmr.msra.gmra.mrb[0].mxu1 %vm86_vm0, %v279_v4 }
   0x7   :  { %261 = vmatprep.mubr.msk.bf16.mxu0 %vm86_vm0, %v280_v5  ;;  %269 = vmatprep.mubr.msk.bf16.mxu1 %vm86_vm0, %v281_v6 }
   0xe   :  { %262 = vmatmul.mubr.msk.bf16.gmra.mrb[4].mxu0 %vm86_vm0, %v282_v7  ;;  %270 = vmatmul.mubr.msk.bf16.gmra.mrb[4].mxu1 %vm86_vm0, %v283_v8 }
  0xd9   :  { %v259_v10 = vpop.f32.mrb[0].mxu0  ;;  %v267_v11 = vpop.f32.mrb[0].mxu1 }
  0xda   :  { %v154_v12 = vadd.f32 %v259_v10, %v228_v9  ;;  %v186_v13 = vadd.f32 %v267_v11, %v228_v9  ;;  %v145_v14 = vpop.f32.mrb[1].mxu0  ;;  %v177_v15 = vpop.f32.mrb[1].mxu1 }
  0xdb   :  { %v146_v16 = vadd.f32 %v228_v9, %v145_v14  ;;  %v178_v17 = vadd.f32 %v228_v9, %v177_v15  ;;  %v260_v18 = vpop.f32.mrb[2].mxu0  ;;  %v268_v19 = vpop.f32.mrb[2].mxu1 }
  0xdc   :  { %210 = vst [vmem:[%s393_s3 + $0x10] sm:$0xff] %v154_v12  ;;  %218 = vst [vmem:[%s393_s3 + $0x50] sm:$0xff] %v186_v13  ;;  %v157_v20 = vadd.f32 %v260_v18, %v228_v9  ;;  %v189_v21 = vadd.f32 %v268_v19, %v228_v9  ;;  %v148_v22 = vpop.f32.mrb[3].mxu0  ;;  %v180_v23 = vpop.f32.mrb[3].mxu1 }
  0xdd   :  { %208 = vst [vmem:[%s393_s3] sm:$0xff] %v146_v16  ;;  %216 = vst [vmem:[%s393_s3 + $0x40] sm:$0xff] %v178_v17  ;;  %v149_v24 = vadd.f32 %v228_v9, %v148_v22  ;;  %v181_v25 = vadd.f32 %v228_v9, %v180_v23 }
  0xde   :  { %211 = vst [vmem:[%s393_s3 + $0x18] sm:$0xff] %v157_v20  ;;  %219 = vst [vmem:[%s393_s3 + $0x58] sm:$0xff] %v189_v21 }
  0xdf   :  { %209 = vst [vmem:[%s393_s3 + $0x8] sm:$0xff] %v149_v24  ;;  %217 = vst [vmem:[%s393_s3 + $0x48] sm:$0xff] %v181_v25 }
  0xe1   :  { %v263_v26 = vpop.f32.mrb[4].mxu0  ;;  %v271_v27 = vpop.f32.mrb[4].mxu1 }
  0xe2   :  { %v170_v28 = vadd.f32 %v263_v26, %v228_v9  ;;  %v202_v29 = vadd.f32 %v271_v27, %v228_v9  ;;  %v161_v30 = vpop.f32.mrb[5].mxu0  ;;  %v193_v31 = vpop.f32.mrb[5].mxu1 }
  0xe3   :  { %v162_v32 = vadd.f32 %v228_v9, %v161_v30  ;;  %v194_v33 = vadd.f32 %v228_v9, %v193_v31  ;;  %v264_v34 = vpop.f32.mrb[6].mxu0  ;;  %v272_v35 = vpop.f32.mrb[6].mxu1 }
  0xe4   :  { %214 = vst [vmem:[%s393_s3 + $0x30] sm:$0xff] %v170_v28  ;;  %222 = vst [vmem:[%s393_s3 + $0x70] sm:$0xff] %v202_v29  ;;  %v173_v36 = vadd.f32 %v264_v34, %v228_v9  ;;  %v205_v37 = vadd.f32 %v272_v35, %v228_v9  ;;  %v164_v38 = vpop.f32.mrb[7].mxu0  ;;  %v196_v39 = vpop.f32.mrb[7].mxu1 }
  0xe5   :  { %212 = vst [vmem:[%s393_s3 + $0x20] sm:$0xff] %v162_v32  ;;  %220 = vst [vmem:[%s393_s3 + $0x60] sm:$0xff] %v194_v33  ;;  %v165_v40 = vadd.f32 %v228_v9, %v164_v38  ;;  %v197_v41 = vadd.f32 %v228_v9, %v196_v39 }
  0xe6   :  { %215 = vst [vmem:[%s393_s3 + $0x38] sm:$0xff] %v173_v36  ;;  %223 = vst [vmem:[%s393_s3 + $0x78] sm:$0xff] %v205_v37 }
  0xe7   :  { %213 = vst [vmem:[%s393_s3 + $0x28] sm:$0xff] %v165_v40  ;;  %221 = vst [vmem:[%s393_s3 + $0x68] sm:$0xff] %v197_v41 }

// kernel: wresnet_forward.15
= control target key start
LH: loop header
LB: loop body
LE: loop exit
PB: predicated region body
PF: predicated region fallthrough
CT: control target
= control target key end

     0   :  { %vm321_vm0 = vcmask 261120   ;;  %s1107_s1 = inlined_call_operand.vmem [shape: bf16[288,128], index: 1, kind: input, shape index: {}]   ;;  %s1108_s0 = inlined_call_operand.vmem [shape: bf16[128,288], index: 0, kind: input, shape index: {}]   ;;  %s1109_s2 = inlined_call_operand.vmem [shape: f32[1,128], index: 2, kind: input, shape index: {}]   ;;  %s1110_s3 = inlined_call_operand.vmem [shape: f32[128,128], index: 3, kind: input, shape index: {}]   ;;  %s1111_s4 = inlined_call_operand.vmem [shape: f32[128,128], index: 4, kind: output, shape index: {}]  }
   0x1   :  { %v769_v0 = vld [vmem:[%s1107_s1 + $0x40] sm:$0xff]   ;;  %v771_v2 = vld [vmem:[%s1107_s1 + $0x48] sm:$0xff]   ;;  %v773_v4 = vld [vmem:[%s1107_s1 + $0x50] sm:$0xff]  }
   0x2   :  { %v770_v1 = vld [vmem:[%s1107_s1] sm:$0xff]   ;;  %659 = vmatprep.subr.bf16.mxu0 %v769_v0  ;;  %753 = vmatprep.subr.bf16.mxu1 %v769_v0  ;;  %v772_v3 = vld [vmem:[%s1107_s1 + $0x8] sm:$0xff]   ;;  %v774_v5 = vld [vmem:[%s1107_s1 + $0x10] sm:$0xff]  }
   0x3   :  { %660 = vmatpush3.bf16.msra.mxu0 %v770_v1  ;;  %761 = vmatpush3.bf16.msra.mxu1 %v770_v1  ;;  %v775_v6 = vld [vmem:[%s1107_s1 + $0x58] sm:$0xff]   ;;  %v777_v8 = vld [vmem:[%s1107_s1 + $0x60] sm:$0xff]   ;;  %v779_v10 = vld [vmem:[%s1107_s1 + $0x68] sm:$0xff]  }
   0x4   :  { %661 = vmatprep.subr.bf16.mxu0 %v771_v2  ;;  %754 = vmatprep.subr.bf16.mxu1 %v771_v2  ;;  %v776_v7 = vld [vmem:[%s1107_s1 + $0x18] sm:$0xff]   ;;  %v778_v9 = vld [vmem:[%s1107_s1 + $0x20] sm:$0xff]   ;;  %v780_v13 = vld [vmem:[%s1107_s1 + $0x28] sm:$0xff]  }
   0x5   :  { %v787_v11 = vld [vmem:[%s1108_s0 + $0x4] ss:$12 sps:$4 sm:$0xff]   ;;  %v790_v12 = vld [vmem:[%s1108_s0 + $0x94] ss:$12 sps:$4 sm:$0xff]   ;;  %v783_v16 = vld [vmem:[%s1107_s1 + $0x78] sm:$0xff]  }
   0x6   :  { %v781_v14 = vld [vmem:[%s1107_s1 + $0x70] sm:$0xff]   ;;  %378 = vmatprep.mubr.bf16.mxu0 %v787_v11  ;;  %426 = vmatprep.mubr.bf16.mxu1 %v790_v12  ;;  %v784_v17 = vld [vmem:[%s1107_s1 + $0x38] sm:$0xff]   ;;  %v785_v18 = vld [vmem:[%s1108_s0] ss:$12 sps:$4 sm:$0xff]  }
   0x7   :  { %662 = vmatpush3.bf16.msra.mxu0 %v772_v3  ;;  %762 = vmatpush3.bf16.msra.mxu1 %v772_v3  ;;  %v782_v15 = vld [vmem:[%s1107_s1 + $0x30] sm:$0xff]   ;;  %v791_v19 = vld [vmem:[%s1107_s1 + $0x80] sm:$0xff]   ;;  %v792_v21 = vld [vmem:[%s1108_s0 + $0x1c] ss:$12 sps:$4 sm:$0xff]  }
   0x8   :  { %663 = vmatprep.subr.bf16.mxu0 %v773_v4  ;;  %755 = vmatprep.subr.bf16.mxu1 %v773_v4  ;;  %v788_v20 = vld [vmem:[%s1108_s0 + $0x90] ss:$12 sps:$4 sm:$0xff]   ;;  %v794_v22 = vld [vmem:[%s1108_s0 + $0xac] ss:$12 sps:$4 sm:$0xff]   ;;  %v797_v25 = vld [vmem:[%s1108_s0 + $0xa8] ss:$12 sps:$4 sm:$0xff]  }
   0x9   :  { %v798_v23 = vld [vmem:[%s1107_s1 + $0x88] sm:$0xff]   ;;  %v796_v24 = vld [vmem:[%s1108_s0 + $0x18] ss:$12 sps:$4 sm:$0xff]   ;;  %v799_v26 = vld [vmem:[%s1108_s0 + $0x34] ss:$12 sps:$4 sm:$0xff]  }
   0xa   :  { %v801_v27 = vld [vmem:[%s1108_s0 + $0x8] ss:$12 sps:$4 sm:$0xff]   ;;  %v802_v28 = vld [vmem:[%s1108_s0 + $0x30] ss:$12 sps:$4 sm:$0xff]   ;;  %v803_v29 = vld [vmem:[%s1108_s0 + $0x20] ss:$12 sps:$4 sm:$0xff]  }
   0xb   :  { %664 = vmatpush3.bf16.msra.mxu0 %v774_v5  ;;  %763 = vmatpush3.bf16.msra.mxu1 %v774_v5  ;;  %v804_v30 = vld [vmem:[%s1108_s0 + $0x4c] ss:$12 sps:$4 sm:$0xff]   ;;  %v807_v32 = vld [vmem:[%s1108_s0 + $0x48] ss:$12 sps:$4 sm:$0xff]   ;;  %v808_v33 = vld [vmem:[%s1108_s0 + $0x50] ss:$12 sps:$4 sm:$0xff]  }
   0xc   :  { %665 = vmatprep.subr.bf16.mxu0 %v775_v6  ;;  %756 = vmatprep.subr.bf16.mxu1 %v775_v6  ;;  %v806_v31 = vld [vmem:[%s1108_s0 + $0x38] ss:$12 sps:$4 sm:$0xff]   ;;  %v811_v35 = vld [vmem:[%s1108_s0 + $0x68] ss:$12 sps:$4 sm:$0xff]   ;;  %v812_v36 = vld [vmem:[%s1108_s0 + $0x60] ss:$12 sps:$4 sm:$0xff]  }
   0xd   :  { %v809_v34 = vld [vmem:[%s1108_s0 + $0x64] ss:$12 sps:$4 sm:$0xff]   ;;  %v813_v37 = vld [vmem:[%s1108_s0 + $0x80] ss:$12 sps:$4 sm:$0xff]   ;;  %v814_v38 = vld [vmem:[%s1108_s0 + $0x7c] ss:$12 sps:$4 sm:$0xff]  }
   0xe   :  { %v816_v39 = vld [vmem:[%s1108_s0 + $0x98] ss:$12 sps:$4 sm:$0xff]   ;;  %v818_v41 = vld [vmem:[%s1108_s0 + $0xb0] ss:$12 sps:$4 sm:$0xff]   ;;  %v989_v2 = vld [vmem:[%s1109_s2] ss:$0 sm:$0xff] }
   0xf   :  { %666 = vmatpush3.bf16.msra.mxu0 %v776_v7  ;;  %764 = vmatpush3.bf16.msra.mxu1 %v776_v7  ;;  %v817_v40 = vld [vmem:[%s1108_s0 + $0x78] ss:$12 sps:$4 sm:$0xff]   ;;  %v542_v6 = vld [vmem:[%s1110_s3 + $0x10] sm:$0xff] }
  0x10   :  { %667 = vmatprep.subr.bf16.mxu0 %v777_v8  ;;  %757 = vmatprep.subr.bf16.mxu1 %v777_v8  ;;  %v540_v11 = vld [vmem:[%s1110_s3] sm:$0xff] }
  0x13   :  { %668 = vmatpush3.bf16.msra.mxu0 %v778_v9  ;;  %765 = vmatpush3.bf16.msra.mxu1 %v778_v9 }
  0x14   :  { %669 = vmatprep.subr.bf16.mxu0 %v779_v10  ;;  %758 = vmatprep.subr.bf16.mxu1 %v779_v10 }
  0x17   :  { %670 = vmatpush3.bf16.msra.mxu0 %v780_v13  ;;  %766 = vmatpush3.bf16.msra.mxu1 %v780_v13 }
  0x18   :  { %671 = vmatprep.subr.bf16.mxu0 %v781_v14  ;;  %759 = vmatprep.subr.bf16.mxu1 %v781_v14 }
  0x1b   :  { %672 = vmatpush3.bf16.msra.mxu0 %v782_v15  ;;  %767 = vmatpush3.bf16.msra.mxu1 %v782_v15 }
  0x1c   :  { %673 = vmatprep.subr.bf16.mxu0 %v783_v16  ;;  %760 = vmatprep.subr.bf16.mxu1 %v783_v16 }
  0x1f   :  { %674 = vmatpush3.bf16.msra.mxu0 %v784_v17  ;;  %768 = vmatpush3.bf16.msra.mxu1 %v784_v17  ;;  %v543_v17 = vld [vmem:[%s1110_s3 + $0x18] sm:$0xff] }
  0x20   :  { %733 = vmatprep.subr.bf16.mxu1 %v791_v19 }
  0x22   :  { %379 = vmatmul.mubr.bf16.vlgmr.msra.gmra.mrb[0].mxu0 %v785_v18  ;;  %427 = vmatmul.mubr.bf16.vlgmr.msra.gmra.mrb[0].mxu1 %v788_v20 }
  0x23   :  { %734 = vmatpush3.bf16.msra.mxu1 %v791_v19  ;;  %386 = vmatprep.mubr.bf16.mxu0 %v792_v21 }
  0x24   :  { %434 = vmatprep.mubr.bf16.mxu1 %v794_v22  ;;  %735 = vmatprep.subr.bf16.mxu1 %v798_v23 }
  0x27   :  { %736 = vmatpush3.bf16.msra.mxu1 %v798_v23  ;;  %v541_v23 = vld [vmem:[%s1110_s3 + $0x8] sm:$0xff] }
  0x2a   :  { %387 = vmatmul.mubr.bf16.gmra.mrb[4].mxu0 %v796_v24  ;;  %435 = vmatmul.mubr.bf16.gmra.mrb[4].mxu1 %v797_v25 }
  0x2b   :  { %394 = vmatprep.mubr.bf16.mxu0 %v799_v26  ;;  %737 = vmatprep.mubr.msk.bf16.mxu1 %vm321_vm0, %v801_v27 }
  0x32   :  { %395 = vmatmul.mubr.bf16.gmra.mrb[8].mxu0 %v802_v28  ;;  %738 = vmatmul.mubr.msk.bf16.vlgmr.msra.gmra.mrb[8].mxu1 %vm321_vm0, %v803_v29 }
  0x33   :  { %402 = vmatprep.mubr.bf16.mxu0 %v804_v30  ;;  %741 = vmatprep.mubr.msk.bf16.mxu1 %vm321_vm0, %v806_v31 }
  0x3a   :  { %403 = vmatmul.mubr.bf16.gmra.mrb[12].mxu0 %v807_v32  ;;  %742 = vmatmul.mubr.msk.bf16.gmra.mrb[12].mxu1 %vm321_vm0, %v808_v33 }
  0x3b   :  { %410 = vmatprep.mubr.bf16.mxu0 %v809_v34  ;;  %745 = vmatprep.mubr.msk.bf16.mxu1 %vm321_vm0, %v811_v35 }
  0x42   :  { %411 = vmatmul.mubr.bf16.gmra.mrb[16].mxu0 %v812_v36  ;;  %746 = vmatmul.mubr.msk.bf16.gmra.mrb[16].mxu1 %vm321_vm0, %v813_v37 }
  0x43   :  { %418 = vmatprep.mubr.bf16.mxu0 %v814_v38  ;;  %749 = vmatprep.mubr.msk.bf16.mxu1 %vm321_vm0, %v816_v39  ;;  %v544_v38 = vld [vmem:[%s1110_s3 + $0x20] sm:$0xff] }
  0x4a   :  { %419 = vmatmul.mubr.bf16.gmra.mrb[20].mxu0 %v817_v40  ;;  %750 = vmatmul.mubr.msk.bf16.gmra.mrb[20].mxu1 %vm321_vm0, %v818_v41 }
  0xf5   :  { %v675_v42 = vpop.f32.mrb[0].mxu0  ;;  %v711_v43 = vpop.f32.mrb[0].mxu1 }
  0xf6   :  { %v676_v44 = vpop.f32.mrb[1].mxu0  ;;  %v712_v45 = vpop.f32.mrb[1].mxu1 }
  0xf7   :  { %v677_v46 = vadd.f32 %v676_v44, %v675_v42  ;;  %v678_v47 = vpop.f32.mrb[2].mxu0  ;;  %v978_v48 = vadd.f32 %v712_v45, %v711_v43  ;;  %v714_v49 = vpop.f32.mrb[2].mxu1 }
  0xf8   :  { %v679_v50 = vpop.f32.mrb[3].mxu0  ;;  %v715_v51 = vpop.f32.mrb[3].mxu1 }
  0xf9   :  { %v680_v52 = vadd.f32 %v679_v50, %v678_v47  ;;  %v980_v53 = vadd.f32 %v715_v51, %v714_v49  ;;  %v381_v7 = vadd.f32 %v677_v46, %v989_v2  ;;  %v545_v46 = vld [vmem:[%s1110_s3 + $0x28] sm:$0xff] }
  0xfb   :  { %v384_v18 = vadd.f32 %v680_v52, %v989_v2  ;;  %v546_v52 = vld [vmem:[%s1110_s3 + $0x30] sm:$0xff] }
  0xfd   :  { %v681_v54 = vpop.f32.mrb[4].mxu0  ;;  %v717_v55 = vpop.f32.mrb[4].mxu1 }
  0xfe   :  { %v682_v56 = vpop.f32.mrb[5].mxu0  ;;  %v718_v57 = vpop.f32.mrb[5].mxu1 }
  0xff   :  { %v683_v58 = vadd.f32 %v682_v56, %v681_v54  ;;  %v684_v59 = vpop.f32.mrb[6].mxu0  ;;  %v982_v60 = vadd.f32 %v718_v57, %v717_v55  ;;  %v720_v61 = vpop.f32.mrb[6].mxu1 }
 0x100   :  { %v685_v62 = vpop.f32.mrb[7].mxu0  ;;  %v721_v63 = vpop.f32.mrb[7].mxu1 }
 0x101   :  { %v686_v0 = vadd.f32 %v685_v62, %v684_v59  ;;  %v984_v1 = vadd.f32 %v721_v63, %v720_v61  ;;  %v389_v3 = vadd.f32 %v683_v58, %v989_v2  ;;  %v547_v58 = vld [vmem:[%s1110_s3 + $0x38] sm:$0xff] }
 0x103   :  { %v392_v12 = vadd.f32 %v686_v0, %v989_v2 }
 0x105   :  { %v687_v4 = vpop.f32.mrb[8].mxu0  ;;  %v739_v5 = vpop.f32.mrb[8].mxu1 }
 0x106   :  { %v486_v8 = vadd.f32 %v739_v5, %v389_v3  ;;  %v688_v9 = vpop.f32.mrb[9].mxu0  ;;  %v477_v10 = vpop.f32.mrb[9].mxu1 }
 0x107   :  { %v689_v13 = vadd.f32 %v688_v9, %v687_v4  ;;  %v478_v14 = vadd.f32 %v477_v10, %v381_v7  ;;  %v690_v15 = vpop.f32.mrb[10].mxu0  ;;  %v740_v16 = vpop.f32.mrb[10].mxu1 }
 0x108   :  { %v558_v19 = vadd.f32 %v542_v6, %v486_v8  ;;  %v489_v20 = vadd.f32 %v740_v16, %v392_v12  ;;  %v691_v21 = vpop.f32.mrb[11].mxu0  ;;  %v480_v22 = vpop.f32.mrb[11].mxu1 }
 0x109   :  { %v556_v24 = vadd.f32 %v540_v11, %v478_v14  ;;  %v692_v25 = vadd.f32 %v691_v21, %v690_v15  ;;  %v481_v26 = vadd.f32 %v480_v22, %v384_v18  ;;  %v397_v35 = vadd.f32 %v689_v13, %v989_v2  ;;  %v548_v15 = vld [vmem:[%s1110_s3 + $0x40] sm:$0xff]  ;;  %v549_v18 = vld [vmem:[%s1110_s3 + $0x48] sm:$0xff] }
 0x10a   :  { %v574_v27 = vmax.f32 %v558_v19, 0.0  ;;  %v559_v28 = vadd.f32 %v543_v17, %v489_v20  ;;  %v437_v19 = vadd.f32 %v982_v60, %v989_v2  ;;  %v440_v60 = vadd.f32 %v984_v1, %v989_v2 }
 0x10b   :  { %v572_v29 = vmax.f32 %v556_v24, 0.0  ;;  %v557_v30 = vadd.f32 %v541_v23, %v481_v26  ;;  %v400_v43 = vadd.f32 %v692_v25, %v989_v2  ;;  %v554_v24 = vld [vmem:[%s1110_s3 + $0x70] sm:$0xff]  ;;  %v429_v25 = vadd.f32 %v978_v48, %v989_v2  ;;  %v555_v48 = vld [vmem:[%s1110_s3 + $0x78] sm:$0xff] }
 0x10c   :  { %590 = vst [vmem:[%s1111_s4 + $0x10] sm:$0xff] %v574_v27  ;;  %v575_v31 = vmax.f32 %v559_v28, 0.0 }
 0x10d   :  { %588 = vst [vmem:[%s1111_s4] sm:$0xff] %v572_v29  ;;  %v573_v32 = vmax.f32 %v557_v30, 0.0  ;;  %v693_v33 = vpop.f32.mrb[12].mxu0  ;;  %v743_v34 = vpop.f32.mrb[12].mxu1  ;;  %v552_v29 = vld [vmem:[%s1110_s3 + $0x60] sm:$0xff] }
 0x10e   :  { %591 = vst [vmem:[%s1111_s4 + $0x18] sm:$0xff] %v575_v31  ;;  %v694_v36 = vpop.f32.mrb[13].mxu0  ;;  %v493_v37 = vpop.f32.mrb[13].mxu1 }
 0x10f   :  { %589 = vst [vmem:[%s1111_s4 + $0x8] sm:$0xff] %v573_v32  ;;  %v695_v39 = vadd.f32 %v694_v36, %v693_v33  ;;  %v494_v40 = vadd.f32 %v493_v37, %v397_v35  ;;  %v696_v41 = vpop.f32.mrb[14].mxu0  ;;  %v744_v42 = vpop.f32.mrb[14].mxu1 }
 0x110   :  { %v697_v44 = vpop.f32.mrb[15].mxu0  ;;  %v496_v45 = vpop.f32.mrb[15].mxu1 }
 0x111   :  { %v405_v47 = vadd.f32 %v695_v39, %v989_v2  ;;  %v560_v49 = vadd.f32 %v544_v38, %v494_v40  ;;  %v698_v50 = vadd.f32 %v697_v44, %v696_v41  ;;  %v497_v51 = vadd.f32 %v496_v45, %v400_v43  ;;  %v553_v44 = vld [vmem:[%s1110_s3 + $0x68] sm:$0xff] }
 0x112   :  { %v432_v39 = vadd.f32 %v980_v53, %v989_v2 }
 0x113   :  { %v502_v54 = vadd.f32 %v743_v34, %v405_v47  ;;  %v576_v55 = vmax.f32 %v560_v49, 0.0  ;;  %v408_v56 = vadd.f32 %v698_v50, %v989_v2  ;;  %v561_v57 = vadd.f32 %v545_v46, %v497_v51  ;;  %v550_v46 = vld [vmem:[%s1110_s3 + $0x50] sm:$0xff] }
 0x115   :  { %v562_v59 = vadd.f32 %v546_v52, %v502_v54  ;;  %592 = vst [vmem:[%s1111_s4 + $0x20] sm:$0xff] %v576_v55  ;;  %v505_v61 = vadd.f32 %v744_v42, %v408_v56  ;;  %v577_v62 = vmax.f32 %v561_v57, 0.0  ;;  %v699_v63 = vpop.f32.mrb[16].mxu0  ;;  %v747_v0 = vpop.f32.mrb[16].mxu1  ;;  %v551_v54 = vld [vmem:[%s1110_s3 + $0x58] sm:$0xff] }
 0x116   :  { %v700_v3 = vpop.f32.mrb[17].mxu0  ;;  %v509_v4 = vpop.f32.mrb[17].mxu1 }
 0x117   :  { %v578_v5 = vmax.f32 %v562_v59, 0.0  ;;  %v563_v6 = vadd.f32 %v547_v58, %v505_v61  ;;  %593 = vst [vmem:[%s1111_s4 + $0x28] sm:$0xff] %v577_v62  ;;  %v701_v7 = vadd.f32 %v700_v3, %v699_v63  ;;  %v702_v8 = vpop.f32.mrb[18].mxu0  ;;  %v748_v9 = vpop.f32.mrb[18].mxu1 }
 0x118   :  { %v703_v10 = vpop.f32.mrb[19].mxu0  ;;  %v512_v11 = vpop.f32.mrb[19].mxu1 }
 0x119   :  { %594 = vst [vmem:[%s1111_s4 + $0x30] sm:$0xff] %v578_v5  ;;  %v579_v12 = vmax.f32 %v563_v6, 0.0  ;;  %v413_v13 = vadd.f32 %v701_v7, %v989_v2  ;;  %v704_v14 = vadd.f32 %v703_v10, %v702_v8 }
 0x11b   :  { %595 = vst [vmem:[%s1111_s4 + $0x38] sm:$0xff] %v579_v12  ;;  %v510_v16 = vadd.f32 %v509_v4, %v413_v13  ;;  %v416_v17 = vadd.f32 %v704_v14, %v989_v2 }
 0x11d   :  { %v564_v20 = vadd.f32 %v548_v15, %v510_v16  ;;  %v513_v21 = vadd.f32 %v512_v11, %v416_v17  ;;  %v705_v22 = vpop.f32.mrb[20].mxu0  ;;  %v751_v23 = vpop.f32.mrb[20].mxu1 }
 0x11e   :  { %v534_v26 = vadd.f32 %v751_v23, %v437_v19  ;;  %v706_v27 = vpop.f32.mrb[21].mxu0  ;;  %v525_v28 = vpop.f32.mrb[21].mxu1 }
 0x11f   :  { %v580_v30 = vmax.f32 %v564_v20, 0.0  ;;  %v565_v31 = vadd.f32 %v549_v18, %v513_v21  ;;  %v707_v32 = vadd.f32 %v706_v27, %v705_v22  ;;  %v526_v33 = vadd.f32 %v525_v28, %v429_v25  ;;  %v708_v34 = vpop.f32.mrb[22].mxu0  ;;  %v752_v35 = vpop.f32.mrb[22].mxu1 }
 0x120   :  { %v570_v36 = vadd.f32 %v554_v24, %v534_v26  ;;  %v537_v37 = vadd.f32 %v752_v35, %v440_v60  ;;  %v709_v38 = vpop.f32.mrb[23].mxu0  ;;  %v528_v40 = vpop.f32.mrb[23].mxu1 }
 0x121   :  { %596 = vst [vmem:[%s1111_s4 + $0x40] sm:$0xff] %v580_v30  ;;  %v581_v1 = vmax.f32 %v565_v31, 0.0  ;;  %v421_v41 = vadd.f32 %v707_v32, %v989_v2  ;;  %v568_v42 = vadd.f32 %v552_v29, %v526_v33  ;;  %v710_v43 = vadd.f32 %v709_v38, %v708_v34 }
 0x122   :  { %v586_v45 = vmax.f32 %v570_v36, 0.0  ;;  %v571_v53 = vadd.f32 %v555_v48, %v537_v37  ;;  %v529_v47 = vadd.f32 %v528_v40, %v432_v39 }
 0x123   :  { %597 = vst [vmem:[%s1111_s4 + $0x48] sm:$0xff] %v581_v1  ;;  %v518_v49 = vadd.f32 %v747_v0, %v421_v41  ;;  %v584_v50 = vmax.f32 %v568_v42, 0.0  ;;  %v424_v51 = vadd.f32 %v710_v43, %v989_v2 }
 0x124   :  { %602 = vst [vmem:[%s1111_s4 + $0x70] sm:$0xff] %v586_v45  ;;  %v587_v52 = vmax.f32 %v571_v53, 0.0  ;;  %v569_v55 = vadd.f32 %v553_v44, %v529_v47 }
 0x125   :  { %v566_v56 = vadd.f32 %v550_v46, %v518_v49  ;;  %600 = vst [vmem:[%s1111_s4 + $0x60] sm:$0xff] %v584_v50  ;;  %v521_v57 = vadd.f32 %v748_v9, %v424_v51 }
 0x126   :  { %603 = vst [vmem:[%s1111_s4 + $0x78] sm:$0xff] %v587_v52  ;;  %v585_v2 = vmax.f32 %v569_v55, 0.0 }
 0x127   :  { %v582_v58 = vmax.f32 %v566_v56, 0.0  ;;  %v567_v59 = vadd.f32 %v551_v54, %v521_v57 }
 0x128   :  { %601 = vst [vmem:[%s1111_s4 + $0x68] sm:$0xff] %v585_v2 }
 0x129   :  { %598 = vst [vmem:[%s1111_s4 + $0x50] sm:$0xff] %v582_v58  ;;  %v583_v61 = vmax.f32 %v567_v59, 0.0 }
 0x12b   :  { %599 = vst [vmem:[%s1111_s4 + $0x58] sm:$0xff] %v583_v61 }

// kernel: wresnet_forward.16
= control target key start
LH: loop header
LB: loop body
LE: loop exit
PB: predicated region body
PF: predicated region fallthrough
CT: control target
= control target key end

     0   :  { %vm204_vm0 = vcmask 261120   ;;  %s521_s1 = inlined_call_operand.vmem [shape: bf16[288,128], index: 1, kind: input, shape index: {}]   ;;  %s522_s0 = inlined_call_operand.vmem [shape: bf16[32,288], index: 0, kind: input, shape index: {}]   ;;  %s523_s2 = inlined_call_operand.vmem [shape: f32[1,128], index: 2, kind: input, shape index: {}]   ;;  %s524_s3 = inlined_call_operand.vmem [shape: f32[32,128], index: 3, kind: output, shape index: {}]  }
   0x1   :  { %v388_v0 = vld [vmem:[%s521_s1 + $0x40] sm:$0xff]   ;;  %v390_v2 = vld [vmem:[%s521_s1 + $0x48] sm:$0xff]   ;;  %v392_v4 = vld [vmem:[%s521_s1 + $0x50] sm:$0xff]  }
   0x2   :  { %v389_v1 = vld [vmem:[%s521_s1] sm:$0xff]   ;;  %348 = vmatprep.subr.bf16.mxu0 %v388_v0  ;;  %v391_v3 = vld [vmem:[%s521_s1 + $0x8] sm:$0xff]   ;;  %v393_v5 = vld [vmem:[%s521_s1 + $0x10] sm:$0xff]  }
   0x3   :  { %349 = vmatpush3.bf16.msra.mxu0 %v389_v1  ;;  %v394_v6 = vld [vmem:[%s521_s1 + $0x58] sm:$0xff]   ;;  %v396_v8 = vld [vmem:[%s521_s1 + $0x60] sm:$0xff]   ;;  %v398_v11 = vld [vmem:[%s521_s1 + $0x68] sm:$0xff]  }
   0x4   :  { %350 = vmatprep.subr.bf16.mxu0 %v390_v2  ;;  %v395_v7 = vld [vmem:[%s521_s1 + $0x18] sm:$0xff]   ;;  %v397_v9 = vld [vmem:[%s521_s1 + $0x20] sm:$0xff]   ;;  %v399_v12 = vld [vmem:[%s521_s1 + $0x28] sm:$0xff]  }
   0x5   :  { %v403_v10 = vld [vmem:[%s521_s1 + $0x80] sm:$0xff]   ;;  %v400_v13 = vld [vmem:[%s521_s1 + $0x70] sm:$0xff]   ;;  %v408_v15 = vld [vmem:[%s521_s1 + $0x88] sm:$0xff]  }
   0x6   :  { %380 = vmatprep.subr.bf16.mxu1 %v403_v10  ;;  %v407_v14 = vld [vmem:[%s522_s0 + $0x4] ss:$12 sps:$4 sm:$0xff]   ;;  %v409_v16 = vld [vmem:[%s522_s0 + $0x8] ss:$12 sps:$4 sm:$0xff]   ;;  %v410_v17 = vld [vmem:[%s522_s0 + $0x20] ss:$12 sps:$4 sm:$0xff]  }
   0x7   :  { %351 = vmatpush3.bf16.msra.mxu0 %v391_v3  ;;  %381 = vmatpush3.bf16.msra.mxu1 %v403_v10  ;;  %v401_v18 = vld [vmem:[%s521_s1 + $0x30] sm:$0xff]   ;;  %v402_v19 = vld [vmem:[%s521_s1 + $0x78] sm:$0xff]   ;;  %v405_v21 = vld [vmem:[%s522_s0] ss:$12 sps:$4 sm:$0xff]  }
   0x8   :  { %352 = vmatprep.subr.bf16.mxu0 %v392_v4  ;;  %243 = vmatprep.mubr.bf16.mxu0 %v407_v14  ;;  %v404_v20 = vld [vmem:[%s521_s1 + $0x38] sm:$0xff]   ;;  %v321_v30 = vld [vmem:[%s523_s2] ss:$0 sm:$0xff] }
   0x9   :  { %382 = vmatprep.subr.bf16.mxu1 %v408_v15  ;;  %384 = vmatprep.mubr.msk.bf16.mxu1 %vm204_vm0, %v409_v16  ;;  %v411_v22 = vld [vmem:[%s522_s0 + $0x1c] ss:$12 sps:$4 sm:$0xff]   ;;  %v413_v23 = vld [vmem:[%s522_s0 + $0x18] ss:$12 sps:$4 sm:$0xff]  }
   0xb   :  { %353 = vmatpush3.bf16.msra.mxu0 %v393_v5  ;;  %383 = vmatpush3.bf16.msra.mxu1 %v408_v15 }
   0xc   :  { %354 = vmatprep.subr.bf16.mxu0 %v394_v6 }
   0xe   :  { %385 = vmatmul.mubr.msk.bf16.vlgmr.msra.gmra.mrb[0].mxu1 %vm204_vm0, %v410_v17 }
   0xf   :  { %355 = vmatpush3.bf16.msra.mxu0 %v395_v7 }
  0x10   :  { %356 = vmatprep.subr.bf16.mxu0 %v396_v8 }
  0x13   :  { %357 = vmatpush3.bf16.msra.mxu0 %v397_v9 }
  0x14   :  { %358 = vmatprep.subr.bf16.mxu0 %v398_v11 }
  0x17   :  { %359 = vmatpush3.bf16.msra.mxu0 %v399_v12 }
  0x18   :  { %360 = vmatprep.subr.bf16.mxu0 %v400_v13 }
  0x1b   :  { %361 = vmatpush3.bf16.msra.mxu0 %v401_v18 }
  0x1c   :  { %362 = vmatprep.subr.bf16.mxu0 %v402_v19 }
  0x1f   :  { %363 = vmatpush3.bf16.msra.mxu0 %v404_v20 }
  0x22   :  { %244 = vmatmul.mubr.bf16.vlgmr.msra.gmra.mrb[0].mxu0 %v405_v21 }
  0x23   :  { %251 = vmatprep.mubr.bf16.mxu0 %v411_v22 }
  0x2a   :  { %252 = vmatmul.mubr.bf16.gmra.mrb[4].mxu0 %v413_v23 }
  0xe1   :  { %v386_v24 = vpop.f32.mrb[0].mxu1 }
  0xe2   :  { %v294_v25 = vpop.f32.mrb[1].mxu1 }
  0xe3   :  { %v387_v26 = vpop.f32.mrb[2].mxu1 }
  0xe4   :  { %v297_v27 = vpop.f32.mrb[3].mxu1 }
  0xf5   :  { %v364_v28 = vpop.f32.mrb[0].mxu0 }
  0xf6   :  { %v365_v29 = vpop.f32.mrb[1].mxu0 }
  0xf7   :  { %v366_v31 = vadd.f32 %v365_v29, %v364_v28  ;;  %v367_v32 = vpop.f32.mrb[2].mxu0 }
  0xf8   :  { %v368_v33 = vpop.f32.mrb[3].mxu0 }
  0xf9   :  { %v369_v34 = vadd.f32 %v368_v33, %v367_v32  ;;  %v246_v35 = vadd.f32 %v366_v31, %v321_v30 }
  0xfb   :  { %v295_v36 = vadd.f32 %v294_v25, %v246_v35  ;;  %v249_v37 = vadd.f32 %v369_v34, %v321_v30 }
  0xfd   :  { %v309_v38 = vmax.f32 %v295_v36, 0.0  ;;  %v298_v39 = vadd.f32 %v297_v27, %v249_v37  ;;  %v370_v40 = vpop.f32.mrb[4].mxu0 }
  0xfe   :  { %v371_v41 = vpop.f32.mrb[5].mxu0 }
  0xff   :  { %313 = vst [vmem:[%s524_s3] sm:$0xff] %v309_v38  ;;  %v310_v42 = vmax.f32 %v298_v39, 0.0  ;;  %v372_v43 = vadd.f32 %v371_v41, %v370_v40  ;;  %v373_v44 = vpop.f32.mrb[6].mxu0 }
 0x100   :  { %v374_v45 = vpop.f32.mrb[7].mxu0 }
 0x101   :  { %314 = vst [vmem:[%s524_s3 + $0x8] sm:$0xff] %v310_v42  ;;  %v254_v46 = vadd.f32 %v372_v43, %v321_v30  ;;  %v375_v47 = vadd.f32 %v374_v45, %v373_v44 }
 0x103   :  { %v303_v48 = vadd.f32 %v386_v24, %v254_v46  ;;  %v257_v49 = vadd.f32 %v375_v47, %v321_v30 }
 0x105   :  { %v311_v50 = vmax.f32 %v303_v48, 0.0  ;;  %v306_v51 = vadd.f32 %v387_v26, %v257_v49 }
 0x107   :  { %315 = vst [vmem:[%s524_s3 + $0x10] sm:$0xff] %v311_v50  ;;  %v312_v52 = vmax.f32 %v306_v51, 0.0 }
 0x109   :  { %316 = vst [vmem:[%s524_s3 + $0x18] sm:$0xff] %v312_v52 }

// kernel: wresnet_forward.17
= control target key start
LH: loop header
LB: loop body
LE: loop exit
PB: predicated region body
PF: predicated region fallthrough
CT: control target
= control target key end

     0   :  { %vm52_vm0 = vcmask 261120   ;;  %s186_s1 = inlined_call_operand.vmem [shape: bf16[32,128], index: 1, kind: input, shape index: {}]   ;;  %s187_s0 = inlined_call_operand.vmem [shape: bf16[32,32], index: 0, kind: input, shape index: {}]   ;;  %s188_s2 = inlined_call_operand.vmem [shape: f32[1,128], index: 2, kind: input, shape index: {}]   ;;  %s189_s3 = inlined_call_operand.vmem [shape: f32[32,128], index: 3, kind: output, shape index: {}]  }
   0x1   :  { %v135_v0 = vld [vmem:[%s186_s1] sm:$0xff]   ;;  %v136_v1 = vld [vmem:[%s186_s1 + $0x8] sm:$0xff]  }
   0x2   :  { %127 = vmatprep.subr.bf16.mxu0 %v135_v0  ;;  %v137_v2 = vld [vmem:[%s187_s0] sm:$0xff]   ;;  %v138_v3 = vld [vmem:[%s187_s0 + $0x8] sm:$0xff]  }
   0x3   :  { %128 = vmatpush3.bf16.msra.mxu0 %v135_v0  ;;  %131 = vmatprep.mubr.msk.bf16.mxu0 %vm52_vm0, %v137_v2  ;;  %v116_v4 = vld [vmem:[%s188_s2] ss:$0 sm:$0xff] }
   0x4   :  { %129 = vmatprep.subr.bf16.mxu0 %v136_v1 }
   0x7   :  { %130 = vmatpush3.bf16.msra.mxu0 %v136_v1 }
   0xa   :  { %132 = vmatmul.mubr.msk.bf16.vlgmr.msra.gmra.mrb[0].mxu0 %vm52_vm0, %v138_v3 }
  0xdd   :  { %v133_v5 = vpop.f32.mrb[0].mxu0 }
  0xde   :  { %v102_v6 = vadd.f32 %v133_v5, %v116_v4  ;;  %v93_v7 = vpop.f32.mrb[1].mxu0 }
  0xdf   :  { %v94_v8 = vadd.f32 %v116_v4, %v93_v7  ;;  %v134_v9 = vpop.f32.mrb[2].mxu0 }
  0xe0   :  { %110 = vst [vmem:[%s189_s3 + $0x10] sm:$0xff] %v102_v6  ;;  %v105_v10 = vadd.f32 %v134_v9, %v116_v4  ;;  %v96_v11 = vpop.f32.mrb[3].mxu0 }
  0xe1   :  { %108 = vst [vmem:[%s189_s3] sm:$0xff] %v94_v8  ;;  %v97_v12 = vadd.f32 %v116_v4, %v96_v11 }
  0xe2   :  { %111 = vst [vmem:[%s189_s3 + $0x18] sm:$0xff] %v105_v10 }
  0xe3   :  { %109 = vst [vmem:[%s189_s3 + $0x8] sm:$0xff] %v97_v12 }

// kernel: wresnet_forward.18
= control target key start
LH: loop header
LB: loop body
LE: loop exit
PB: predicated region body
PF: predicated region fallthrough
CT: control target
= control target key end

     0   :  { %vm375_vm0 = vcmask 523264   ;;  %s912_s1 = inlined_call_operand.vmem [shape: bf16[576,128], index: 1, kind: input, shape index: {}]   ;;  %s913_s0 = inlined_call_operand.vmem [shape: bf16[32,576], index: 0, kind: input, shape index: {}]   ;;  %s914_s2 = inlined_call_operand.vmem [shape: f32[1,128], index: 2, kind: input, shape index: {}]   ;;  %s915_s3 = inlined_call_operand.vmem [shape: f32[32,128], index: 3, kind: input, shape index: {}]   ;;  %s916_s4 = inlined_call_operand.vmem [shape: f32[32,128], index: 4, kind: output, shape index: {}]  }
   0x1   :  { %v672_v0 = vld [vmem:[%s912_s1 + $0x40] sm:$0xff]   ;;  %v676_v4 = vld [vmem:[%s912_s1 + $0x48] sm:$0xff]   ;;  %v680_v8 = vld [vmem:[%s912_s1 + $0x50] sm:$0xff]  }
   0x2   :  { %v673_v1 = vld [vmem:[%s912_s1] sm:$0xff]   ;;  %598 = vmatprep.subr.bf16.mxu0 %v672_v0  ;;  %v677_v5 = vld [vmem:[%s912_s1 + $0x8] sm:$0xff]   ;;  %v681_v9 = vld [vmem:[%s912_s1 + $0x10] sm:$0xff]  }
   0x3   :  { %v674_v2 = vld [vmem:[%s912_s1 + $0xc0] sm:$0xff]   ;;  %599 = vmatpush3.bf16.msra.mxu0 %v673_v1  ;;  %v678_v6 = vld [vmem:[%s912_s1 + $0xc8] sm:$0xff]   ;;  %v682_v10 = vld [vmem:[%s912_s1 + $0xd0] sm:$0xff]  }
   0x4   :  { %v675_v3 = vld [vmem:[%s912_s1 + $0x80] sm:$0xff]   ;;  %626 = vmatprep.subr.bf16.mxu1 %v674_v2  ;;  %600 = vmatprep.subr.bf16.mxu0 %v676_v4  ;;  %v679_v7 = vld [vmem:[%s912_s1 + $0x88] sm:$0xff]   ;;  %v683_v11 = vld [vmem:[%s912_s1 + $0x90] sm:$0xff]  }
   0x5   :  { %627 = vmatpush3.bf16.msra.mxu1 %v675_v3  ;;  %v684_v12 = vld [vmem:[%s912_s1 + $0x58] sm:$0xff]   ;;  %v688_v16 = vld [vmem:[%s912_s1 + $0x60] sm:$0xff]   ;;  %v692_v20 = vld [vmem:[%s912_s1 + $0x68] sm:$0xff]  }
   0x6   :  { %628 = vmatprep.subr.bf16.mxu1 %v678_v6  ;;  %v685_v13 = vld [vmem:[%s912_s1 + $0x18] sm:$0xff]   ;;  %v689_v17 = vld [vmem:[%s912_s1 + $0x20] sm:$0xff]   ;;  %v693_v21 = vld [vmem:[%s912_s1 + $0x28] sm:$0xff]  }
   0x7   :  { %601 = vmatpush3.bf16.msra.mxu0 %v677_v5  ;;  %v686_v14 = vld [vmem:[%s912_s1 + $0xd8] sm:$0xff]   ;;  %v690_v18 = vld [vmem:[%s912_s1 + $0xe0] sm:$0xff]   ;;  %v694_v22 = vld [vmem:[%s912_s1 + $0xe8] sm:$0xff]  }
   0x8   :  { %602 = vmatprep.subr.bf16.mxu0 %v680_v8  ;;  %v687_v15 = vld [vmem:[%s912_s1 + $0x98] sm:$0xff]   ;;  %v691_v19 = vld [vmem:[%s912_s1 + $0xa0] sm:$0xff]   ;;  %v695_v23 = vld [vmem:[%s912_s1 + $0xa8] sm:$0xff]  }
   0x9   :  { %629 = vmatpush3.bf16.msra.mxu1 %v679_v7  ;;  %v696_v24 = vld [vmem:[%s912_s1 + $0x70] sm:$0xff]   ;;  %v700_v28 = vld [vmem:[%s912_s1 + $0x78] sm:$0xff]   ;;  %v707_v34 = vld [vmem:[%s912_s1 + $0x100] sm:$0xff]  }
   0xa   :  { %630 = vmatprep.subr.bf16.mxu1 %v682_v10  ;;  %v697_v25 = vld [vmem:[%s912_s1 + $0x30] sm:$0xff]   ;;  %v701_v29 = vld [vmem:[%s912_s1 + $0x38] sm:$0xff]   ;;  %v710_v36 = vld [vmem:[%s913_s0 + $0xc] ss:$20 sps:$4 sm:$0xff]  }
   0xb   :  { %603 = vmatpush3.bf16.msra.mxu0 %v681_v9  ;;  %v698_v26 = vld [vmem:[%s912_s1 + $0xf0] sm:$0xff]   ;;  %v702_v30 = vld [vmem:[%s912_s1 + $0xf8] sm:$0xff]   ;;  %v711_v37 = vld [vmem:[%s912_s1 + $0x108] sm:$0xff]   ;;  %463 = vmatprep.mubr.bf16.mxu1 %v710_v36 }
   0xc   :  { %604 = vmatprep.subr.bf16.mxu0 %v684_v12  ;;  %v699_v27 = vld [vmem:[%s912_s1 + $0xb0] sm:$0xff]   ;;  %v705_v32 = vld [vmem:[%s913_s0 + $0x4] ss:$20 sps:$4 sm:$0xff]   ;;  %v708_v35 = vld [vmem:[%s913_s0 + $0x8] ss:$20 sps:$4 sm:$0xff]  }
   0xd   :  { %631 = vmatpush3.bf16.msra.mxu1 %v683_v11  ;;  %v703_v31 = vld [vmem:[%s913_s0] ss:$20 sps:$4 sm:$0xff]   ;;  %v706_v33 = vld [vmem:[%s912_s1 + $0xb8] sm:$0xff]   ;;  %414 = vmatprep.mubr.bf16.mxu0 %v705_v32  ;;  %v718_v42 = vld [vmem:[%s913_s0 + $0x30] ss:$20 sps:$4 sm:$0xff]  }
   0xe   :  { %632 = vmatprep.subr.bf16.mxu1 %v686_v14  ;;  %v712_v38 = vld [vmem:[%s913_s0 + $0x2c] ss:$20 sps:$4 sm:$0xff]   ;;  %v714_v39 = vld [vmem:[%s913_s0 + $0x28] ss:$20 sps:$4 sm:$0xff]   ;;  %v715_v40 = vld [vmem:[%s912_s1 + $0x110] sm:$0xff]  }
   0xf   :  { %605 = vmatpush3.bf16.msra.mxu0 %v685_v13  ;;  %v716_v41 = vld [vmem:[%s913_s0 + $0x34] ss:$20 sps:$4 sm:$0xff]   ;;  %v719_v43 = vld [vmem:[%s912_s1 + $0x118] sm:$0xff]   ;;  %v720_v44 = vld [vmem:[%s913_s0 + $0x10] ss:$20 sps:$4 sm:$0xff]  }
  0x10   :  { %606 = vmatprep.subr.bf16.mxu0 %v688_v16  ;;  %v721_v45 = vld [vmem:[%s913_s0 + $0x38] ss:$20 sps:$4 sm:$0xff]   ;;  %v549_v47 = vld [vmem:[%s914_s2] ss:$0 sm:$0xff] }
  0x11   :  { %633 = vmatpush3.bf16.msra.mxu1 %v687_v15  ;;  %v531_v15 = vld [vmem:[%s915_s3 + $0x10] sm:$0xff] }
  0x12   :  { %634 = vmatprep.subr.bf16.mxu1 %v690_v18 }
  0x13   :  { %607 = vmatpush3.bf16.msra.mxu0 %v689_v17 }
  0x14   :  { %608 = vmatprep.subr.bf16.mxu0 %v692_v20 }
  0x15   :  { %635 = vmatpush3.bf16.msra.mxu1 %v691_v19  ;;  %v529_v19 = vld [vmem:[%s915_s3] sm:$0xff] }
  0x16   :  { %636 = vmatprep.subr.bf16.mxu1 %v694_v22  ;;  %v532_v22 = vld [vmem:[%s915_s3 + $0x18] sm:$0xff] }
  0x17   :  { %609 = vmatpush3.bf16.msra.mxu0 %v693_v21 }
  0x18   :  { %610 = vmatprep.subr.bf16.mxu0 %v696_v24 }
  0x19   :  { %637 = vmatpush3.bf16.msra.mxu1 %v695_v23 }
  0x1a   :  { %638 = vmatprep.subr.bf16.mxu1 %v698_v26  ;;  %v530_v26 = vld [vmem:[%s915_s3 + $0x8] sm:$0xff] }
  0x1b   :  { %611 = vmatpush3.bf16.msra.mxu0 %v697_v25 }
  0x1c   :  { %612 = vmatprep.subr.bf16.mxu0 %v700_v28 }
  0x1d   :  { %639 = vmatpush3.bf16.msra.mxu1 %v699_v27 }
  0x1e   :  { %640 = vmatprep.subr.bf16.mxu1 %v702_v30 }
  0x1f   :  { %613 = vmatpush3.bf16.msra.mxu0 %v701_v29 }
  0x20   :  { %660 = vmatprep.subr.bf16.mxu0 %v707_v34 }
  0x21   :  { %641 = vmatpush3.bf16.msra.mxu1 %v706_v33 }
  0x22   :  { %415 = vmatmul.mubr.bf16.vlgmr.msra.gmra.mrb[0].mxu0 %v703_v31 }
  0x23   :  { %661 = vmatpush3.bf16.msra.mxu0 %v707_v34  ;;  %422 = vmatprep.mubr.bf16.mxu0 %v712_v38 }
  0x24   :  { %464 = vmatmul.mubr.bf16.vlgmr.msra.gmra.mrb[0].mxu1 %v708_v35  ;;  %662 = vmatprep.subr.bf16.mxu0 %v711_v37 }
  0x25   :  { %471 = vmatprep.mubr.bf16.mxu1 %v716_v41 }
  0x27   :  { %663 = vmatpush3.bf16.msra.mxu0 %v711_v37 }
  0x28   :  { %664 = vmatprep.subr.bf16.mxu0 %v715_v40 }
  0x2a   :  { %423 = vmatmul.mubr.bf16.gmra.mrb[4].mxu0 %v714_v39 }
  0x2b   :  { %668 = vmatprep.mubr.msk.bf16.mxu0 %vm375_vm0, %v720_v44  ;;  %665 = vmatpush3.bf16.msra.mxu0 %v715_v40 }
  0x2c   :  { %472 = vmatmul.mubr.bf16.gmra.mrb[4].mxu1 %v718_v42  ;;  %666 = vmatprep.subr.bf16.mxu0 %v719_v43 }
  0x2f   :  { %667 = vmatpush3.bf16.msra.mxu0 %v719_v43 }
  0x32   :  { %669 = vmatmul.mubr.msk.bf16.vlgmr.msra.gmra.mrb[8].mxu0 %vm375_vm0, %v721_v45 }
  0xf5   :  { %v614_v46 = vpop.f32.mrb[0].mxu0 }
  0xf6   :  { %v615_v48 = vpop.f32.mrb[1].mxu0 }
  0xf7   :  { %v616_v49 = vadd.f32 %v615_v48, %v614_v46  ;;  %v617_v50 = vpop.f32.mrb[2].mxu0  ;;  %v642_v51 = vpop.f32.mrb[0].mxu1 }
  0xf8   :  { %v618_v52 = vpop.f32.mrb[3].mxu0  ;;  %v643_v55 = vpop.f32.mrb[1].mxu1 }
  0xf9   :  { %v417_v53 = vadd.f32 %v616_v49, %v549_v47  ;;  %v619_v54 = vadd.f32 %v618_v52, %v617_v50  ;;  %v644_v56 = vadd.f32 %v643_v55, %v642_v51  ;;  %v645_v57 = vpop.f32.mrb[2].mxu1 }
  0xfa   :  { %v646_v59 = vpop.f32.mrb[3].mxu1 }
  0xfb   :  { %v420_v58 = vadd.f32 %v619_v54, %v549_v47  ;;  %v647_v60 = vadd.f32 %v646_v59, %v645_v57  ;;  %v466_v61 = vadd.f32 %v644_v56, %v417_v53 }
  0xfd   :  { %v620_v62 = vpop.f32.mrb[4].mxu0  ;;  %v469_v0 = vadd.f32 %v647_v60, %v420_v58 }
  0xfe   :  { %v621_v63 = vpop.f32.mrb[5].mxu0 }
  0xff   :  { %v622_v1 = vadd.f32 %v621_v63, %v620_v62  ;;  %v623_v2 = vpop.f32.mrb[6].mxu0  ;;  %v648_v3 = vpop.f32.mrb[4].mxu1 }
 0x100   :  { %v624_v4 = vpop.f32.mrb[7].mxu0  ;;  %v649_v7 = vpop.f32.mrb[5].mxu1 }
 0x101   :  { %v425_v5 = vadd.f32 %v622_v1, %v549_v47  ;;  %v625_v6 = vadd.f32 %v624_v4, %v623_v2  ;;  %v650_v8 = vadd.f32 %v649_v7, %v648_v3  ;;  %v651_v9 = vpop.f32.mrb[6].mxu1 }
 0x102   :  { %v652_v11 = vpop.f32.mrb[7].mxu1 }
 0x103   :  { %v428_v10 = vadd.f32 %v625_v6, %v549_v47  ;;  %v653_v12 = vadd.f32 %v652_v11, %v651_v9  ;;  %v474_v13 = vadd.f32 %v650_v8, %v425_v5 }
 0x105   :  { %v670_v14 = vpop.f32.mrb[8].mxu0  ;;  %v477_v16 = vadd.f32 %v653_v12, %v428_v10 }
 0x106   :  { %v523_v17 = vadd.f32 %v670_v14, %v474_v13  ;;  %v514_v18 = vpop.f32.mrb[9].mxu0 }
 0x107   :  { %v515_v20 = vadd.f32 %v514_v18, %v466_v61  ;;  %v671_v21 = vpop.f32.mrb[10].mxu0 }
 0x108   :  { %v535_v23 = vadd.f32 %v531_v15, %v523_v17  ;;  %v526_v24 = vadd.f32 %v671_v21, %v477_v16  ;;  %v517_v25 = vpop.f32.mrb[11].mxu0 }
 0x109   :  { %v533_v27 = vadd.f32 %v529_v19, %v515_v20  ;;  %v518_v28 = vadd.f32 %v517_v25, %v469_v0 }
 0x10a   :  { %v539_v29 = vmax.f32 %v535_v23, 0.0  ;;  %v536_v30 = vadd.f32 %v532_v22, %v526_v24 }
 0x10b   :  { %v537_v31 = vmax.f32 %v533_v27, 0.0  ;;  %v534_v32 = vadd.f32 %v530_v26, %v518_v28 }
 0x10c   :  { %543 = vst [vmem:[%s916_s4 + $0x10] sm:$0xff] %v539_v29  ;;  %v540_v33 = vmax.f32 %v536_v30, 0.0 }
 0x10d   :  { %541 = vst [vmem:[%s916_s4] sm:$0xff] %v537_v31  ;;  %v538_v34 = vmax.f32 %v534_v32, 0.0 }
 0x10e   :  { %544 = vst [vmem:[%s916_s4 + $0x18] sm:$0xff] %v540_v33 }
 0x10f   :  { %542 = vst [vmem:[%s916_s4 + $0x8] sm:$0xff] %v538_v34 }

// kernel: wresnet_forward.19
= control target key start
LH: loop header
LB: loop body
LE: loop exit
PB: predicated region body
PF: predicated region fallthrough
CT: control target
= control target key end

     0   :  { %v214_v3 = vmov 0.0|0.0   ;;  %vm215_vm0 = vmmov 0   ;;  %v216_v6 = vmov 0.0   ;;  %vm19_vm1 = vcmask 523264   ;;  %s294_s0 = inlined_call_operand.vmem [shape: f32[2,16,64], index: 0, kind: input, shape index: {}]   ;;  %s295_s1 = inlined_call_operand.vmem [shape: f32[64,128], index: 1, kind: input, shape index: {}]   ;;  %s296_s2 = inlined_call_operand.vmem [shape: f32[1,128], index: 2, kind: input, shape index: {}]   ;;  %s297_s3 = inlined_call_operand.hbm [shape: f32[2,128], index: 3, kind: output, shape index: {}]  }
   0x1   :  { %v38_v0 = vld [vmem:[%s295_s1] sm:$0xff]  ;;  %v39_v1 = vld [vmem:[%s295_s1 + $0x8] sm:$0xff]  ;;  %v40_v2 = vld [vmem:[%s295_s1 + $0x10] sm:$0xff]  ;;  %174 = vmatprep.subr.bf16.mxu0 %v214_v3  ;;  %171 = vmatprep.mubr.msk.f32.mxu0 %vm215_vm0, %v216_v6 }
   0x2   :  { %v175_v4 = vpack.c.bf16 %v39_v1, %v38_v0  ;;  %v41_v5 = vld [vmem:[%s295_s1 + $0x18] sm:$0xff]  ;;  %v15_v7 = vld [vmem:[%s294_s0] sm:$0xff]  ;;  %v16_v9 = vld [vmem:[%s294_s0 + $0x8] sm:$0xff] }
   0x3   :  { %v178_v8 = vpack.c.bf16 %v41_v5, %v40_v2  ;;  %v17_v10 = vld [vmem:[%s294_s0 + $0x10] sm:$0xff]  ;;  %v18_v11 = vld [vmem:[%s294_s0 + $0x18] sm:$0xff]  ;;  %v20_v12 = vsel %vm19_vm1, %v15_v7, 0.0  ;;  %v42_v13 = vld [vmem:[%s295_s1 + $0x20] sm:$0xff]  ;;  %v21_v15 = vsel %vm19_vm1, %v16_v9, 0.0 }
   0x4   :  { %176 = vmatpush3.bf16.msra.mxu0 %v175_v4  ;;  %v43_v14 = vld [vmem:[%s295_s1 + $0x28] sm:$0xff]  ;;  %v29_v16 = vsel %vm19_vm1, %v17_v10, 0.0  ;;  %v30_v17 = vsel %vm19_vm1, %v18_v11, 0.0  ;;  %v22_v18 = vadd.f32 %v21_v15, %v20_v12 }
   0x5   :  { %177 = vmatprep.subr.bf16.mxu0 %v214_v3  ;;  %v31_v19 = vadd.f32 %v30_v17, %v29_v16 }
   0x6   :  { %8 = vsyncpa [#allocation3], 0  ;;  %v181_v20 = vpack.c.bf16 %v43_v14, %v42_v13  ;;  %v23_v21 = vrot.slane %v22_v18, 4  ;;  %v44_v23 = vld [vmem:[%s295_s1 + $0x30] sm:$0xff]  ;;  %v45_v24 = vld [vmem:[%s295_s1 + $0x38] sm:$0xff]  ;;  %vm55_vm2 = vcmask 1041409  }
   0x7   :  { %v32_v22 = vrot.slane %v31_v19, 4  ;;  %v184_v27 = vpack.c.bf16 %v45_v24, %v44_v23  ;;  %v144_v37 = vld [vmem:[%s296_s2] ss:$0 sm:$0xff]  ;;  %s217_s9 = smov [#allocation2]  }
   0x8   :  { %179 = vmatpush3.bf16.msra.mxu0 %v178_v8  ;;  %v24_v25 = vadd.f32 %v23_v21, %v22_v18  ;;  %s136_s10 = sshll.u32 %s217_s9, 4  ;;  %s137_s10 = int_to_ptr.vmem [resolvable:$true] %s136_s10 }
   0x9   :  { %180 = vmatprep.subr.bf16.mxu0 %v214_v3  ;;  %v33_v26 = vadd.f32 %v32_v22, %v31_v19  ;;  %s190_s11 = scalar_lea.vmem %s137_s10, 32  ;;  %p195_p1 = scmp.lt.s32.totalorder %s137_s10, %s137_s10 }
   0xa   :  { %v25_v28 = vrot.slane %v24_v25, 2  ;;  %p191_p0 = scmp.ne.s32.totalorder %s137_s10, %s190_s11  ;;  %p196_p2 = scmp.lt.s32.totalorder %s190_s11, %s190_s11 }
   0xb   :  { %v34_v29 = vrot.slane %v33_v26, 2 }
   0xc   :  { %182 = vmatpush3.bf16.msra.mxu0 %v181_v20  ;;  %v26_v30 = vadd.f32 %v25_v28, %v24_v25  ;;  %p197_p3 = por %p196_p2, %p195_p1 }
   0xd   :  { %183 = vmatprep.subr.bf16.mxu0 %v214_v3  ;;  %v35_v31 = vadd.f32 %v34_v29, %v33_v26 }
   0xe   :  { %v27_v32 = vrot.slane %v26_v30, 1  ;;  %p198_p4 = pnand %p197_p3, %p191_p0 }
   0xf   :  { %v36_v33 = vrot.slane %v35_v31, 1 }
  0x10   :  { %185 = vmatpush3.bf16.msra.mxu0 %v184_v27  ;;  %v28_v34 = vadd.f32 %v27_v32, %v26_v30 }
  0x11   :  { %v37_v35 = vadd.f32 %v36_v33, %v35_v31 }
  0x13   :  { %v56_v36 = vsel %vm55_vm2, %v37_v35, %v28_v34 }
  0x14   :  { %172 = vmatmul.mubr.msk.f32.vlgmr.msra.gmra.mrb[0].mxu0 %vm19_vm1, %v56_v36 }
  0xe7   :  { %v125_v38 = vpop.f32.mrb[0].mxu0 }
  0xe8   :  { %v126_v39 = vadd.f32 %v144_v37, %v125_v38  ;;  %v173_v40 = vpop.f32.mrb[1].mxu0 }
  0xea   :  { %129 = vst [vmem:[#allocation2] sm:$0x3] %v126_v39 }
  0xeb   :  { %201 = shalt.err (!%p198_p4)
}
  0xec   :  { %s202_s14 = scalar_lea.hbm %s297_s3, 32 }
  0xed   :  { %p203_p5 = scmp.ne.s32.totalorder %s297_s3, %s202_s14  ;;  %p206_p6 = scmp.lt.u32.totalorder %s202_s14, %s297_s3 }
  0xef   :  { %p208_p7 = pnand %p206_p6, %p203_p5 }
  0xf1   :  { %211 = shalt.err (!%p208_p7)
}
  0xf2   :  { %139 = dma.vmem_to_hbm [thread:$0]  %s137_s10, 32, %s297_s3, [#allocation3]  }
  0xf3   :  { %212 = dma.done.wait [#allocation3], 32  }
  0xf4   :  { %213 = vsyncadd [#allocation3], 4294967264 }
  0xf5   :  { %143 = vsyncpa [#allocation3], 1 }

</bundles_post_ra>
